<compile_context>
chip_gen: v5e
topology: v5e:2x2
jax: 0.10.0
libtpu: 0.0.40
codegen_flags: <defaults>
</compile_context>

<pallas_src>
import functools

import jax
import jax.numpy as jnp
from jax import lax
from jax.experimental import pallas as pl
from jax.experimental.pallas import tpu as pltpu


NUM_HEAD_ROWS = 8  # layer-4 output rows, padded to one sublane tile (rows 0/1 used)


def _gelu_exact(x):
    # PyTorch nn.GELU() default (approximate='none'): 0.5*x*(1+erf(x/sqrt(2)))
    return 0.5 * x * (1.0 + lax.erf(x * 0.7071067811865476))


def _gelu_tanh(x):
    # Opt-in tanh approximation (EUP path); slight deviation from exact erf.
    return jax.nn.gelu(x, approximate=True)


def _round_up(x, m):
    return ((x + m - 1) // m) * m


def _choose_block_b(B, block_b_max):
    """Pick a lane-friendly batch tile (multiple of 128, power of two)."""
    cap = max(128, min(int(block_b_max), pl.next_power_of_2(B)))
    # v7x has 2 TensorCores: guarantee >= 2 parallel grid steps once the batch
    # is large enough to split.
    if B >= 256:
        cap = min(cap, max(128, pl.next_power_of_2(pl.cdiv(B, 2))))
    # Prefer a tile that divides B exactly -> no jnp.pad copy in the wrapper.
    for bb in (1024, 512, 256, 128):
        if bb <= cap and B % bb == 0:
            return bb
    return cap


# --------------------------------------------------------------------------
# Kernel: fused two-head critic MLP.
#   repr_ref : (block_b, repr_dim)
#   act_ref  : (block_b, action_dim)
#   w1r_ref  : (repr_dim, 2*unit)     layer-1 weights, repr rows, both heads
#   w1a_ref  : (action_dim, 2*unit)   layer-1 weights, action rows, both heads
#   w23_ref  : (2, 2*unit, 2*unit)    block-diagonal layers 2 and 3
#   w4t_ref  : (8, 2*unit)            transposed fused layer 4 (row0=q1, row1=q2)
#   b123_ref : (3, 2*unit)            biases of layers 1..3 (fused across heads)
#   b4_ref   : (8, 1)                 layer-4 biases (row0=q1, row1=q2)
#   out_ref  : (8, block_b)           lane-dense slab: row0=q1, row1=q2
# --------------------------------------------------------------------------
def _critic_kernel(repr_ref, act_ref, w1r_ref, w1a_ref, w23_ref, w4t_ref,
                   b123_ref, b4_ref, out_ref, *, approximate_gelu):
    gelu = _gelu_tanh if approximate_gelu else _gelu_exact
    cdt = w1r_ref.dtype  # matmul operand dtype (bf16 by default, f32 accum)

    r = repr_ref[...].astype(cdt)
    a = act_ref[...].astype(cdt)

    # Layer 1 (host-side concat folded into two partial matmuls).
    x = (jnp.dot(r, w1r_ref[...], preferred_element_type=jnp.float32)
         + jnp.dot(a, w1a_ref[...], preferred_element_type=jnp.float32)
         + b123_ref[0:1, :])
    x = gelu(x)

    # Layer 2 (block-diagonal: both heads in one 128-wide matmul).
    x = (jnp.dot(x.astype(cdt), w23_ref[0], preferred_element_type=jnp.float32)
         + b123_ref[1:2, :])
    x = gelu(x)

    # Layer 3.
    x = (jnp.dot(x.astype(cdt), w23_ref[1], preferred_element_type=jnp.float32)
         + b123_ref[2:3, :])
    x = gelu(x)

    # Layer 4: transposed projection -> (8, block_b) lane-dense slab
    # (heads on sublanes, batch on lanes); writeback is 64x smaller than a
    # (block_b, 128) slab.  Contract both operands on their last dim (A @ B^T).
    y = lax.dot_general(w4t_ref[...], x.astype(cdt),
                        dimension_numbers=(((1,), (1,)), ((), ())),
                        preferred_element_type=jnp.float32)
    out_ref[...] = y + b4_ref[...]


# --------------------------------------------------------------------------
# One-time parameter packing (outside the kernel).
# params*: (w1, b1, w2, b2, w3, b3, w4, b4) with weights (in, out), biases (1, out).
# --------------------------------------------------------------------------
def pack_critic_params(params1, params2, repr_dim, action_dim, unit_dim=64,
                       matmul_dtype=jnp.bfloat16):
    w1_1, b1_1, w2_1, b2_1, w3_1, b3_1, w4_1, b4_1 = params1
    w1_2, b1_2, w2_2, b2_2, w3_2, b3_2, w4_2, b4_2 = params2
    F = 2 * unit_dim

    # Layer 1: heads side-by-side, then split row-wise into repr / action parts.
    w1 = jnp.concatenate([w1_1, w1_2], axis=1)                 # (repr+act, F)
    w1r = w1[:repr_dim].astype(matmul_dtype)                   # (repr_dim, F)
    w1a = w1[repr_dim:repr_dim + action_dim].astype(matmul_dtype)

    def blkdiag(a, b):
        z = jnp.zeros((unit_dim, unit_dim), jnp.float32)
        top = jnp.concatenate([a, z], axis=1)
        bot = jnp.concatenate([z, b], axis=1)
        return jnp.concatenate([top, bot], axis=0)             # (F, F)

    w23 = jnp.stack([blkdiag(w2_1, w2_2),
                     blkdiag(w3_1, w3_2)], axis=0).astype(matmul_dtype)  # (2,F,F)

    # Layer 4, transposed: row h holds head-h output weights over the fused F
    # features (rows 2..7 are zero padding to a full sublane tile).
    w4t = jnp.zeros((NUM_HEAD_ROWS, F), jnp.float32)
    w4t = w4t.at[0, :unit_dim].set(w4_1[:, 0])
    w4t = w4t.at[1, unit_dim:].set(w4_2[:, 0])
    w4t = w4t.astype(matmul_dtype)

    b1 = jnp.concatenate([b1_1, b1_2], axis=1)                 # (1, F)
    b2 = jnp.concatenate([b2_1, b2_2], axis=1)
    b3 = jnp.concatenate([b3_1, b3_2], axis=1)
    b123 = jnp.concatenate([b1, b2, b3], axis=0).astype(jnp.float32)  # (3, F)

    b4 = jnp.zeros((NUM_HEAD_ROWS, 1), jnp.float32)
    b4 = b4.at[0, 0].set(b4_1[0, 0]).at[1, 0].set(b4_2[0, 0])

    return w1r, w1a, w23, w4t, b123, b4


# --------------------------------------------------------------------------
# Wrapper: 1-D parallel batch grid, resident weights, (8, B) lane-dense output.
# --------------------------------------------------------------------------
@functools.partial(jax.jit, static_argnames=("block_b_max", "approximate_gelu"))
def critic_forward(repr_x, action, packed_params, *, block_b_max=1024,
                   approximate_gelu=False):
    w1r, w1a, w23, w4t, b123, b4 = packed_params
    B, repr_dim = repr_x.shape
    action_dim = action.shape[1]
    F = w1r.shape[1]
    NH = w4t.shape[0]

    block_b = _choose_block_b(B, block_b_max)
    Bp = _round_up(B, block_b)
    if Bp != B:
        # Only hit for ragged / tiny batches; typical power-of-two SAC batches
        # take a divisor tile above and skip this copy entirely.
        repr_x = jnp.pad(repr_x, ((0, Bp - B), (0, 0)))
        action = jnp.pad(action, ((0, Bp - B), (0, 0)))
    grid = (Bp // block_b,)

    # Advisory cost estimate so XLA schedules/overlaps the custom call.
    flops = int(2 * Bp * F * (repr_dim + action_dim + 2 * F) + 2 * Bp * F * NH)
    transcendentals = int(3 * Bp * F)
    bytes_accessed = int(
        Bp * (repr_dim + action_dim) * repr_x.dtype.itemsize
        + NH * Bp * 4
        + (w1r.size + w1a.size + w23.size + w4t.size) * w1r.dtype.itemsize
        + (b123.size + b4.size) * 4)

    kernel = functools.partial(_critic_kernel, approximate_gelu=approximate_gelu)

    out = pl.pallas_call(
        kernel,
        out_shape=jax.ShapeDtypeStruct((NH, Bp), jnp.float32),
        grid=grid,
        in_specs=[
            pl.BlockSpec((block_b, repr_dim), lambda i: (i, 0)),
            pl.BlockSpec((block_b, action_dim), lambda i: (i, 0)),
            pl.BlockSpec((repr_dim, F), lambda i: (0, 0)),
            pl.BlockSpec((action_dim, F), lambda i: (0, 0)),
            pl.BlockSpec((2, F, F), lambda i: (0, 0, 0)),
            pl.BlockSpec((NH, F), lambda i: (0, 0)),
            pl.BlockSpec((3, F), lambda i: (0, 0)),
            pl.BlockSpec((NH, 1), lambda i: (0, 0)),
        ],
        out_specs=pl.BlockSpec((NH, block_b), lambda i: (0, i)),
        compiler_params=pltpu.CompilerParams(
            dimension_semantics=("parallel",)),
        cost_estimate=pl.CostEstimate(flops=flops,
                                      transcendentals=transcendentals,
                                      bytes_accessed=bytes_accessed),
    )(repr_x, action, w1r, w1a, w23, w4t, b123, b4)

    q1 = out[0, :B].reshape(B, 1)
    q2 = out[1, :B].reshape(B, 1)
    return q1, q2


# --------------------------------------------------------------------------
# Init / reference (pure JAX, unfused) for the self-check.
# TODO(synk): the AdamW optimizer of the PyTorch module is training-state only
# and is not part of the forward pass, so it is not implemented here.
# --------------------------------------------------------------------------
def _init_head(key, in_dim, unit_dim):
    dims = [(in_dim, unit_dim), (unit_dim, unit_dim), (unit_dim, unit_dim), (unit_dim, 1)]
    params = []
    for din, dout in dims:
        key, kw, kb = jax.random.split(key, 3)
        bound = 1.0 / jnp.sqrt(din)
        w = jax.random.uniform(kw, (din, dout), jnp.float32, -bound, bound)
        b = jax.random.uniform(kb, (1, dout), jnp.float32, -bound, bound)
        params += [w, b]
    return tuple(params), key


def _reference_head(h, params, matmul_dtype=jnp.float32):
    """Unfused reference; matmul_dtype=bf16 emulates the kernel's MXU numerics."""
    w1, b1, w2, b2, w3, b3, w4, b4 = params

    def mm(x, w):
        return jnp.dot(x.astype(matmul_dtype), w.astype(matmul_dtype),
                       preferred_element_type=jnp.float32)

    x = _gelu_exact(mm(h, w1) + b1)
    x = _gelu_exact(mm(x, w2) + b2)
    x = _gelu_exact(mm(x, w3) + b3)
    return mm(x, w4) + b4


if __name__ == "__main__":
    # Small shapes consistent with the module.
    B, repr_dim, action_dim, unit_dim = 8, 32, 4, 64

    key = jax.random.PRNGKey(0)
    key, k_repr, k_act = jax.random.split(key, 3)
    repr_x = jax.random.normal(k_repr, (B, repr_dim), jnp.float32)
    action = jax.random.normal(k_act, (B, action_dim), jnp.float32)

    params1, key = _init_head(key, repr_dim + action_dim, unit_dim)
    params2, key = _init_head(key, repr_dim + action_dim, unit_dim)

    packed = pack_critic_params(params1, params2, repr_dim, action_dim, unit_dim)

    q1, q2 = critic_forward(repr_x, action, packed)
    jax.block_until_ready((q1, q2))
    assert q1.shape == (B, 1) and q2.shape == (B, 1)

    h = jnp.concatenate([repr_x, action], axis=1)

    # Tight check against a reference using the same bf16 matmul operands.
    q1_emu = _reference_head(h, params1, matmul_dtype=jnp.bfloat16)
    q2_emu = _reference_head(h, params2, matmul_dtype=jnp.bfloat16)
    assert jnp.allclose(q1, q1_emu, atol=1e-4, rtol=1e-4)
    assert jnp.allclose(q2, q2_emu, atol=1e-4, rtol=1e-4)

    # Loose check against the exact f32 PyTorch-semantics reference
    # (difference = bf16 weight/activation quantization only).
    q1_f32 = _reference_head(h, params1, matmul_dtype=jnp.float32)
    q2_f32 = _reference_head(h, params2, matmul_dtype=jnp.float32)
    assert jnp.allclose(q1, q1_f32, atol=3e-2, rtol=3e-2)
    assert jnp.allclose(q2, q2_f32, atol=3e-2, rtol=3e-2)

    print("KERNEL_OK")
</pallas_src>

<mosaic_0001>
module attributes {stable_mosaic.version = 11 : i64} {
  func.func @_critic_kernel(%arg0: i32, %arg1: memref<128x32xf32, #tpu.memory_space<vmem>>, %arg2: memref<128x4xf32, #tpu.memory_space<vmem>>, %arg3: memref<32x128xbf16, #tpu.memory_space<vmem>>, %arg4: memref<4x128xbf16, #tpu.memory_space<vmem>>, %arg5: memref<2x128x128xbf16, #tpu.memory_space<vmem>>, %arg6: memref<8x128xbf16, #tpu.memory_space<vmem>>, %arg7: memref<3x128xf32, #tpu.memory_space<vmem>>, %arg8: memref<8x1xf32, #tpu.memory_space<vmem>>, %arg9: memref<8x128xf32, #tpu.memory_space<vmem>>) attributes {dimension_semantics = [#tpu.dimension_semantics<parallel>], iteration_bounds = array<i64: 1>, scalar_prefetch = 0 : i64, scratch_operands = 0 : i64, tpu.core_type = #tpu.core_type<tc>, window_params = [{transform_indices = @transform_0, window_bounds = array<i64: 128, 32>}, {transform_indices = @transform_1, window_bounds = array<i64: 128, 4>}, {pipeline_mode = #tpu.pipeline_mode<synchronous>, transform_indices = @transform_2, window_bounds = array<i64: 32, 128>}, {pipeline_mode = #tpu.pipeline_mode<synchronous>, transform_indices = @transform_3, window_bounds = array<i64: 4, 128>}, {pipeline_mode = #tpu.pipeline_mode<synchronous>, transform_indices = @transform_4, window_bounds = array<i64: 2, 128, 128>}, {pipeline_mode = #tpu.pipeline_mode<synchronous>, transform_indices = @transform_5, window_bounds = array<i64: 8, 128>}, {pipeline_mode = #tpu.pipeline_mode<synchronous>, transform_indices = @transform_6, window_bounds = array<i64: 3, 128>}, {pipeline_mode = #tpu.pipeline_mode<synchronous>, transform_indices = @transform_7, window_bounds = array<i64: 8, 1>}, {transform_indices = @transform_8, window_bounds = array<i64: 8, 128>}]} {
    %c0 = arith.constant 0 : index
    %c0_0 = arith.constant 0 : index
    %0 = vector.load %arg1[%c0, %c0_0] : memref<128x32xf32, #tpu.memory_space<vmem>>, vector<128x32xf32>
    %1 = arith.truncf %0 : vector<128x32xf32> to vector<128x32xbf16>
    %c0_1 = arith.constant 0 : index
    %c0_2 = arith.constant 0 : index
    %2 = vector.load %arg2[%c0_1, %c0_2] : memref<128x4xf32, #tpu.memory_space<vmem>>, vector<128x4xf32>
    %3 = arith.truncf %2 : vector<128x4xf32> to vector<128x4xbf16>
    %c0_3 = arith.constant 0 : index
    %c0_4 = arith.constant 0 : index
    %4 = vector.load %arg3[%c0_3, %c0_4] : memref<32x128xbf16, #tpu.memory_space<vmem>>, vector<32x128xbf16>
    %cst = arith.constant dense<0.000000e+00> : vector<128x128xf32>
    %5 = tpu.matmul %1, %4, %cst {dimension_numbers = #tpu.dot_dimension_numbers<[1], [0], [0], [1], [0, 0, 1, 1], [], []>} : vector<128x32xbf16>, vector<32x128xbf16>, vector<128x128xf32> -> vector<128x128xf32>
    %c0_5 = arith.constant 0 : index
    %c0_6 = arith.constant 0 : index
    %6 = vector.load %arg4[%c0_5, %c0_6] : memref<4x128xbf16, #tpu.memory_space<vmem>>, vector<4x128xbf16>
    %cst_7 = arith.constant dense<0.000000e+00> : vector<128x128xf32>
    %7 = tpu.matmul %3, %6, %cst_7 {dimension_numbers = #tpu.dot_dimension_numbers<[1], [0], [0], [1], [0, 0, 1, 1], [], []>} : vector<128x4xbf16>, vector<4x128xbf16>, vector<128x128xf32> -> vector<128x128xf32>
    %8 = arith.addf %5, %7 : vector<128x128xf32>
    %c0_8 = arith.constant 0 : index
    %c0_9 = arith.constant 0 : index
    %9 = vector.load %arg7[%c0_8, %c0_9] : memref<3x128xf32, #tpu.memory_space<vmem>>, vector<1x128xf32>
    %10 = vector.broadcast %9 : vector<1x128xf32> to vector<128x128xf32>
    %11 = arith.addf %8, %10 : vector<128x128xf32>
    %cst_10 = arith.constant 5.000000e-01 : f32
    %12 = vector.broadcast %cst_10 : f32 to vector<128x128xf32>
    %13 = arith.mulf %12, %11 : vector<128x128xf32>
    %cst_11 = arith.constant 0.707106769 : f32
    %14 = vector.broadcast %cst_11 : f32 to vector<128x128xf32>
    %15 = arith.mulf %11, %14 : vector<128x128xf32>
    %16 = math.erf %15 : vector<128x128xf32>
    %cst_12 = arith.constant 1.000000e+00 : f32
    %17 = vector.broadcast %cst_12 : f32 to vector<128x128xf32>
    %18 = arith.addf %17, %16 : vector<128x128xf32>
    %19 = arith.mulf %13, %18 : vector<128x128xf32>
    %20 = arith.truncf %19 : vector<128x128xf32> to vector<128x128xbf16>
    %c0_13 = arith.constant 0 : index
    %c0_14 = arith.constant 0 : index
    %c0_15 = arith.constant 0 : index
    %21 = vector.load %arg5[%c0_13, %c0_14, %c0_15] : memref<2x128x128xbf16, #tpu.memory_space<vmem>>, vector<1x128x128xbf16>
    %22 = vector.shape_cast %21 : vector<1x128x128xbf16> to vector<128x128xbf16>
    %cst_16 = arith.constant dense<0.000000e+00> : vector<128x128xf32>
    %23 = tpu.matmul %20, %22, %cst_16 {dimension_numbers = #tpu.dot_dimension_numbers<[1], [0], [0], [1], [0, 0, 1, 1], [], []>} : vector<128x128xbf16>, vector<128x128xbf16>, vector<128x128xf32> -> vector<128x128xf32>
    %c1 = arith.constant 1 : index
    %c0_17 = arith.constant 0 : index
    %24 = vector.load %arg7[%c1, %c0_17] : memref<3x128xf32, #tpu.memory_space<vmem>>, vector<1x128xf32>
    %25 = vector.broadcast %24 : vector<1x128xf32> to vector<128x128xf32>
    %26 = arith.addf %23, %25 : vector<128x128xf32>
    %cst_18 = arith.constant 5.000000e-01 : f32
    %27 = vector.broadcast %cst_18 : f32 to vector<128x128xf32>
    %28 = arith.mulf %27, %26 : vector<128x128xf32>
    %cst_19 = arith.constant 0.707106769 : f32
    %29 = vector.broadcast %cst_19 : f32 to vector<128x128xf32>
    %30 = arith.mulf %26, %29 : vector<128x128xf32>
    %31 = math.erf %30 : vector<128x128xf32>
    %cst_20 = arith.constant 1.000000e+00 : f32
    %32 = vector.broadcast %cst_20 : f32 to vector<128x128xf32>
    %33 = arith.addf %32, %31 : vector<128x128xf32>
    %34 = arith.mulf %28, %33 : vector<128x128xf32>
    %35 = arith.truncf %34 : vector<128x128xf32> to vector<128x128xbf16>
    %c1_21 = arith.constant 1 : index
    %c0_22 = arith.constant 0 : index
    %c0_23 = arith.constant 0 : index
    %36 = vector.load %arg5[%c1_21, %c0_22, %c0_23] : memref<2x128x128xbf16, #tpu.memory_space<vmem>>, vector<1x128x128xbf16>
    %37 = vector.shape_cast %36 : vector<1x128x128xbf16> to vector<128x128xbf16>
    %cst_24 = arith.constant dense<0.000000e+00> : vector<128x128xf32>
    %38 = tpu.matmul %35, %37, %cst_24 {dimension_numbers = #tpu.dot_dimension_numbers<[1], [0], [0], [1], [0, 0, 1, 1], [], []>} : vector<128x128xbf16>, vector<128x128xbf16>, vector<128x128xf32> -> vector<128x128xf32>
    %c2 = arith.constant 2 : index
    %c0_25 = arith.constant 0 : index
    %39 = vector.load %arg7[%c2, %c0_25] : memref<3x128xf32, #tpu.memory_space<vmem>>, vector<1x128xf32>
    %40 = vector.broadcast %39 : vector<1x128xf32> to vector<128x128xf32>
    %41 = arith.addf %38, %40 : vector<128x128xf32>
    %cst_26 = arith.constant 5.000000e-01 : f32
    %42 = vector.broadcast %cst_26 : f32 to vector<128x128xf32>
    %43 = arith.mulf %42, %41 : vector<128x128xf32>
    %cst_27 = arith.constant 0.707106769 : f32
    %44 = vector.broadcast %cst_27 : f32 to vector<128x128xf32>
    %45 = arith.mulf %41, %44 : vector<128x128xf32>
    %46 = math.erf %45 : vector<128x128xf32>
    %cst_28 = arith.constant 1.000000e+00 : f32
    %47 = vector.broadcast %cst_28 : f32 to vector<128x128xf32>
    %48 = arith.addf %47, %46 : vector<128x128xf32>
    %49 = arith.mulf %43, %48 : vector<128x128xf32>
    %c0_29 = arith.constant 0 : index
    %c0_30 = arith.constant 0 : index
    %50 = vector.load %arg6[%c0_29, %c0_30] : memref<8x128xbf16, #tpu.memory_space<vmem>>, vector<8x128xbf16>
    %51 = arith.truncf %49 : vector<128x128xf32> to vector<128x128xbf16>
    %cst_31 = arith.constant dense<0.000000e+00> : vector<8x128xf32>
    %52 = tpu.matmul %50, %51, %cst_31 {dimension_numbers = #tpu.dot_dimension_numbers<[1], [1], [0], [0], [0, 0, 1, 0], [], []>} : vector<8x128xbf16>, vector<128x128xbf16>, vector<8x128xf32> -> vector<8x128xf32>
    %c0_32 = arith.constant 0 : index
    %c0_33 = arith.constant 0 : index
    %53 = vector.load %arg8[%c0_32, %c0_33] : memref<8x1xf32, #tpu.memory_space<vmem>>, vector<8x1xf32>
    %54 = vector.broadcast %53 : vector<8x1xf32> to vector<8x128xf32>
    %55 = arith.addf %52, %54 : vector<8x128xf32>
    %c0_34 = arith.constant 0 : index
    %c0_35 = arith.constant 0 : index
    %56 = vector.load %arg9[%c0_34, %c0_35] : memref<8x128xf32, #tpu.memory_space<vmem>>, vector<8x128xf32>
    tpu.vector_store %arg9[%c0_34, %c0_35], %55 {strides = array<i32>} : memref<8x128xf32, #tpu.memory_space<vmem>>, vector<8x128xf32>,
    return
  }
  func.func @transform_0(%arg0: i32) -> (i32, i32) {
    %c0_i32 = arith.constant 0 : i32
    %c0_i32_0 = arith.constant 0 : i32
    return %arg0, %c0_i32 : i32, i32
  }
  func.func @transform_1(%arg0: i32) -> (i32, i32) {
    %c0_i32 = arith.constant 0 : i32
    %c0_i32_0 = arith.constant 0 : i32
    return %arg0, %c0_i32 : i32, i32
  }
  func.func @transform_2(%arg0: i32) -> (i32, i32) {
    %c0_i32 = arith.constant 0 : i32
    %c0_i32_0 = arith.constant 0 : i32
    %c0_i32_1 = arith.constant 0 : i32
    return %c0_i32, %c0_i32_0 : i32, i32
  }
  func.func @transform_3(%arg0: i32) -> (i32, i32) {
    %c0_i32 = arith.constant 0 : i32
    %c0_i32_0 = arith.constant 0 : i32
    %c0_i32_1 = arith.constant 0 : i32
    return %c0_i32, %c0_i32_0 : i32, i32
  }
  func.func @transform_4(%arg0: i32) -> (i32, i32, i32) {
    %c0_i32 = arith.constant 0 : i32
    %c0_i32_0 = arith.constant 0 : i32
    %c0_i32_1 = arith.constant 0 : i32
    %c0_i32_2 = arith.constant 0 : i32
    return %c0_i32, %c0_i32_0, %c0_i32_1 : i32, i32, i32
  }
  func.func @transform_5(%arg0: i32) -> (i32, i32) {
    %c0_i32 = arith.constant 0 : i32
    %c0_i32_0 = arith.constant 0 : i32
    %c0_i32_1 = arith.constant 0 : i32
    return %c0_i32, %c0_i32_0 : i32, i32
  }
  func.func @transform_6(%arg0: i32) -> (i32, i32) {
    %c0_i32 = arith.constant 0 : i32
    %c0_i32_0 = arith.constant 0 : i32
    %c0_i32_1 = arith.constant 0 : i32
    return %c0_i32, %c0_i32_0 : i32, i32
  }
  func.func @transform_7(%arg0: i32) -> (i32, i32) {
    %c0_i32 = arith.constant 0 : i32
    %c0_i32_0 = arith.constant 0 : i32
    %c0_i32_1 = arith.constant 0 : i32
    return %c0_i32, %c0_i32_0 : i32, i32
  }
  func.func @transform_8(%arg0: i32) -> (i32, i32) {
    %c0_i32 = arith.constant 0 : i32
    %c0_i32_0 = arith.constant 0 : i32
    return %c0_i32, %arg0 : i32, i32
  }
}

</mosaic_0001>

<bundles_post_ra>
// kernel: critic_forward.1
= control target key start
LH: loop header
LB: loop body
LE: loop exit
PB: predicated region body
PF: predicated region fallthrough
CT: control target
= control target key end

     0   :  { %vm108_vm0 = vcmask 1041408   ;;  %vm83_vm1 = vcmask 31744   ;;  %vm173_vm2 = vcmask 261120   ;;  %s4953_s3 = inlined_call_operand.vmem [shape: bf16[4,128], index: 3, kind: input, shape index: {}]   ;;  %s4954_s2 = inlined_call_operand.vmem [shape: bf16[32,128], index: 2, kind: input, shape index: {}]   ;;  %s4955_s1 = inlined_call_operand.vmem [shape: f32[128,4], index: 1, kind: input, shape index: {}]   ;;  %s4956_s0 = inlined_call_operand.vmem [shape: f32[128,32], index: 0, kind: input, shape index: {}]   ;;  %s4957_s6 = inlined_call_operand.vmem [shape: f32[3,128], index: 6, kind: input, shape index: {}]   ;;  %s4958_s4 = inlined_call_operand.vmem [shape: bf16[2,128,128], index: 4, kind: input, shape index: {}]   ;;  %s4959_s7 = inlined_call_operand.vmem [shape: f32[8,1], index: 7, kind: input, shape index: {}]   ;;  %s4960_s5 = inlined_call_operand.vmem [shape: bf16[8,128], index: 5, kind: input, shape index: {}]   ;;  %s4961_s8 = inlined_call_operand.vmem [shape: f32[8,128], index: 8, kind: output, shape index: {}]  }
   0x1   :  { %v82_v0 = vld [vmem:[%s4953_s3] sm:$0x3]  ;;  %v2810_v1 = vld [vmem:[%s4954_s2 + $0x8] sm:$0xff]  ;;  %v56_v10 = vld [vmem:[%s4955_s1 + $0x10] sm:$0xff] }
   0x2   :  { %v54_v2 = vld [vmem:[%s4955_s1] sm:$0xff]  ;;  %v110_v3 = vsel %vm108_vm0, %v82_v0, 0  ;;  %v55_v4 = vld [vmem:[%s4955_s1 + $0x8] sm:$0xff]  ;;  %204 = vmatpush.bf16.msra.mxu1 %v2810_v1  ;;  %v57_v11 = vld [vmem:[%s4955_s1 + $0x18] sm:$0xff] }
   0x3   :  { %119 = vmatpush.bf16.msra.mxu0 %v110_v3  ;;  %v70_v5 = vpack.c.bf16 %v55_v4, %v54_v2  ;;  %v2809_v6 = vld [vmem:[%s4954_s2] sm:$0xff]  ;;  %v31_v8 = vld [vmem:[%s4956_s0 + $0x8] sm:$0xff]  ;;  %v71_v12 = vpack.c.bf16 %v57_v11, %v56_v10  ;;  %v32_v13 = vld [vmem:[%s4956_s0 + $0x10] sm:$0xff] }
   0x4   :  { %v30_v7 = vld [vmem:[%s4956_s0] sm:$0xff]  ;;  %v33_v14 = vld [vmem:[%s4956_s0 + $0x18] sm:$0xff]  ;;  %v59_v17 = vld [vmem:[%s4955_s1 + $0x28] sm:$0xff] }
   0x5   :  { %v46_v9 = vpack.c.bf16 %v31_v8, %v30_v7  ;;  %v47_v15 = vpack.c.bf16 %v33_v14, %v32_v13  ;;  %v58_v16 = vld [vmem:[%s4955_s1 + $0x20] sm:$0xff]  ;;  %v35_v20 = vld [vmem:[%s4956_s0 + $0x28] sm:$0xff]  ;;  %v60_v22 = vld [vmem:[%s4955_s1 + $0x30] sm:$0xff] }
   0x6   :  { %2657 = vmatmul.msk.bf16.vlgmr.msra.gmra.mxu0 %vm83_vm1, %v70_v5  ;;  %205 = vmatpush.bf16.msra.mxu1 %v2809_v6  ;;  %v72_v18 = vpack.c.bf16 %v59_v17, %v58_v16  ;;  %v34_v19 = vld [vmem:[%s4956_s0 + $0x20] sm:$0xff]  ;;  %v61_v23 = vld [vmem:[%s4955_s1 + $0x38] sm:$0xff]  ;;  %v36_v25 = vld [vmem:[%s4956_s0 + $0x30] sm:$0xff] }
   0x7   :  { %v48_v21 = vpack.c.bf16 %v35_v20, %v34_v19  ;;  %v73_v24 = vpack.c.bf16 %v61_v23, %v60_v22  ;;  %v37_v26 = vld [vmem:[%s4956_s0 + $0x38] sm:$0xff]  ;;  %v62_v28 = vld [vmem:[%s4955_s1 + $0x40] sm:$0xff]  ;;  %v63_v29 = vld [vmem:[%s4955_s1 + $0x48] sm:$0xff] }
   0x8   :  { %v49_v27 = vpack.c.bf16 %v37_v26, %v36_v25  ;;  %v74_v30 = vpack.c.bf16 %v63_v29, %v62_v28  ;;  %v38_v31 = vld [vmem:[%s4956_s0 + $0x40] sm:$0xff]  ;;  %v39_v32 = vld [vmem:[%s4956_s0 + $0x48] sm:$0xff]  ;;  %v64_v34 = vld [vmem:[%s4955_s1 + $0x50] sm:$0xff] }
   0x9   :  { %2673 = vmatmul.msk.bf16.vlgmr.msra.gmra.mxu1 %vm173_vm2, %v46_v9  ;;  %v50_v33 = vpack.c.bf16 %v39_v32, %v38_v31  ;;  %v65_v35 = vld [vmem:[%s4955_s1 + $0x58] sm:$0xff]  ;;  %v40_v37 = vld [vmem:[%s4956_s0 + $0x50] sm:$0xff]  ;;  %v66_v40 = vld [vmem:[%s4955_s1 + $0x60] sm:$0xff] }
   0xa   :  { %v75_v36 = vpack.c.bf16 %v65_v35, %v64_v34  ;;  %v41_v38 = vld [vmem:[%s4956_s0 + $0x58] sm:$0xff]  ;;  %v67_v41 = vld [vmem:[%s4955_s1 + $0x68] sm:$0xff]  ;;  %v42_v43 = vld [vmem:[%s4956_s0 + $0x60] sm:$0xff] }
   0xb   :  { %v51_v39 = vpack.c.bf16 %v41_v38, %v40_v37  ;;  %v76_v42 = vpack.c.bf16 %v67_v41, %v66_v40  ;;  %v43_v44 = vld [vmem:[%s4956_s0 + $0x68] sm:$0xff]  ;;  %v68_v46 = vld [vmem:[%s4955_s1 + $0x70] sm:$0xff]  ;;  %v69_v47 = vld [vmem:[%s4955_s1 + $0x78] sm:$0xff] }
   0xc   :  { %v52_v45 = vpack.c.bf16 %v43_v44, %v42_v43  ;;  %v77_v48 = vpack.c.bf16 %v69_v47, %v68_v46  ;;  %v44_v49 = vld [vmem:[%s4956_s0 + $0x70] sm:$0xff]  ;;  %v45_v50 = vld [vmem:[%s4956_s0 + $0x78] sm:$0xff]  ;;  %v3099_v53 = vld [vmem:[%s4957_s6] ss:$0 sm:$0xff] }
   0xd   :  { %v53_v51 = vpack.c.bf16 %v45_v50, %v44_v49  ;;  %v2818_v56 = vld [vmem:[%s4958_s4 + $0x38] sm:$0xff]  ;;  %v2817_v60 = vld [vmem:[%s4958_s4 + $0x30] sm:$0xff]  ;;  %v2816_v1 = vld [vmem:[%s4958_s4 + $0x28] sm:$0xff] }
   0xe   :  { %1043 = vmatpush.bf16.msra.mxu2 %v2818_v56  ;;  %v2815_v8 = vld [vmem:[%s4958_s4 + $0x20] sm:$0xff]  ;;  %v2814_v17 = vld [vmem:[%s4958_s4 + $0x18] sm:$0xff] }
   0xf   :  { %v2811_v50 = vld [vmem:[%s4958_s4] sm:$0xff] }
  0x12   :  { %1044 = vmatpush.bf16.msra.mxu2 %v2817_v60 }
  0x16   :  { %2658 = vmatmul.msk.bf16.gmra.mxu0 %vm83_vm1, %v71_v12  ;;  %1045 = vmatpush.bf16.msra.mxu2 %v2816_v1 }
  0x19   :  { %2674 = vmatmul.msk.bf16.gmra.mxu1 %vm173_vm2, %v47_v15 }
  0x1a   :  { %1046 = vmatpush.bf16.msra.mxu2 %v2815_v8 }
  0x1e   :  { %1047 = vmatpush.bf16.msra.mxu2 %v2814_v17 }
  0x26   :  { %2659 = vmatmul.msk.bf16.gmra.mxu0 %vm83_vm1, %v72_v18 }
  0x29   :  { %2675 = vmatmul.msk.bf16.gmra.mxu1 %vm173_vm2, %v48_v21 }
  0x36   :  { %2660 = vmatmul.msk.bf16.gmra.mxu0 %vm83_vm1, %v73_v24 }
  0x39   :  { %2676 = vmatmul.msk.bf16.gmra.mxu1 %vm173_vm2, %v49_v27  ;;  %v2813_v27 = vld [vmem:[%s4958_s4 + $0x10] sm:$0xff] }
  0x3a   :  { %1048 = vmatpush.bf16.msra.mxu2 %v2813_v27 }
  0x46   :  { %2661 = vmatmul.msk.bf16.gmra.mxu0 %vm83_vm1, %v74_v30 }
  0x49   :  { %2677 = vmatmul.msk.bf16.gmra.mxu1 %vm173_vm2, %v50_v33 }
  0x56   :  { %2662 = vmatmul.msk.bf16.gmra.mxu0 %vm83_vm1, %v75_v36 }
  0x59   :  { %2678 = vmatmul.msk.bf16.gmra.mxu1 %vm173_vm2, %v51_v39  ;;  %v2812_v39 = vld [vmem:[%s4958_s4 + $0x8] sm:$0xff] }
  0x5a   :  { %1049 = vmatpush.bf16.msra.mxu2 %v2812_v39 }
  0x5e   :  { %1050 = vmatpush.bf16.msra.mxu2 %v2811_v50 }
  0x66   :  { %2663 = vmatmul.msk.bf16.gmra.mxu0 %vm83_vm1, %v76_v42 }
  0x69   :  { %2679 = vmatmul.msk.bf16.gmra.mxu1 %vm173_vm2, %v52_v45 }
  0x76   :  { %2664 = vmatmul.msk.bf16.gmra.mxu0 %vm83_vm1, %v77_v48 }
  0x79   :  { %2680 = vmatmul.msk.bf16.gmra.mxu1 %vm173_vm2, %v53_v51 }
  0x83   :  { %v121_v52 = vpop.f32.mrf.mxu0 }
  0x86   :  { %v207_v54 = vpop.f32.mrf.mxu1 }
  0x87   :  { %v208_v55 = vadd.f32 %v207_v54, %v121_v52 }
  0x89   :  { %v3105_v57 = vadd.f32 %v3099_v53, %v208_v55 }
  0x8b   :  { %v123_v58 = vpop.f32.mrf.mxu0  ;;  %v3108_v59 = vmul.f32 0.70710677, %v3105_v57 }
  0x8d   :  { %v297_v61 = vmul.f32 %v3108_v59, %v3108_v59 }
  0x8e   :  { %v209_v62 = vpop.f32.mrf.mxu1 }
  0x8f   :  { %v3115_v63 = vmin.f32 %v297_v61, 16.0  ;;  %v210_v0 = vadd.f32 %v209_v62, %v123_v58 }
  0x91   :  { %v299_v2 = vmul.f32 2.1237322e-06, %v3115_v63  ;;  %v3122_v3 = vadd.f32 %v3099_v53, %v210_v0  ;;  %v310_v4 = vmul.f32 3.8918573e-05, %v3115_v63 }
  0x93   :  { %v126_v5 = vpop.f32.mrf.mxu0  ;;  %v300_v6 = vadd.f32 0.00028619796, %v299_v2  ;;  %v3126_v7 = vmul.f32 0.70710677, %v3122_v3  ;;  %v311_v9 = vadd.f32 0.001143296, %v310_v4 }
  0x95   :  { %v301_v10 = vmul.f32 %v300_v6, %v3115_v63  ;;  %v337_v11 = vmul.f32 %v3126_v7, %v3126_v7  ;;  %v312_v13 = vmul.f32 %v311_v9, %v3115_v63 }
  0x96   :  { %v212_v12 = vpop.f32.mrf.mxu1 }
  0x97   :  { %v302_v14 = vadd.f32 0.0036580483, %v301_v10  ;;  %v3135_v15 = vmin.f32 %v337_v11, 16.0  ;;  %v213_v16 = vadd.f32 %v212_v12, %v126_v5  ;;  %v313_v18 = vadd.f32 0.014752088, %v312_v13 }
  0x99   :  { %v339_v19 = vmul.f32 2.1237322e-06, %v3135_v15  ;;  %v3142_v20 = vadd.f32 %v3099_v53, %v213_v16  ;;  %v350_v21 = vmul.f32 3.8918573e-05, %v3135_v15  ;;  %v314_v23 = vmul.f32 %v313_v18, %v3115_v63 }
  0x9a   :  { %v303_v24 = vmul.f32 %v302_v14, %v3115_v63 }
  0x9b   :  { %v128_v22 = vpop.f32.mrf.mxu0  ;;  %v340_v25 = vadd.f32 0.00028619796, %v339_v19  ;;  %v3148_v26 = vmul.f32 0.70710677, %v3142_v20  ;;  %v315_v28 = vadd.f32 0.112945676, %v314_v23 }
  0x9c   :  { %v351_v30 = vadd.f32 0.001143296, %v350_v21  ;;  %v304_v34 = vadd.f32 0.05243302, %v303_v24 }
  0x9d   :  { %v341_v29 = vmul.f32 %v340_v25, %v3135_v15  ;;  %v377_v31 = vmul.f32 %v3148_v26, %v3148_v26  ;;  %v316_v33 = vmul.f32 %v315_v28, %v3115_v63 }
  0x9e   :  { %v214_v32 = vpop.f32.mrf.mxu1  ;;  %v352_v36 = vmul.f32 %v351_v30, %v3135_v15  ;;  %v305_v46 = vmul.f32 %v304_v34, %v3115_v63 }
  0x9f   :  { %v215_v35 = vadd.f32 %v214_v32, %v128_v22  ;;  %v342_v37 = vadd.f32 0.0036580483, %v341_v29  ;;  %v3158_v38 = vmin.f32 %v377_v31, 16.0  ;;  %v317_v40 = vadd.f32 0.4994258, %v316_v33 }
  0xa0   :  { %v353_v42 = vadd.f32 0.014752088, %v352_v36  ;;  %v306_v60 = vadd.f32 0.18741608, %v305_v46 }
  0xa1   :  { %v3164_v41 = vadd.f32 %v3099_v53, %v215_v35  ;;  %v318_v44 = vmul.f32 %v317_v40, %v3115_v63  ;;  %v390_v45 = vmul.f32 3.8918573e-05, %v3158_v38  ;;  %v343_v48 = vmul.f32 %v342_v37, %v3135_v15 }
  0xa2   :  { %v354_v47 = vmul.f32 %v353_v42, %v3135_v15  ;;  %v379_v55 = vmul.f32 2.1237322e-06, %v3158_v38  ;;  %v307_v13 = vmul.f32 %v306_v60, %v3115_v63 }
  0xa3   :  { %v131_v43 = vpop.f32.mrf.mxu0  ;;  %v3172_v49 = vmul.f32 0.70710677, %v3164_v41  ;;  %v3177_v51 = vadd.f32 1.0, %v318_v44  ;;  %v391_v54 = vadd.f32 0.001143296, %v390_v45 }
  0xa4   :  { %v355_v52 = vadd.f32 0.112945676, %v354_v47  ;;  %v344_v62 = vadd.f32 0.05243302, %v343_v48  ;;  %v380_v5 = vadd.f32 0.00028619796, %v379_v55 }
  0xa5   :  { %v417_v56 = vmul.f32 %v3172_v49, %v3172_v49  ;;  %2832 = vrcp.f32 %v3177_v51  ;;  %v392_v2 = vmul.f32 %v391_v54, %v3158_v38  ;;  %v308_v28 = vadd.f32 1.1283791, %v307_v13 }
  0xa6   :  { %v217_v58 = vpop.f32.mrf.mxu1  ;;  %v356_v1 = vmul.f32 %v355_v52, %v3135_v15  ;;  %v345_v14 = vmul.f32 %v344_v62, %v3135_v15  ;;  %v381_v21 = vmul.f32 %v380_v5, %v3158_v38  ;;  %vm325_vm4 = vweird.f32 %v3177_v51 }
  0xa7   :  { %v218_v61 = vadd.f32 %v217_v58, %v131_v43  ;;  %v3183_v0 = vmin.f32 %v417_v56, 16.0  ;;  %v393_v9 = vadd.f32 0.014752088, %v392_v2  ;;  %v331_v35 = vand.u32 2147483648, %v3177_v51 }
  0xa8   :  { %v357_v8 = vadd.f32 0.4994258, %v356_v1  ;;  %v346_v29 = vadd.f32 0.18741608, %v345_v14  ;;  %v382_v33 = vadd.f32 0.0036580483, %v381_v21 }
  0xa9   :  { %v3188_v4 = vadd.f32 %v3099_v53, %v218_v61  ;;  %v419_v10 = vmul.f32 2.1237322e-06, %v3183_v0  ;;  %v394_v17 = vmul.f32 %v393_v9, %v3158_v38  ;;  %v329_v42 = vand.u32 2147483647, %v3177_v51 }
  0xaa   :  { %v358_v16 = vmul.f32 %v357_v8, %v3135_v15  ;;  %v347_v43 = vmul.f32 %v346_v29, %v3135_v15  ;;  %v430_v45 = vmul.f32 3.8918573e-05, %v3183_v0  ;;  %v383_v15 = vmul.f32 %v382_v33, %v3158_v38 }
  0xab   :  { %v133_v6 = vpop.f32.mrf.mxu0  ;;  %v3192_v11 = vmul.f32 0.70710677, %v3188_v4  ;;  %v2833_v12 = vpop.eup %2832  ;;  %v395_v24 = vadd.f32 0.112945676, %v394_v17  ;;  %v420_v25 = vadd.f32 0.00028619796, %v419_v10 }
  0xac   :  { %v321_v19 = vmul.f32 %v2833_v12, %v3177_v51  ;;  %v3202_v23 = vadd.f32 1.0, %v358_v16  ;;  %vm326_vm3 = vweird.f32 %v2833_v12  ;;  %v309_v51 = vmul.f32 %v308_v28, %v3108_v59 }
  0xad   :  { %v457_v18 = vmul.f32 %v3192_v11, %v3192_v11  ;;  %v396_v36 = vmul.f32 %v395_v24, %v3158_v38  ;;  %v421_v37 = vmul.f32 %v420_v25, %v3183_v0  ;;  %vm3219_vm5 = vmor %vm325_vm4, %vm326_vm3  ;;  %v332_v55 = vor.u32 1.1754944e-38, %v331_v35 }
  0xae   :  { %v219_v22 = vpop.f32.mrf.mxu1  ;;  %v322_v63 = vsub.f32 1.0, %v321_v19  ;;  %2834 = vrcp.f32 %v3202_v23  ;;  %vm330_vm6 = vcmp.eq.f32.partialorder %v329_v42, 8.507059e+37  ;;  %v431_v2 = vadd.f32 0.001143296, %v430_v45 }
  0xaf   :  { %v220_v27 = vadd.f32 %v219_v22, %v133_v6  ;;  %v3205_v30 = vmin.f32 %v457_v18, 16.0  ;;  %v397_v50 = vadd.f32 0.4994258, %v396_v36  ;;  %v422_v56 = vadd.f32 0.0036580483, %v421_v37 }
  0xb0   :  { %v323_v32 = vmul.f32 %v2833_v12, %v322_v63  ;;  %v348_v5 = vadd.f32 1.1283791, %v347_v43  ;;  %v384_v9 = vadd.f32 0.05243302, %v383_v15  ;;  %v369_v13 = vand.u32 2147483647, %v3202_v23 }
  0xb1   :  { %v3208_v31 = vadd.f32 %v3099_v53, %v220_v27  ;;  %v459_v46 = vmul.f32 2.1237322e-06, %v3205_v30  ;;  %v398_v1 = vmul.f32 %v397_v50, %v3158_v38  ;;  %v423_v16 = vmul.f32 %v422_v56, %v3183_v0 }
  0xb2   :  { %v324_v40 = vadd.f32 %v2833_v12, %v323_v32  ;;  %v371_v18 = vand.u32 2147483648, %v3202_v23  ;;  %v432_v22 = vmul.f32 %v431_v2, %v3183_v0  ;;  %v349_v27 = vmul.f32 %v348_v5, %v3126_v7 }
  0xb3   :  { %v136_v34 = vpop.f32.mrf.mxu0  ;;  %v3215_v39 = vmul.f32 0.70710677, %v3208_v31  ;;  %v460_v6 = vadd.f32 0.00028619796, %v459_v46  ;;  %v3240_v14 = vadd.f32 1.0, %v398_v1  ;;  %vm365_vm8 = vweird.f32 %v3202_v23 }
  0xb4   :  { %v328_v48 = vsel %vm3219_vm5, %v2833_v12, %v324_v40  ;;  %v2835_v52 = vpop.eup %2834  ;;  %v385_v32 = vmul.f32 %v384_v9, %v3158_v38  ;;  %v424_v33 = vadd.f32 0.05243302, %v423_v16  ;;  %v372_v35 = vor.u32 1.1754944e-38, %v371_v18 }
  0xb5   :  { %v497_v47 = vmul.f32 %v3215_v39, %v3215_v39  ;;  %v333_v61 = vsel %vm330_vm6, %v332_v55, %v328_v48  ;;  %v361_v62 = vmul.f32 %v2835_v52, %v3202_v23  ;;  %vm366_vm7 = vweird.f32 %v2835_v52 }
  0xb6   :  { %v222_v54 = vpop.f32.mrf.mxu1  ;;  %v334_v17 = vmul.f32 %v333_v61, %v309_v51  ;;  %2836 = vrcp.f32 %v3240_v14  ;;  %v461_v24 = vmul.f32 %v460_v6, %v3205_v30  ;;  %vm367_vm9 = vmor %vm365_vm8, %vm366_vm7  ;;  %vm370_vm10 = vcmp.eq.f32.partialorder %v369_v13, 8.507059e+37 }
  0xb7   :  { %v3231_v58 = vmin.f32 %v497_v47, 16.0  ;;  %v223_v60 = vadd.f32 %v222_v54, %v136_v34  ;;  %v362_v12 = vsub.f32 1.0, %v361_v62  ;;  %v433_v40 = vadd.f32 0.014752088, %v432_v22 }
  0xb8   :  { %v2681_v36 = vclamps-f32 %v334_v17, 1.0  ;;  %v462_v42 = vadd.f32 0.0036580483, %v461_v24  ;;  %v386_v50 = vadd.f32 0.18741608, %v385_v32  ;;  %v265_v51 = vmul.f32 0.5, %v3105_v57 }
  0xb9   :  { %v499_v8 = vmul.f32 2.1237322e-06, %v3231_v58  ;;  %v3237_v59 = vadd.f32 %v3099_v53, %v223_v60  ;;  %v363_v21 = vmul.f32 %v2835_v52, %v362_v12  ;;  %v434_v48 = vmul.f32 %v433_v40, %v3183_v0 }
  0xba   :  { %v425_v15 = vmul.f32 %v424_v33, %v3183_v0  ;;  %v937_v55 = vadd.f32 1.0, %v2681_v36  ;;  %v463_v56 = vmul.f32 %v462_v42, %v3205_v30  ;;  %v266_v1 = vmul.f32 0.5, %v3122_v3 }
  0xbb   :  { %v138_v10 = vpop.f32.mrf.mxu0  ;;  %v3245_v19 = vmul.f32 0.70710677, %v3237_v59  ;;  %v500_v25 = vadd.f32 0.00028619796, %v499_v8  ;;  %v364_v29 = vadd.f32 %v2835_v52, %v363_v21  ;;  %v435_v62 = vadd.f32 0.112945676, %v434_v48 }
  0xbc   :  { %v3260_v45 = vpop.eup %2836  ;;  %v470_v8 = vmul.f32 3.8918573e-05, %v3205_v30  ;;  %v387_v57 = vmul.f32 %v386_v50, %v3158_v38  ;;  %v426_v13 = vadd.f32 0.18741608, %v425_v15  ;;  %v953_v16 = vmul.f32 %v937_v55, %v265_v51 }
  0xbd   :  { %v537_v63 = vmul.f32 %v3245_v19, %v3245_v19  ;;  %v368_v37 = vsel %vm367_vm9, %v2835_v52, %v364_v29  ;;  %v501_v7 = vmul.f32 %v500_v25, %v3231_v58  ;;  %v401_v52 = vmul.f32 %v3260_v45, %v3240_v14 }
  0xbe   :  { %v224_v28 = vpop.f32.mrf.mxu1  ;;  %v373_v44 = vsel %vm370_vm10, %v372_v35, %v368_v37  ;;  %v436_v12 = vmul.f32 %v435_v62, %v3183_v0  ;;  %v471_v18 = vadd.f32 0.001143296, %v470_v8  ;;  %v464_v21 = vadd.f32 0.05243302, %v463_v56 }
  0xbf   :  { %v225_v34 = vadd.f32 %v224_v28, %v138_v10  ;;  %v3262_v23 = vmin.f32 %v537_v63, 16.0  ;;  %v374_v47 = vmul.f32 %v373_v44, %v349_v27  ;;  %v502_v60 = vadd.f32 0.0036580483, %v501_v7 }
  0xc0   :  { %v402_v10 = vsub.f32 1.0, %v401_v52  ;;  %v437_v24 = vadd.f32 0.4994258, %v436_v12  ;;  %v472_v28 = vmul.f32 %v471_v18, %v3205_v30  ;;  %v3290_v33 = vmul.f32 0.5, %v3142_v20 }
  0xc1   :  { %v3258_v43 = vadd.f32 %v3099_v53, %v225_v34  ;;  %v2682_v54 = vclamps-f32 %v374_v47, 1.0  ;;  %v539_v2 = vmul.f32 2.1237322e-06, %v3262_v23  ;;  %v503_v25 = vmul.f32 %v502_v60, %v3231_v58 }
  0xc2   :  { %v403_v32 = vmul.f32 %v3260_v45, %v402_v10  ;;  %v427_v34 = vmul.f32 %v426_v13, %v3183_v0  ;;  %v438_v35 = vmul.f32 %v437_v24, %v3183_v0  ;;  %v388_v36 = vadd.f32 1.1283791, %v387_v57 }
  0xc3   :  { %v141_v46 = vpop.f32.mrf.mxu0  ;;  %v3271_v61 = vmul.f32 0.70710677, %v3258_v43  ;;  %v938_v6 = vadd.f32 1.0, %v2682_v54  ;;  %v540_v27 = vadd.f32 0.00028619796, %v539_v2  ;;  %v465_v37 = vmul.f32 %v464_v21, %v3205_v30 }
  0xc4   :  { %v473_v42 = vadd.f32 0.014752088, %v472_v28  ;;  %v504_v7 = vadd.f32 0.05243302, %v503_v25  ;;  %vm406_vm11 = vweird.f32 %v3260_v45  ;;  %v3299_v47 = vadd.f32 1.0, %v438_v35 }
  0xc5   :  { %v954_v17 = vmul.f32 %v938_v6, %v266_v1  ;;  %v577_v3 = vmul.f32 %v3271_v61, %v3271_v61  ;;  %v541_v44 = vmul.f32 %v540_v27, %v3262_v23  ;;  %v404_v0 = vadd.f32 %v3260_v45, %v403_v32 }
  0xc6   :  { %v227_v5 = vpop.f32.mrf.mxu1  ;;  %v474_v50 = vmul.f32 %v473_v42, %v3205_v30  ;;  %v428_v52 = vadd.f32 1.1283791, %v427_v34  ;;  %vm405_vm12 = vweird.f32 %v3240_v14  ;;  %v411_v51 = vand.u32 2147483648, %v3240_v14 }
  0xc7   :  { %v228_v9 = vadd.f32 %v227_v5, %v141_v46  ;;  %v969_v38 = vpack.c.bf16 %v954_v17, %v953_v16  ;;  %v3295_v40 = vmin.f32 %v577_v3, 16.0  ;;  %2838 = vrcp.f32 %v3299_v47  ;;  %vm3316_vm13 = vmor %vm405_vm12, %vm406_vm11 }
  0xc8   :  { %v409_v55 = vand.u32 2147483647, %v3240_v14  ;;  %v510_v56 = vmul.f32 3.8918573e-05, %v3231_v58  ;;  %v466_v60 = vadd.f32 0.18741608, %v465_v37  ;;  %v505_v8 = vmul.f32 %v504_v7, %v3231_v58 }
  0xc9   :  { %v3281_v22 = vadd.f32 %v3099_v53, %v228_v9  ;;  %1051 = vmatmul.bf16.vlgmr.msra.gmra.mxu2 %v969_v38  ;;  %v579_v15 = vmul.f32 2.1237322e-06, %v3295_v40  ;;  %v542_v62 = vadd.f32 0.0036580483, %v541_v44  ;;  %v475_v5 = vadd.f32 0.112945676, %v474_v50 }
  0xca   :  { %v3321_v6 = vmul.f32 0.5, %v3164_v41  ;;  %v408_v14 = vsel %vm3316_vm13, %v3260_v45, %v404_v0  ;;  %v389_v9 = vmul.f32 %v388_v36, %v3148_v26  ;;  %v3331_v10 = vmul.f32 0.5, %v3188_v4 }
  0xcb   :  { %v143_v63 = vpop.f32.mrf.mxu0  ;;  %v3286_v29 = vmul.f32 0.70710677, %v3281_v22  ;;  %v412_v13 = vor.u32 1.1754944e-38, %v411_v51  ;;  %v580_v16 = vadd.f32 0.00028619796, %v579_v15  ;;  %vm410_vm14 = vcmp.eq.f32.partialorder %v409_v55, 8.507059e+37 }
  0xcc   :  { %v476_v41 = vmul.f32 %v475_v5, %v3205_v30  ;;  %v511_v17 = vadd.f32 0.001143296, %v510_v56  ;;  %v429_v21 = vmul.f32 %v428_v52, %v3172_v49  ;;  %v467_v3 = vmul.f32 %v466_v60, %v3205_v30 }
  0xcd   :  { %v617_v20 = vmul.f32 %v3286_v29, %v3286_v29  ;;  %v2839_v18 = vpop.eup %2838  ;;  %v543_v45 = vmul.f32 %v542_v62, %v3262_v23  ;;  %v413_v24 = vsel %vm410_vm14, %v412_v13, %v408_v14  ;;  %v506_v4 = vadd.f32 0.18741608, %v505_v8 }
  0xce   :  { %v229_v46 = vpop.f32.mrf.mxu1  ;;  %v441_v38 = vmul.f32 %v2839_v18, %v3299_v47  ;;  %v477_v28 = vadd.f32 0.4994258, %v476_v41  ;;  %v512_v32 = vmul.f32 %v511_v17, %v3231_v58  ;;  %v550_v49 = vmul.f32 3.8918573e-05, %v3262_v23 }
  0xcf   :  { %v230_v48 = vadd.f32 %v229_v46, %v143_v63  ;;  %v3324_v57 = vmin.f32 %v617_v20, 16.0  ;;  %v581_v34 = vmul.f32 %v580_v16, %v3295_v40  ;;  %v414_v36 = vmul.f32 %v413_v24, %v389_v9 }
  0xd0   :  { %v442_v37 = vsub.f32 1.0, %v441_v38  ;;  %v544_v42 = vadd.f32 0.05243302, %v543_v45  ;;  %v451_v7 = vand.u32 2147483648, %v3299_v47  ;;  %v478_v44 = vmul.f32 %v477_v28, %v3205_v30 }
  0xd1   :  { %v3310_v54 = vadd.f32 %v3099_v53, %v230_v48  ;;  %v619_v25 = vmul.f32 2.1237322e-06, %v3324_v57  ;;  %v513_v46 = vadd.f32 0.014752088, %v512_v32  ;;  %vm446_vm15 = vweird.f32 %v2839_v18 }
  0xd2   :  { %v443_v48 = vmul.f32 %v2839_v18, %v442_v37  ;;  %v449_v0 = vand.u32 2147483647, %v3299_v47  ;;  %v3358_v15 = vadd.f32 1.0, %v478_v44  ;;  %v551_v55 = vadd.f32 0.001143296, %v550_v49 }
  0xd3   :  { %v146_v1 = vpop.f32.mrf.mxu0  ;;  %v3334_v12 = vmul.f32 0.70710677, %v3310_v54  ;;  %v620_v20 = vadd.f32 0.00028619796, %v619_v25  ;;  %v582_v56 = vadd.f32 0.0036580483, %v581_v34  ;;  %vm445_vm0 = vweird.f32 %v3299_v47 }
  0xd4   :  { %v2683_v60 = vclamps-f32 %v414_v36, 1.0  ;;  %v444_v62 = vadd.f32 %v2839_v18, %v443_v48  ;;  %vm447_vm1 = vmor %vm445_vm0, %vm446_vm15  ;;  %2840 = vrcp.f32 %v3358_v15  ;;  %v514_v5 = vmul.f32 %v513_v46, %v3231_v58 }
  0xd5   :  { %v657_v63 = vmul.f32 %v3334_v12, %v3334_v12  ;;  %v621_v8 = vmul.f32 %v620_v20, %v3324_v57  ;;  %vm450_vm2 = vcmp.eq.f32.partialorder %v449_v0, 8.507059e+37  ;;  %v552_v41 = vmul.f32 %v551_v55, %v3262_v23 }
  0xd6   :  { %v232_v26 = vpop.f32.mrf.mxu1  ;;  %v448_v14 = vsel %vm447_vm1, %v2839_v18, %v444_v62  ;;  %v3371_v17 = vmul.f32 0.5, %v3208_v31  ;;  %v545_v45 = vmul.f32 %v544_v42, %v3262_v23  ;;  %v583_v18 = vmul.f32 %v582_v56, %v3295_v40 }
  0xd7   :  { %v233_v27 = vadd.f32 %v232_v26, %v146_v1  ;;  %v3353_v52 = vmin.f32 %v657_v63, 16.0  ;;  %v452_v1 = vor.u32 1.1754944e-38, %v451_v7  ;;  %v515_v38 = vadd.f32 0.112945676, %v514_v5 }
  0xd8   :  { %v468_v63 = vadd.f32 1.1283791, %v467_v3  ;;  %v507_v28 = vmul.f32 %v506_v4, %v3231_v58  ;;  %v622_v32 = vadd.f32 0.0036580483, %v621_v8  ;;  %v553_v37 = vadd.f32 0.014752088, %v552_v41 }
  0xd9   :  { %v3348_v35 = vadd.f32 %v3099_v53, %v233_v27  ;;  %v659_v13 = vmul.f32 2.1237322e-06, %v3353_v52  ;;  %v453_v47 = vsel %vm450_vm2, %v452_v1, %v448_v14  ;;  %v939_v27 = vadd.f32 1.0, %v2683_v60 }
  0xda   :  { %v454_v26 = vmul.f32 %v453_v47, %v429_v21  ;;  %v3380_v34 = vpop.eup %2840  ;;  %v516_v21 = vmul.f32 %v515_v38, %v3231_v58  ;;  %v546_v42 = vadd.f32 0.18741608, %v545_v45  ;;  %v584_v20 = vadd.f32 0.05243302, %v583_v18 }
  0xdb   :  { %v148_v50 = vpop.f32.mrf.mxu0  ;;  %v3356_v51 = vmul.f32 0.70710677, %v3348_v35  ;;  %v660_v31 = vadd.f32 0.00028619796, %v659_v13  ;;  %v481_v3 = vmul.f32 %v3380_v34, %v3358_v15  ;;  %v955_v4 = vmul.f32 %v939_v27, %v3290_v33 }
  0xdc   :  { %v2684_v49 = vclamps-f32 %v454_v26, 1.0  ;;  %v623_v55 = vmul.f32 %v622_v32, %v3324_v57  ;;  %v554_v5 = vmul.f32 %v553_v37, %v3262_v23  ;;  %v508_v13 = vadd.f32 1.1283791, %v507_v28 }
  0xdd   :  { %v697_v30 = vmul.f32 %v3356_v51, %v3356_v51  ;;  %v482_v62 = vsub.f32 1.0, %v481_v3  ;;  %v3407_v47 = vmul.f32 0.5, %v3258_v43  ;;  %v547_v45 = vmul.f32 %v546_v42, %v3262_v23 }
  0xde   :  { %v234_v2 = vpop.f32.mrf.mxu1  ;;  %v940_v44 = vadd.f32 1.0, %v2684_v49  ;;  %v624_v26 = vadd.f32 0.05243302, %v623_v55  ;;  %vm486_vm3 = vweird.f32 %v3380_v34  ;;  %v491_v32 = vand.u32 2147483648, %v3358_v15 }
  0xdf   :  { %v235_v9 = vadd.f32 %v234_v2, %v148_v50  ;;  %v3367_v16 = vmin.f32 %v697_v30, 16.0  ;;  %v517_v50 = vadd.f32 0.4994258, %v516_v21  ;;  %v661_v30 = vmul.f32 %v660_v31, %v3353_v52 }
  0xe0   :  { %v956_v56 = vmul.f32 %v940_v44, %v3321_v6  ;;  %v3404_v6 = vmul.f32 0.5, %v3237_v59  ;;  %v555_v59 = vadd.f32 0.112945676, %v554_v5  ;;  %v590_v31 = vmul.f32 3.8918573e-05, %v3295_v40 }
  0xe1   :  { %v3375_v24 = vadd.f32 %v3099_v53, %v235_v9  ;;  %v699_v25 = vmul.f32 2.1237322e-06, %v3367_v16  ;;  %v518_v2 = vmul.f32 %v517_v50, %v3231_v58  ;;  %v483_v9 = vmul.f32 %v3380_v34, %v482_v62 }
  0xe2   :  { %v970_v8 = vpack.c.bf16 %v956_v56, %v955_v4  ;;  %v469_v58 = vmul.f32 %v468_v63, %v3192_v11  ;;  %v662_v27 = vadd.f32 0.0036580483, %v661_v30  ;;  %v3422_v11 = vmul.f32 %v508_v13, %v3215_v39 }
  0xe3   :  { %v3383_v36 = vmul.f32 0.70710677, %v3375_v24  ;;  %v700_v7 = vadd.f32 0.00028619796, %v699_v25  ;;  %v151_v46 = vpop.f32.mrf.mxu0  ;;  %v3409_v41 = vadd.f32 1.0, %v518_v2  ;;  %v585_v25 = vmul.f32 %v584_v20, %v3295_v40 }
  0xe4   :  { %1056 = vmatmul.bf16.gmra.mxu2 %v970_v8  ;;  %v484_v28 = vadd.f32 %v3380_v34, %v483_v9  ;;  %v3425_v63 = vmul.f32 0.5, %v3281_v22  ;;  %v625_v21 = vmul.f32 %v624_v26, %v3324_v57  ;;  %vm485_vm4 = vweird.f32 %v3358_v15 }
  0xe5   :  { %v737_v48 = vmul.f32 %v3383_v36, %v3383_v36  ;;  %v701_v33 = vmul.f32 %v700_v7, %v3367_v16  ;;  %2842 = vrcp.f32 %v3409_v41  ;;  %v489_v42 = vand.u32 2147483647, %v3358_v15  ;;  %vm3433_vm5 = vmor %vm485_vm4, %vm486_vm3 }
  0xe6   :  { %v237_v0 = vpop.f32.mrf.mxu1  ;;  %v548_v44 = vadd.f32 1.1283791, %v547_v45  ;;  %v663_v39 = vmul.f32 %v662_v27, %v3353_v52  ;;  %v556_v3 = vmul.f32 %v555_v59, %v3262_v23  ;;  %v586_v20 = vadd.f32 0.18741608, %v585_v25 }
  0xe7   :  { %v238_v60 = vadd.f32 %v237_v0, %v151_v46  ;;  %v3394_v1 = vmin.f32 %v737_v48, 16.0  ;;  %v702_v38 = vadd.f32 0.0036580483, %v701_v33  ;;  %v488_v15 = vsel %vm3433_vm5, %v3380_v34, %v484_v28 }
  0xe8   :  { %v3445_v50 = vmul.f32 0.5, %v3310_v54  ;;  %v492_v55 = vor.u32 1.1754944e-38, %v491_v32  ;;  %v557_v56 = vadd.f32 0.4994258, %v556_v3  ;;  %v626_v62 = vadd.f32 0.18741608, %v625_v21 }
  0xe9   :  { %v3400_v14 = vadd.f32 %v3099_v53, %v238_v60  ;;  %v739_v18 = vmul.f32 2.1237322e-06, %v3394_v1  ;;  %v703_v4 = vmul.f32 %v702_v38, %v3367_v16  ;;  %v591_v60 = vadd.f32 0.001143296, %v590_v31 }
  0xea   :  { %vm490_vm6 = vcmp.eq.f32.partialorder %v489_v42, 8.507059e+37  ;;  %v664_v5 = vadd.f32 0.05243302, %v663_v39  ;;  %v558_v34 = vmul.f32 %v557_v56, %v3262_v23  ;;  %v587_v9 = vmul.f32 %v586_v20, %v3295_v40 }
  0xeb   :  { %v3417_v43 = vmul.f32 0.70710677, %v3400_v14  ;;  %v740_v37 = vadd.f32 0.00028619796, %v739_v18  ;;  %v153_v7 = vpop.f32.mrf.mxu0  ;;  %v2843_v0 = vpop.eup %2842  ;;  %v493_v33 = vsel %vm490_vm6, %v492_v55, %v488_v15  ;;  %v704_v54 = vadd.f32 0.05243302, %v703_v4 }
  0xec   :  { %v521_v2 = vmul.f32 %v2843_v0, %v3409_v41  ;;  %v529_v26 = vand.u32 2147483647, %v3409_v41  ;;  %v531_v18 = vand.u32 2147483648, %v3409_v41  ;;  %v3458_v25 = vadd.f32 1.0, %v558_v34 }
  0xed   :  { %v777_v48 = vmul.f32 %v3417_v43, %v3417_v43  ;;  %v741_v30 = vmul.f32 %v740_v37, %v3394_v1  ;;  %v592_v27 = vmul.f32 %v591_v60, %v3295_v40  ;;  %v494_v38 = vmul.f32 %v493_v33, %v469_v58 }
  0xee   :  { %v239_v49 = vpop.f32.mrf.mxu1  ;;  %v522_v45 = vsub.f32 1.0, %v521_v2  ;;  %vm526_vm7 = vweird.f32 %v2843_v0  ;;  %v627_v23 = vmul.f32 %v626_v62, %v3324_v57  ;;  %v665_v32 = vmul.f32 %v664_v5, %v3353_v52 }
  0xef   :  { %v240_v22 = vadd.f32 %v239_v49, %v153_v7  ;;  %v3454_v13 = vmin.f32 %v777_v48, 16.0  ;;  %v742_v59 = vadd.f32 0.0036580483, %v741_v30  ;;  %2844 = vrcp.f32 %v3458_v25 }
  0xf0   :  { %v523_v28 = vmul.f32 %v2843_v0, %v522_v45  ;;  %v3467_v31 = vadd.f32 1.1283791, %v587_v9  ;;  %vm525_vm8 = vweird.f32 %v3409_v41  ;;  %v705_v58 = vmul.f32 %v704_v54, %v3367_v16 }
  0xf1   :  { %v3450_v8 = vadd.f32 %v3099_v53, %v240_v22  ;;  %v779_v21 = vmul.f32 2.1237322e-06, %v3454_v13  ;;  %vm527_vm9 = vmor %vm525_vm8, %vm526_vm7  ;;  %v532_v42 = vor.u32 1.1754944e-38, %v531_v18  ;;  %v593_v39 = vadd.f32 0.014752088, %v592_v27 }
  0xf2   :  { %v524_v37 = vadd.f32 %v2843_v0, %v523_v28  ;;  %v630_v46 = vmul.f32 3.8918573e-05, %v3324_v57  ;;  %v743_v22 = vmul.f32 %v742_v59, %v3394_v1  ;;  %v2685_v3 = vclamps-f32 %v494_v38, 1.0 }
  0xf3   :  { %v3464_v49 = vmul.f32 0.70710677, %v3450_v8  ;;  %vm530_vm10 = vcmp.eq.f32.partialorder %v529_v26, 8.507059e+37  ;;  %v156_v4 = vpop.f32.mrf.mxu0  ;;  %v3474_v48 = vadd.f32 1.1283791, %v627_v23  ;;  %v594_v30 = vmul.f32 %v593_v39, %v3295_v40 }
  0xf4   :  { %v528_v20 = vsel %vm527_vm9, %v2843_v0, %v524_v37  ;;  %v666_v15 = vadd.f32 0.18741608, %v665_v32  ;;  %v780_v56 = vadd.f32 0.00028619796, %v779_v21  ;;  %v3483_v5 = vmul.f32 %v548_v44, %v3245_v19 }
  0xf5   :  { %v533_v55 = vsel %vm530_vm10, %v532_v42, %v528_v20  ;;  %v817_v41 = vmul.f32 %v3464_v49, %v3464_v49  ;;  %v3480_v2 = vpop.eup %2844  ;;  %v706_v0 = vadd.f32 0.18741608, %v705_v58  ;;  %v631_v33 = vadd.f32 0.001143296, %v630_v46 }
  0xf6   :  { %v242_v7 = vpop.f32.mrf.mxu1  ;;  %v534_v60 = vmul.f32 %v533_v55, %v3422_v11  ;;  %v670_v34 = vmul.f32 3.8918573e-05, %v3353_v52  ;;  %v744_v9 = vadd.f32 0.05243302, %v743_v22  ;;  %v941_v45 = vadd.f32 1.0, %v2685_v3 }
  0xf7   :  { %v243_v62 = vadd.f32 %v242_v7, %v156_v4  ;;  %v561_v26 = vmul.f32 %v3480_v2, %v3458_v25  ;;  %v667_v11 = vmul.f32 %v666_v15, %v3353_v52  ;;  %v3489_v18 = vmin.f32 %v817_v41, 16.0 }
  0xf8   :  { %v2686_v54 = vclamps-f32 %v534_v60, 1.0  ;;  %v595_v27 = vadd.f32 0.112945676, %v594_v30  ;;  %v632_v59 = vmul.f32 %v631_v33, %v3324_v57  ;;  %v781_v19 = vmul.f32 %v780_v56, %v3454_v13 }
  0xf9   :  { %v3494_v38 = vadd.f32 %v3099_v53, %v243_v62  ;;  %v562_v28 = vsub.f32 1.0, %v561_v26  ;;  %v707_v23 = vmul.f32 %v706_v0, %v3367_v16  ;;  %v671_v37 = vadd.f32 0.001143296, %v670_v34 }
  0xfa   :  { %v942_v44 = vadd.f32 1.0, %v2686_v54  ;;  %v596_v32 = vmul.f32 %v595_v27, %v3295_v40  ;;  %v633_v21 = vadd.f32 0.014752088, %v632_v59  ;;  %v745_v58 = vmul.f32 %v744_v9, %v3394_v1 }
  0xfb   :  { %v957_v42 = vmul.f32 %v941_v45, %v3331_v10  ;;  %v563_v39 = vmul.f32 %v3480_v2, %v562_v28  ;;  %v819_v46 = vmul.f32 2.1237322e-06, %v3489_v18  ;;  %v672_v20 = vmul.f32 %v671_v37, %v3353_v52  ;;  %v158_v41 = vpop.f32.mrf.mxu0 }
  0xfc   :  { %v958_v7 = vmul.f32 %v942_v44, %v3371_v17  ;;  %v597_v22 = vadd.f32 0.4994258, %v596_v32  ;;  %v634_v3 = vmul.f32 %v633_v21, %v3324_v57  ;;  %v782_v4 = vadd.f32 0.0036580483, %v781_v19 }
  0xfd   :  { %v3506_v55 = vmul.f32 0.70710677, %v3494_v38  ;;  %vm566_vm11 = vweird.f32 %v3480_v2  ;;  %v564_v17 = vadd.f32 %v3480_v2, %v563_v39  ;;  %v746_v30 = vadd.f32 0.18741608, %v745_v58 }
  0xfe   :  { %v971_v15 = vpack.c.bf16 %v958_v7, %v957_v42  ;;  %v244_v10 = vpop.f32.mrf.mxu1  ;;  %v598_v56 = vmul.f32 %v597_v22, %v3295_v40  ;;  %v635_v62 = vadd.f32 0.112945676, %v634_v3  ;;  %vm565_vm12 = vweird.f32 %v3458_v25 }
  0xff   :  { %v245_v60 = vadd.f32 %v244_v10, %v158_v41  ;;  %v571_v0 = vand.u32 2147483648, %v3458_v25  ;;  %v673_v33 = vadd.f32 0.014752088, %v672_v20  ;;  %v820_v34 = vadd.f32 0.00028619796, %v819_v46  ;;  %vm3524_vm13 = vmor %vm565_vm12, %vm566_vm11 }
 0x100   :  { %1061 = vmatmul.bf16.gmra.mxu2 %v971_v15  ;;  %v569_v9 = vand.u32 2147483647, %v3458_v25  ;;  %v3514_v54 = vadd.f32 1.0, %v598_v56  ;;  %v668_v26 = vadd.f32 1.1283791, %v667_v11  ;;  %v783_v40 = vmul.f32 %v782_v4, %v3454_v13 }
 0x101   :  { %v3517_v45 = vadd.f32 %v3099_v53, %v245_v60  ;;  %v857_v27 = vmul.f32 %v3506_v55, %v3506_v55  ;;  %v636_v19 = vmul.f32 %v635_v62, %v3324_v57  ;;  %v568_v25 = vsel %vm3524_vm13, %v3480_v2, %v564_v17 }
 0x102   :  { %2846 = vrcp.f32 %v3514_v54  ;;  %v674_v53 = vmul.f32 %v673_v33, %v3353_v52  ;;  %v710_v11 = vmul.f32 3.8918573e-05, %v3367_v16  ;;  %v3537_v44 = vmul.f32 %v3467_v31, %v3271_v61 }
 0x103   :  { %v708_v28 = vadd.f32 1.1283791, %v707_v23  ;;  %v747_v32 = vmul.f32 %v746_v30, %v3394_v1  ;;  %v572_v21 = vor.u32 1.1754944e-38, %v571_v0  ;;  %v3542_v37 = vmul.f32 %v3474_v48, %v3286_v29 }
 0x104   :  { %v821_v2 = vmul.f32 %v820_v34, %v3489_v18  ;;  %vm570_vm14 = vcmp.eq.f32.partialorder %v569_v9, 8.507059e+37  ;;  %v3546_v58 = vmul.f32 0.70710677, %v3517_v45  ;;  %v3549_v42 = vmul.f32 %v668_v26, %v3334_v12 }
 0x105   :  { %v3551_v7 = vmin.f32 %v857_v27, 16.0  ;;  %v573_v61 = vsel %vm570_vm14, %v572_v21, %v568_v25  ;;  %v637_v31 = vadd.f32 0.4994258, %v636_v19  ;;  %v784_v23 = vadd.f32 0.05243302, %v783_v40 }
 0x106   :  { %v897_v39 = vmul.f32 %v3546_v58, %v3546_v58  ;;  %v675_v46 = vadd.f32 0.112945676, %v674_v53  ;;  %v711_v29 = vadd.f32 0.001143296, %v710_v11  ;;  %v3556_v48 = vmul.f32 %v708_v28, %v3356_v51 }
 0x107   :  { %v748_v22 = vadd.f32 1.1283791, %v747_v32  ;;  %v638_v3 = vmul.f32 %v637_v31, %v3324_v57  ;;  %v750_v20 = vmul.f32 3.8918573e-05, %v3394_v1  ;;  %v822_v4 = vadd.f32 0.0036580483, %v821_v2 }
 0x108   :  { %v2847_v12 = vpop.eup %2846  ;;  %v574_v15 = vmul.f32 %v573_v61, %v3483_v5  ;;  %v676_v41 = vmul.f32 %v675_v46, %v3353_v52  ;;  %v712_v10 = vmul.f32 %v711_v29, %v3367_v16  ;;  %v859_v17 = vmul.f32 2.1237322e-06, %v3551_v7 }
 0x109   :  { %v601_v56 = vmul.f32 %v2847_v12, %v3514_v54  ;;  %v3565_v60 = vadd.f32 1.0, %v638_v3  ;;  %v751_v51 = vadd.f32 0.001143296, %v750_v20  ;;  %v3568_v62 = vmul.f32 %v784_v23, %v3454_v13 }
 0x10a   :  { %v3570_v57 = vmin.f32 %v897_v39, 16.0  ;;  %v677_v30 = vadd.f32 0.4994258, %v676_v41  ;;  %v713_v0 = vadd.f32 0.014752088, %v712_v10  ;;  %v3573_v5 = vmul.f32 %v748_v22, %v3383_v36 }
 0x10b   :  { %v602_v33 = vsub.f32 1.0, %v601_v56  ;;  %v609_v34 = vand.u32 2147483647, %v3514_v54  ;;  %2848 = vrcp.f32 %v3565_v60  ;;  %v823_v9 = vmul.f32 %v822_v4, %v3489_v18 }
 0x10c   :  { %v2687_v26 = vclamps-f32 %v574_v15, 1.0  ;;  %v611_v40 = vand.u32 2147483648, %v3514_v54  ;;  %v678_v27 = vmul.f32 %v677_v30, %v3353_v52  ;;  %vm606_vm15 = vweird.f32 %v2847_v12 }
 0x10d   :  { %v603_v59 = vmul.f32 %v2847_v12, %v602_v33  ;;  %v714_v19 = vmul.f32 %v713_v0, %v3367_v16  ;;  %v752_v25 = vmul.f32 %v751_v51, %v3394_v1  ;;  %v860_v36 = vadd.f32 0.00028619796, %v859_v17 }
 0x10e   :  { %vm605_vm0 = vweird.f32 %v3514_v54  ;;  %v899_v53 = vmul.f32 2.1237322e-06, %v3570_v57  ;;  %v3584_v11 = vadd.f32 1.0, %v678_v27  ;;  %vm610_vm1 = vcmp.eq.f32.partialorder %v609_v34, 8.507059e+37 }
 0x10f   :  { %v604_v28 = vadd.f32 %v2847_v12, %v603_v59  ;;  %v715_v32 = vadd.f32 0.112945676, %v714_v19  ;;  %v753_v21 = vadd.f32 0.014752088, %v752_v25  ;;  %vm607_vm2 = vmor %vm605_vm0, %vm606_vm15  ;;  %v612_v2 = vor.u32 1.1754944e-38, %v611_v40 }
 0x110   :  { %v943_v52 = vadd.f32 1.0, %v2687_v26  ;;  %v649_v61 = vand.u32 2147483647, %v3565_v60  ;;  %2850 = vrcp.f32 %v3584_v11  ;;  %v790_v46 = vmul.f32 3.8918573e-05, %v3454_v13 }
 0x111   :  { %v2849_v31 = vpop.eup %2848  ;;  %v608_v23 = vsel %vm607_vm2, %v2847_v12, %v604_v28  ;;  %v716_v39 = vmul.f32 %v715_v32, %v3367_v16  ;;  %v754_v54 = vmul.f32 %v753_v21, %v3394_v1  ;;  %v3591_v29 = vadd.f32 0.05243302, %v823_v9 }
 0x112   :  { %v613_v22 = vsel %vm610_vm1, %v612_v2, %v608_v23  ;;  %v900_v3 = vadd.f32 0.00028619796, %v899_v53  ;;  %v641_v20 = vmul.f32 %v2849_v31, %v3565_v60  ;;  %v861_v4 = vmul.f32 %v860_v36, %v3551_v7 }
 0x113   :  { %v614_v15 = vmul.f32 %v613_v22, %v3537_v44  ;;  %v651_v41 = vand.u32 2147483648, %v3565_v60  ;;  %v717_v10 = vadd.f32 0.4994258, %v716_v39  ;;  %v959_v12 = vmul.f32 %v943_v52, %v3404_v6 }
 0x114   :  { %v642_v17 = vsub.f32 1.0, %v641_v20  ;;  %vm645_vm3 = vweird.f32 %v3565_v60  ;;  %v755_v56 = vadd.f32 0.112945676, %v754_v54  ;;  %vm3599_vm4 = vcmp.eq.f32.partialorder %v649_v61, 8.507059e+37 }
 0x115   :  { %v2688_v51 = vclamps-f32 %v614_v15, 1.0  ;;  %v718_v0 = vmul.f32 %v717_v10, %v3367_v16  ;;  %v791_v33 = vadd.f32 0.001143296, %v790_v46  ;;  %v901_v44 = vmul.f32 %v900_v3, %v3570_v57 }
 0x116   :  { %v2851_v34 = vpop.eup %2850  ;;  %v643_v9 = vmul.f32 %v2849_v31, %v642_v17  ;;  %vm646_vm5 = vweird.f32 %v2849_v31  ;;  %v756_v26 = vmul.f32 %v755_v56, %v3394_v1  ;;  %v652_v40 = vor.u32 1.1754944e-38, %v651_v41 }
 0x117   :  { %v944_v6 = vadd.f32 1.0, %v2688_v51  ;;  %v681_v27 = vmul.f32 %v2851_v34, %v3584_v11  ;;  %v3607_v59 = vadd.f32 1.0, %v718_v0  ;;  %v689_v25 = vand.u32 2147483647, %v3584_v11  ;;  %vm647_vm6 = vmor %vm645_vm3, %vm646_vm5 }
 0x118   :  { %v644_v19 = vadd.f32 %v2849_v31, %v643_v9  ;;  %v691_v36 = vand.u32 2147483648, %v3584_v11  ;;  %v757_v16 = vadd.f32 0.4994258, %v756_v26  ;;  %v792_v32 = vmul.f32 %v791_v33, %v3454_v13 }
 0x119   :  { %v960_v53 = vmul.f32 %v944_v6, %v3407_v47  ;;  %v682_v28 = vsub.f32 1.0, %v681_v27  ;;  %2852 = vrcp.f32 %v3607_v59  ;;  %vm686_vm7 = vweird.f32 %v2851_v34 }
 0x11a   :  { %v648_v21 = vsel %vm647_vm6, %v2849_v31, %v644_v19  ;;  %v830_v2 = vmul.f32 3.8918573e-05, %v3489_v18  ;;  %v870_v52 = vmul.f32 3.8918573e-05, %v3551_v7  ;;  %v758_v47 = vmul.f32 %v757_v16, %v3394_v1 }
 0x11b   :  { %v972_v61 = vpack.c.bf16 %v960_v53, %v959_v12  ;;  %v653_v23 = vsel %vm3599_vm4, %v652_v40, %v648_v21  ;;  %v683_v39 = vmul.f32 %v2851_v34, %v682_v28  ;;  %v902_v60 = vadd.f32 0.0036580483, %v901_v44 }
 0x11c   :  { %v654_v54 = vmul.f32 %v653_v23, %v3542_v37  ;;  %vm685_vm8 = vweird.f32 %v3584_v11  ;;  %vm3623_vm9 = vcmp.eq.f32.partialorder %v689_v25, 8.507059e+37  ;;  %v729_v22 = vand.u32 2147483647, %v3607_v59 }
 0x11d   :  { %1066 = vmatmul.bf16.gmra.mxu2 %v972_v61  ;;  %v684_v31 = vadd.f32 %v2851_v34, %v683_v39  ;;  %v3628_v3 = vadd.f32 1.0, %v758_v47  ;;  %v793_v20 = vadd.f32 0.014752088, %v792_v32  ;;  %vm687_vm10 = vmor %vm685_vm8, %vm686_vm7  ;;  %v692_v1 = vor.u32 1.1754944e-38, %v691_v36 }
 0x11e   :  { %v2689_v15 = vclamps-f32 %v654_v54, 1.0  ;;  %v831_v41 = vadd.f32 0.001143296, %v830_v2  ;;  %v871_v10 = vadd.f32 0.001143296, %v870_v52  ;;  %v731_v11 = vand.u32 2147483648, %v3607_v59 }
 0x11f   :  { %v2853_v37 = vpop.eup %2852  ;;  %v688_v12 = vsel %vm687_vm10, %v2851_v34, %v684_v31  ;;  %2854 = vrcp.f32 %v3628_v3  ;;  %v910_v17 = vmul.f32 3.8918573e-05, %v3570_v57  ;;  %v862_v56 = vadd.f32 0.0036580483, %v861_v4 }
 0x120   :  { %v903_v51 = vmul.f32 %v902_v60, %v3570_v57  ;;  %v693_v30 = vsel %vm3623_vm9, %v692_v1, %v688_v12  ;;  %v721_v0 = vmul.f32 %v2853_v37, %v3607_v59  ;;  %vm725_vm11 = vweird.f32 %v3607_v59 }
 0x121   :  { %v694_v33 = vmul.f32 %v693_v30, %v3549_v42  ;;  %vm3640_vm12 = vcmp.eq.f32.partialorder %v729_v22, 8.507059e+37  ;;  %v794_v44 = vmul.f32 %v793_v20, %v3454_v13  ;;  %v945_v9 = vadd.f32 1.0, %v2689_v15 }
 0x122   :  { %v722_v26 = vsub.f32 1.0, %v721_v0  ;;  %v832_v4 = vmul.f32 %v831_v41, %v3489_v18  ;;  %v872_v6 = vmul.f32 %v871_v10, %v3551_v7  ;;  %v732_v27 = vor.u32 1.1754944e-38, %v731_v11 }
 0x123   :  { %v2690_v40 = vclamps-f32 %v694_v33, 1.0  ;;  %v795_v19 = vadd.f32 0.112945676, %v794_v44  ;;  %v911_v25 = vadd.f32 0.001143296, %v910_v17  ;;  %vm726_vm13 = vweird.f32 %v2853_v37 }
 0x124   :  { %v723_v36 = vmul.f32 %v2853_v37, %v722_v26  ;;  %v833_v42 = vadd.f32 0.014752088, %v832_v4  ;;  %v873_v16 = vadd.f32 0.014752088, %v872_v6  ;;  %v769_v32 = vand.u32 2147483647, %v3628_v3  ;;  %vm727_vm14 = vmor %vm725_vm11, %vm726_vm13 }
 0x125   :  { %v2855_v53 = vpop.eup %2854  ;;  %v946_v28 = vadd.f32 1.0, %v2690_v40  ;;  %v796_v21 = vmul.f32 %v795_v19, %v3454_v13  ;;  %v912_v2 = vmul.f32 %v911_v25, %v3570_v57  ;;  %v961_v52 = vmul.f32 %v945_v9, %v3425_v63 }
 0x126   :  { %v724_v61 = vadd.f32 %v2853_v37, %v723_v36  ;;  %v761_v23 = vmul.f32 %v2855_v53, %v3628_v3  ;;  %v834_v39 = vmul.f32 %v833_v42, %v3489_v18  ;;  %v874_v54 = vmul.f32 %v873_v16, %v3551_v7 }
 0x127   :  { %v962_v47 = vmul.f32 %v946_v28, %v3445_v50  ;;  %v797_v60 = vadd.f32 0.4994258, %v796_v21  ;;  %v913_v46 = vadd.f32 0.014752088, %v912_v2  ;;  %v771_v20 = vand.u32 2147483648, %v3628_v3 }
 0x128   :  { %v728_v31 = vsel %vm727_vm14, %v2853_v37, %v724_v61  ;;  %v762_v22 = vsub.f32 1.0, %v761_v23  ;;  %v835_v15 = vadd.f32 0.112945676, %v834_v39  ;;  %v875_v10 = vadd.f32 0.112945676, %v874_v54 }
 0x129   :  { %v973_v63 = vpack.c.bf16 %v962_v47, %v961_v52  ;;  %v733_v1 = vsel %vm3640_vm12, %v732_v27, %v728_v31  ;;  %v798_v41 = vmul.f32 %v797_v60, %v3454_v13  ;;  %vm766_vm15 = vweird.f32 %v2855_v53 }
 0x12a   :  { %v763_v50 = vmul.f32 %v2855_v53, %v762_v22  ;;  %v836_v59 = vmul.f32 %v835_v15, %v3489_v18  ;;  %v914_v12 = vmul.f32 %v913_v46, %v3570_v57  ;;  %v825_v37 = vmul.f32 %v3591_v29, %v3489_v18 }
 0x12b   :  { %v734_v11 = vmul.f32 %v733_v1, %v3556_v48  ;;  %v3666_v17 = vadd.f32 1.0, %v798_v41  ;;  %v876_v30 = vmul.f32 %v875_v10, %v3551_v7  ;;  %vm765_vm0 = vweird.f32 %v3628_v3 }
 0x12c   :  { %v764_v0 = vadd.f32 %v2855_v53, %v763_v50  ;;  %v837_v33 = vadd.f32 0.4994258, %v836_v59  ;;  %v915_v34 = vadd.f32 0.112945676, %v914_v12  ;;  %v863_v44 = vmul.f32 %v862_v56, %v3551_v7  ;;  %vm767_vm1 = vmor %vm765_vm0, %vm766_vm15 }
 0x12d   :  { %v904_v9 = vadd.f32 0.05243302, %v903_v51  ;;  %1071 = vmatmul.bf16.gmra.mxu2 %v973_v63  ;;  %v772_v26 = vor.u32 1.1754944e-38, %v771_v20  ;;  %2856 = vrcp.f32 %v3666_v17  ;;  %vm770_vm2 = vcmp.eq.f32.partialorder %v769_v32, 8.507059e+37 }
 0x12e   :  { %v768_v29 = vsel %vm767_vm1, %v2855_v53, %v764_v0  ;;  %v838_v48 = vmul.f32 %v837_v33, %v3489_v18  ;;  %v877_v4 = vadd.f32 0.4994258, %v876_v30  ;;  %v786_v6 = vadd.f32 0.18741608, %v3568_v62 }
 0x12f   :  { %v2691_v40 = vclamps-f32 %v734_v11, 1.0  ;;  %v773_v27 = vsel %vm770_vm2, %v772_v26, %v768_v29  ;;  %v916_v3 = vmul.f32 %v915_v34, %v3570_v57  ;;  %v826_v25 = vadd.f32 0.18741608, %v825_v37 }
 0x130   :  { %v774_v19 = vmul.f32 %v773_v27, %v3573_v5  ;;  %v3676_v56 = vadd.f32 1.0, %v838_v48  ;;  %v878_v51 = vmul.f32 %v877_v4, %v3551_v7  ;;  %v864_v36 = vadd.f32 0.05243302, %v863_v44 }
 0x131   :  { %v917_v42 = vadd.f32 0.4994258, %v916_v3  ;;  %v905_v16 = vmul.f32 %v904_v9, %v3570_v57  ;;  %v787_v62 = vmul.f32 %v786_v6, %v3454_v13  ;;  %v947_v32 = vadd.f32 1.0, %v2691_v40 }
 0x132   :  { %v2692_v53 = vclamps-f32 %v774_v19, 1.0  ;;  %2858 = vrcp.f32 %v3676_v56  ;;  %v3682_v21 = vadd.f32 1.0, %v878_v51  ;;  %v276_v2 = vmul.f32 0.5, %v3375_v24 }
 0x133   :  { %v2857_v28 = vpop.eup %2856  ;;  %v918_v5 = vmul.f32 %v917_v42, %v3570_v57  ;;  %v275_v23 = vmul.f32 0.5, %v3348_v35  ;;  %v827_v39 = vmul.f32 %v826_v25, %v3489_v18  ;;  %v865_v47 = vmul.f32 %v864_v36, %v3551_v7 }
 0x134   :  { %v948_v52 = vadd.f32 1.0, %v2692_v53  ;;  %v801_v61 = vmul.f32 %v2857_v28, %v3666_v17  ;;  %2860 = vrcp.f32 %v3682_v21  ;;  %v906_v60 = vadd.f32 0.18741608, %v905_v16 }
 0x135   :  { %v3691_v46 = vadd.f32 1.0, %v918_v5  ;;  %v788_v31 = vadd.f32 1.1283791, %v787_v62  ;;  %v963_v22 = vmul.f32 %v947_v32, %v275_v23  ;;  %v811_v24 = vand.u32 2147483648, %v3666_v17 }
 0x136   :  { %v964_v13 = vmul.f32 %v948_v52, %v276_v2  ;;  %v802_v54 = vsub.f32 1.0, %v801_v61  ;;  %vm806_vm3 = vweird.f32 %v2857_v28  ;;  %v809_v35 = vand.u32 2147483647, %v3666_v17 }
 0x137   :  { %2862 = vrcp.f32 %v3691_v46  ;;  %v828_v18 = vadd.f32 1.1283791, %v827_v39  ;;  %v866_v41 = vadd.f32 0.18741608, %v865_v47  ;;  %v907_v10 = vmul.f32 %v906_v60, %v3570_v57 }
 0x138   :  { %v2859_v20 = vpop.eup %2858  ;;  %v803_v15 = vmul.f32 %v2857_v28, %v802_v54  ;;  %v974_v63 = vpack.c.bf16 %v964_v13, %v963_v22  ;;  %vm805_vm4 = vweird.f32 %v3666_v17  ;;  %v789_v12 = vmul.f32 %v788_v31, %v3417_v43 }
 0x139   :  { %v841_v1 = vmul.f32 %v2859_v20, %v3676_v56  ;;  %vm807_vm5 = vmor %vm805_vm4, %vm806_vm3  ;;  %v812_v37 = vor.u32 1.1754944e-38, %v811_v24  ;;  %v849_v30 = vand.u32 2147483647, %v3676_v56  ;;  %vm810_vm6 = vcmp.eq.f32.partialorder %v809_v35, 8.507059e+37 }
 0x13a   :  { %v804_v50 = vadd.f32 %v2857_v28, %v803_v15  ;;  %v2861_v59 = vpop.eup %2860  ;;  %v851_v33 = vand.u32 2147483648, %v3676_v56  ;;  %v829_v44 = vmul.f32 %v828_v18, %v3464_v49  ;;  %vm846_vm7 = vweird.f32 %v2859_v20 }
 0x13b   :  { %v842_v11 = vsub.f32 1.0, %v841_v1  ;;  %v881_v34 = vmul.f32 %v2861_v59, %v3682_v21  ;;  %v867_v43 = vmul.f32 %v866_v41, %v3551_v7  ;;  %v908_v26 = vadd.f32 1.1283791, %v907_v10 }
 0x13c   :  { %v808_v0 = vsel %vm807_vm5, %v2857_v28, %v804_v50  ;;  %vm845_vm8 = vweird.f32 %v3676_v56  ;;  %vm850_vm9 = vcmp.eq.f32.partialorder %v849_v30, 8.507059e+37  ;;  %v852_v40 = vor.u32 1.1754944e-38, %v851_v33 }
 0x13d   :  { %1076 = vmatmul.bf16.gmra.mxu2 %v974_v63  ;;  %v813_v57 = vsel %vm810_vm6, %v812_v37, %v808_v0  ;;  %v843_v9 = vmul.f32 %v2859_v20, %v842_v11  ;;  %v2863_v17 = vpop.eup %2862  ;;  %v882_v48 = vsub.f32 1.0, %v881_v34  ;;  %vm847_vm10 = vmor %vm845_vm8, %vm846_vm7  ;;  %vm885_vm11 = vweird.f32 %v3682_v21 }
 0x13e   :  { %v814_v29 = vmul.f32 %v813_v57, %v789_v12  ;;  %v921_v6 = vmul.f32 %v2863_v17, %v3691_v46  ;;  %v889_v49 = vand.u32 2147483647, %v3682_v21  ;;  %vm886_vm12 = vweird.f32 %v2861_v59 }
 0x13f   :  { %v844_v4 = vadd.f32 %v2859_v20, %v843_v9  ;;  %v883_v27 = vmul.f32 %v2861_v59, %v882_v48  ;;  %v891_v36 = vand.u32 2147483648, %v3682_v21  ;;  %v931_v56 = vand.u32 2147483648, %v3691_v46  ;;  %vm3715_vm14 = vmor %vm885_vm11, %vm886_vm12  ;;  %v3727_v21 = vld [vmem:[%s4957_s6 + $0x1] ss:$0 sm:$0xff] }
 0x140   :  { %v2693_v3 = vclamps-f32 %v814_v29, 1.0  ;;  %v922_v7 = vsub.f32 1.0, %v921_v6  ;;  %vm926_vm13 = vweird.f32 %v2863_v17  ;;  %v929_v53 = vand.u32 2147483647, %v3691_v46 }
 0x141   :  { %v848_v19 = vsel %vm847_vm10, %v2859_v20, %v844_v4  ;;  %v884_v25 = vadd.f32 %v2861_v59, %v883_v27  ;;  %v277_v28 = vmul.f32 0.5, %v3400_v14  ;;  %v868_v62 = vadd.f32 1.1283791, %v867_v43 }
 0x142   :  { %v853_v51 = vsel %vm850_vm9, %v852_v40, %v848_v19  ;;  %v923_v16 = vmul.f32 %v2863_v17, %v922_v7  ;;  %vm925_vm15 = vweird.f32 %v3691_v46  ;;  %v949_v2 = vadd.f32 1.0, %v2693_v3 }
 0x143   :  { %v854_v42 = vmul.f32 %v853_v51, %v829_v44  ;;  %v888_v52 = vsel %vm3715_vm14, %v2861_v59, %v884_v25  ;;  %v278_v23 = vmul.f32 0.5, %v3450_v8  ;;  %v909_v39 = vmul.f32 %v908_v26, %v3546_v58  ;;  %vm927_vm0 = vmor %vm925_vm15, %vm926_vm13 }
 0x144   :  { %v924_v61 = vadd.f32 %v2863_v17, %v923_v16  ;;  %v892_v14 = vor.u32 1.1754944e-38, %v891_v36  ;;  %v932_v47 = vor.u32 1.1754944e-38, %v931_v56  ;;  %vm890_vm1 = vcmp.eq.f32.partialorder %v889_v49, 8.507059e+37 }
 0x145   :  { %v2694_v5 = vclamps-f32 %v854_v42, 1.0  ;;  %vm930_vm2 = vcmp.eq.f32.partialorder %v929_v53, 8.507059e+37  ;;  %v869_v22 = vmul.f32 %v868_v62, %v3506_v55  ;;  %v965_v8 = vmul.f32 %v949_v2, %v277_v28 }
 0x146   :  { %v928_v13 = vsel %vm927_vm0, %v2863_v17, %v924_v61  ;;  %v893_v46 = vsel %vm890_vm1, %v892_v14, %v888_v52  ;;  %v280_v59 = vmul.f32 0.5, %v3517_v45  ;;  %v279_v11 = vmul.f32 0.5, %v3494_v38 }
 0x147   :  { %v950_v60 = vadd.f32 1.0, %v2694_v5  ;;  %v933_v31 = vsel %vm930_vm2, %v932_v47, %v928_v13  ;;  %v894_v35 = vmul.f32 %v893_v46, %v869_v22  ;;  %v2826_v22 = vld [vmem:[%s4958_s4 + $0x78] sm:$0xff] }
 0x148   :  { %v934_v58 = vmul.f32 %v933_v31, %v909_v39  ;;  %1871 = vmatpush.bf16.msra.mxu3 %v2826_v22 }
 0x149   :  { %v966_v24 = vmul.f32 %v950_v60, %v278_v23  ;;  %v2695_v1 = vclamps-f32 %v894_v35, 1.0 }
 0x14a   :  { %v2696_v18 = vclamps-f32 %v934_v58, 1.0 }
 0x14b   :  { %v975_v15 = vpack.c.bf16 %v966_v24, %v965_v8  ;;  %v951_v12 = vadd.f32 1.0, %v2695_v1 }
 0x14c   :  { %v1052_v54 = vpop.f32.mrf.mxu2  ;;  %v952_v50 = vadd.f32 1.0, %v2696_v18 }
 0x14d   :  { %v3731_v20 = vadd.f32 %v3727_v21, %v1052_v54  ;;  %1081 = vmatmul.bf16.gmra.mxu2 %v975_v15  ;;  %v967_v33 = vmul.f32 %v951_v12, %v279_v11 }
 0x14e   :  { %v968_v30 = vmul.f32 %v952_v50, %v280_v59  ;;  %v2825_v59 = vld [vmem:[%s4958_s4 + $0x70] sm:$0xff] }
 0x14f   :  { %v3734_v63 = vmul.f32 0.70710677, %v3731_v20  ;;  %1872 = vmatpush.bf16.msra.mxu3 %v2825_v59 }
 0x150   :  { %v976_v44 = vpack.c.bf16 %v968_v30, %v967_v33 }
 0x151   :  { %v1124_v55 = vmul.f32 %v3734_v63, %v3734_v63 }
 0x153   :  { %v3746_v0 = vmin.f32 %v1124_v55, 16.0 }
 0x154   :  { %v1054_v41 = vpop.f32.mrf.mxu2 }
 0x155   :  { %v3737_v10 = vadd.f32 %v3727_v21, %v1054_v41  ;;  %v1126_v57 = vmul.f32 2.1237322e-06, %v3746_v0  ;;  %v1137_v45 = vmul.f32 3.8918573e-05, %v3746_v0 }
 0x157   :  { %v3743_v37 = vmul.f32 0.70710677, %v3737_v10  ;;  %v1127_v17 = vadd.f32 0.00028619796, %v1126_v57  ;;  %v1138_v43 = vadd.f32 0.001143296, %v1137_v45 }
 0x159   :  { %v1164_v34 = vmul.f32 %v3743_v37, %v3743_v37  ;;  %v1139_v38 = vmul.f32 %v1138_v43, %v3746_v0  ;;  %v1128_v29 = vmul.f32 %v1127_v17, %v3746_v0 }
 0x15b   :  { %v3751_v9 = vmin.f32 %v1164_v34, 16.0  ;;  %v1140_v48 = vadd.f32 0.014752088, %v1139_v38  ;;  %v1129_v27 = vadd.f32 0.0036580483, %v1128_v29  ;;  %v2824_v38 = vld [vmem:[%s4958_s4 + $0x68] sm:$0xff] }
 0x15c   :  { %1873 = vmatpush.bf16.msra.mxu3 %v2824_v38  ;;  %v2820_v38 = vld [vmem:[%s4958_s4 + $0x48] sm:$0xff] }
 0x15d   :  { %1086 = vmatmul.bf16.gmra.mxu2 %v976_v44  ;;  %v1166_v26 = vmul.f32 2.1237322e-06, %v3751_v9  ;;  %v1141_v6 = vmul.f32 %v1140_v48, %v3746_v0  ;;  %v1177_v40 = vmul.f32 3.8918573e-05, %v3751_v9  ;;  %v1130_v42 = vmul.f32 %v1129_v27, %v3746_v0 }
 0x15f   :  { %v1167_v4 = vadd.f32 0.00028619796, %v1166_v26  ;;  %v1142_v3 = vadd.f32 0.112945676, %v1141_v6  ;;  %v1178_v19 = vadd.f32 0.001143296, %v1177_v40 }
 0x160   :  { %v1131_v52 = vadd.f32 0.05243302, %v1130_v42 }
 0x161   :  { %v1168_v51 = vmul.f32 %v1167_v4, %v3751_v9  ;;  %v1143_v25 = vmul.f32 %v1142_v3, %v3746_v0  ;;  %v1179_v36 = vmul.f32 %v1178_v19, %v3751_v9 }
 0x162   :  { %v1132_v31 = vmul.f32 %v1131_v52, %v3746_v0 }
 0x163   :  { %v1144_v16 = vadd.f32 0.4994258, %v1143_v25  ;;  %v1180_v53 = vadd.f32 0.014752088, %v1179_v36  ;;  %v1169_v62 = vadd.f32 0.0036580483, %v1168_v51 }
 0x164   :  { %v1133_v55 = vadd.f32 0.18741608, %v1132_v31  ;;  %v2823_v51 = vld [vmem:[%s4958_s4 + $0x60] sm:$0xff] }
 0x165   :  { %v1145_v32 = vmul.f32 %v1144_v16, %v3746_v0  ;;  %v1181_v5 = vmul.f32 %v1180_v53, %v3751_v9  ;;  %v1170_v13 = vmul.f32 %v1169_v62, %v3751_v9  ;;  %1874 = vmatpush.bf16.msra.mxu3 %v2823_v51 }
 0x166   :  { %v1134_v26 = vmul.f32 %v1133_v55, %v3746_v0 }
 0x167   :  { %v1057_v49 = vpop.f32.mrf.mxu2  ;;  %v3775_v23 = vadd.f32 1.0, %v1145_v32  ;;  %v1182_v39 = vadd.f32 0.112945676, %v1181_v5  ;;  %v1171_v35 = vadd.f32 0.05243302, %v1170_v13 }
 0x168   :  { %v3760_v7 = vadd.f32 %v3727_v21, %v1057_v49  ;;  %v1135_v42 = vadd.f32 1.1283791, %v1134_v26 }
 0x169   :  { %2864 = vrcp.f32 %v3775_v23  ;;  %v1183_v46 = vmul.f32 %v1182_v39, %v3751_v9  ;;  %v1172_v34 = vmul.f32 %v1171_v35, %v3751_v9  ;;  %v1158_v27 = vand.u32 2147483648, %v3775_v23 }
 0x16a   :  { %v3766_v56 = vmul.f32 0.70710677, %v3760_v7  ;;  %vm1152_vm4 = vweird.f32 %v3775_v23  ;;  %v1156_v0 = vand.u32 2147483647, %v3775_v23  ;;  %v1136_v31 = vmul.f32 %v1135_v42, %v3734_v63  ;;  %v2821_v63 = vld [vmem:[%s4958_s4 + $0x50] sm:$0xff]  ;;  %v2819_v42 = vld [vmem:[%s4958_s4 + $0x40] sm:$0xff] }
 0x16b   :  { %v1184_v15 = vadd.f32 0.4994258, %v1183_v46  ;;  %v1173_v6 = vadd.f32 0.18741608, %v1172_v34  ;;  %v1159_v5 = vor.u32 1.1754944e-38, %v1158_v27 }
 0x16c   :  { %v1204_v28 = vmul.f32 %v3766_v56, %v3766_v56  ;;  %vm1157_vm6 = vcmp.eq.f32.partialorder %v1156_v0, 8.507059e+37 }
 0x16d   :  { %v1185_v41 = vmul.f32 %v1184_v15, %v3751_v9 }
 0x16e   :  { %v3773_v2 = vmin.f32 %v1204_v28, 16.0 }
 0x16f   :  { %v1059_v61 = vpop.f32.mrf.mxu2  ;;  %v2865_v50 = vpop.eup %2864  ;;  %v3805_v44 = vadd.f32 1.0, %v1185_v41 }
 0x170   :  { %v1206_v14 = vmul.f32 2.1237322e-06, %v3773_v2  ;;  %v3779_v47 = vadd.f32 %v3727_v21, %v1059_v61  ;;  %v1217_v60 = vmul.f32 3.8918573e-05, %v3773_v2  ;;  %v1148_v33 = vmul.f32 %v2865_v50, %v3775_v23 }
 0x171   :  { %2866 = vrcp.f32 %v3805_v44  ;;  %vm1153_vm3 = vweird.f32 %v2865_v50  ;;  %v1174_v61 = vmul.f32 %v1173_v6, %v3751_v9  ;;  %v1196_v59 = vand.u32 2147483647, %v3805_v44 }
 0x172   :  { %v3785_v54 = vmul.f32 0.70710677, %v3779_v47  ;;  %v1218_v8 = vadd.f32 0.001143296, %v1217_v60  ;;  %v1207_v24 = vadd.f32 0.00028619796, %v1206_v14  ;;  %vm3822_vm5 = vmor %vm1152_vm4, %vm1153_vm3  ;;  %vm1192_vm8 = vweird.f32 %v3805_v44 }
 0x173   :  { %v1149_v43 = vsub.f32 1.0, %v1148_v33  ;;  %v2822_v14 = vld [vmem:[%s4958_s4 + $0x58] sm:$0xff]  ;;  %v1175_v35 = vadd.f32 1.1283791, %v1174_v61  ;;  %vm1197_vm10 = vcmp.eq.f32.partialorder %v1196_v59, 8.507059e+37 }
 0x174   :  { %v1244_v58 = vmul.f32 %v3785_v54, %v3785_v54  ;;  %v1219_v18 = vmul.f32 %v1218_v8, %v3773_v2  ;;  %v1208_v11 = vmul.f32 %v1207_v24, %v3773_v2  ;;  %1875 = vmatpush.bf16.msra.mxu3 %v2822_v14 }
 0x175   :  { %v1150_v48 = vmul.f32 %v2865_v50, %v1149_v43  ;;  %v1176_v43 = vmul.f32 %v1175_v35, %v3743_v37 }
 0x176   :  { %v3795_v1 = vmin.f32 %v1244_v58, 16.0  ;;  %v1220_v12 = vadd.f32 0.014752088, %v1219_v18  ;;  %v1209_v29 = vadd.f32 0.0036580483, %v1208_v11 }
 0x177   :  { %v1151_v3 = vadd.f32 %v2865_v50, %v1150_v48  ;;  %v2867_v62 = vpop.eup %2866 }
 0x178   :  { %v1246_v30 = vmul.f32 2.1237322e-06, %v3795_v1  ;;  %v1221_v57 = vmul.f32 %v1220_v12, %v3773_v2  ;;  %v1257_v45 = vmul.f32 3.8918573e-05, %v3795_v1  ;;  %v1210_v16 = vmul.f32 %v1209_v29, %v3773_v2  ;;  %1876 = vmatpush.bf16.msra.mxu3 %v2821_v63 }
 0x179   :  { %v1155_v53 = vsel %vm3822_vm5, %v2865_v50, %v1151_v3  ;;  %v1188_v23 = vmul.f32 %v2867_v62, %v3805_v44  ;;  %v1198_v50 = vand.u32 2147483648, %v3805_v44  ;;  %vm1193_vm7 = vweird.f32 %v2867_v62 }
 0x17a   :  { %v1247_v17 = vadd.f32 0.00028619796, %v1246_v30  ;;  %v1222_v4 = vadd.f32 0.112945676, %v1221_v57  ;;  %v1258_v49 = vadd.f32 0.001143296, %v1257_v45  ;;  %v1160_v60 = vsel %vm1157_vm6, %v1159_v5, %v1155_v53  ;;  %vm1194_vm9 = vmor %vm1192_vm8, %vm1193_vm7 }
 0x17b   :  { %v1211_v22 = vadd.f32 0.05243302, %v1210_v16  ;;  %v1189_v24 = vsub.f32 1.0, %v1188_v23  ;;  %v1161_v41 = vmul.f32 %v1160_v60, %v1136_v31 }
 0x17c   :  { %v1248_v40 = vmul.f32 %v1247_v17, %v3795_v1  ;;  %v1223_v19 = vmul.f32 %v1222_v4, %v3773_v2  ;;  %v1259_v36 = vmul.f32 %v1258_v49, %v3795_v1  ;;  %v1199_v17 = vor.u32 1.1754944e-38, %v1198_v50  ;;  %1877 = vmatpush.bf16.msra.mxu3 %v2820_v38 }
 0x17d   :  { %v1190_v55 = vmul.f32 %v2867_v62, %v1189_v24  ;;  %v1212_v12 = vmul.f32 %v1211_v22, %v3773_v2  ;;  %v2729_v45 = vclamps-f32 %v1161_v41, 1.0 }
 0x17e   :  { %v1224_v28 = vadd.f32 0.4994258, %v1223_v19  ;;  %v1249_v32 = vadd.f32 0.0036580483, %v1248_v40  ;;  %v1260_v52 = vadd.f32 0.014752088, %v1259_v36 }
 0x17f   :  { %v1191_v33 = vadd.f32 %v2867_v62, %v1190_v55  ;;  %v1213_v4 = vadd.f32 0.18741608, %v1212_v12  ;;  %v1764_v25 = vadd.f32 1.0, %v2729_v45 }
 0x180   :  { %v1225_v13 = vmul.f32 %v1224_v28, %v3773_v2  ;;  %v1261_v46 = vmul.f32 %v1260_v52, %v3795_v1  ;;  %v1250_v9 = vmul.f32 %v1249_v32, %v3795_v1  ;;  %v1093_v32 = vmul.f32 0.5, %v3737_v10  ;;  %1878 = vmatpush.bf16.msra.mxu3 %v2819_v42 }
 0x181   :  { %v1195_v29 = vsel %vm1194_vm9, %v2867_v62, %v1191_v33  ;;  %v1092_v62 = vmul.f32 0.5, %v3731_v20  ;;  %v1214_v61 = vmul.f32 %v1213_v4, %v3773_v2 }
 0x182   :  { %v3842_v58 = vadd.f32 1.0, %v1225_v13  ;;  %v1262_v15 = vadd.f32 0.112945676, %v1261_v46  ;;  %v1251_v30 = vadd.f32 0.05243302, %v1250_v9  ;;  %v1200_v40 = vsel %vm1197_vm10, %v1199_v17, %v1195_v29 }
 0x183   :  { %v1062_v39 = vpop.f32.mrf.mxu2  ;;  %v1201_v37 = vmul.f32 %v1200_v40, %v1176_v43  ;;  %v1780_v60 = vmul.f32 %v1764_v25, %v1092_v62  ;;  %v1215_v50 = vadd.f32 1.1283791, %v1214_v61 }
 0x184   :  { %v3839_v8 = vadd.f32 %v3727_v21, %v1062_v39  ;;  %2868 = vrcp.f32 %v3842_v58  ;;  %v1263_v34 = vmul.f32 %v1262_v15, %v3795_v1  ;;  %v1252_v49 = vmul.f32 %v1251_v30, %v3795_v1 }
 0x185   :  { %v2730_v16 = vclamps-f32 %v1201_v37, 1.0  ;;  %v1238_v10 = vand.u32 2147483648, %v3842_v58  ;;  %vm1232_vm12 = vweird.f32 %v3842_v58  ;;  %v1236_v9 = vand.u32 2147483647, %v3842_v58 }
 0x186   :  { %v3845_v18 = vmul.f32 0.70710677, %v3839_v8  ;;  %v1264_v48 = vadd.f32 0.4994258, %v1263_v34  ;;  %v1253_v23 = vadd.f32 0.18741608, %v1252_v49 }
 0x187   :  { %v1765_v39 = vadd.f32 1.0, %v2730_v16  ;;  %v1239_v30 = vor.u32 1.1754944e-38, %v1238_v10  ;;  %vm1237_vm14 = vcmp.eq.f32.partialorder %v1236_v9, 8.507059e+37 }
 0x188   :  { %v1284_v11 = vmul.f32 %v3845_v18, %v3845_v18  ;;  %v1265_v3 = vmul.f32 %v1264_v48, %v3795_v1  ;;  %v1254_v63 = vmul.f32 %v1253_v23, %v3795_v1 }
 0x189   :  { %v1781_v46 = vmul.f32 %v1765_v39, %v1093_v32 }
 0x18a   :  { %v3858_v57 = vmin.f32 %v1284_v11, 16.0  ;;  %v2869_v27 = vpop.eup %2868  ;;  %v3878_v53 = vadd.f32 1.0, %v1265_v3  ;;  %v1255_v38 = vadd.f32 1.1283791, %v1254_v63 }
 0x18b   :  { %v1064_v26 = vpop.f32.mrf.mxu2  ;;  %v1228_v36 = vmul.f32 %v2869_v27, %v3842_v58  ;;  %vm1233_vm11 = vweird.f32 %v2869_v27  ;;  %v1796_v24 = vpack.c.bf16 %v1781_v46, %v1780_v60 }
 0x18c   :  { %v1286_v44 = vmul.f32 2.1237322e-06, %v3858_v57  ;;  %v3866_v6 = vadd.f32 %v3727_v21, %v1064_v26  ;;  %v1297_v0 = vmul.f32 3.8918573e-05, %v3858_v57  ;;  %2870 = vrcp.f32 %v3878_v53  ;;  %vm3894_vm13 = vmor %vm1232_vm12, %vm1233_vm11 }
 0x18d   :  { %v1229_v52 = vsub.f32 1.0, %v1228_v36  ;;  %1879 = vmatmul.bf16.vlgmr.msra.gmra.mxu3 %v1796_v24  ;;  %v1216_v26 = vmul.f32 %v1215_v50, %v3766_v56  ;;  %v1278_v48 = vand.u32 2147483648, %v3878_v53  ;;  %v1276_v3 = vand.u32 2147483647, %v3878_v53 }
 0x18e   :  { %v1287_v19 = vadd.f32 0.00028619796, %v1286_v44  ;;  %v3872_v51 = vmul.f32 0.70710677, %v3866_v6  ;;  %v1298_v28 = vadd.f32 0.001143296, %v1297_v0  ;;  %vm1272_vm0 = vweird.f32 %v3878_v53 }
 0x18f   :  { %v1230_v13 = vmul.f32 %v2869_v27, %v1229_v52  ;;  %v1279_v56 = vor.u32 1.1754944e-38, %v1278_v48  ;;  %v1256_v62 = vmul.f32 %v1255_v38, %v3785_v54  ;;  %vm1277_vm2 = vcmp.eq.f32.partialorder %v1276_v3, 8.507059e+37 }
 0x190   :  { %v1324_v5 = vmul.f32 %v3872_v51, %v3872_v51  ;;  %v1288_v20 = vmul.f32 %v1287_v19, %v3858_v57  ;;  %v1299_v31 = vmul.f32 %v1298_v28, %v3858_v57 }
 0x191   :  { %v1231_v2 = vadd.f32 %v2869_v27, %v1230_v13 }
 0x192   :  { %v3886_v14 = vmin.f32 %v1324_v5, 16.0  ;;  %v1300_v35 = vadd.f32 0.014752088, %v1299_v31  ;;  %v2871_v12 = vpop.eup %2870  ;;  %v1289_v11 = vadd.f32 0.0036580483, %v1288_v20 }
 0x193   :  { %v1235_v59 = vsel %vm3894_vm13, %v2869_v27, %v1231_v2  ;;  %v1268_v45 = vmul.f32 %v2871_v12, %v3878_v53  ;;  %vm1273_vm15 = vweird.f32 %v2871_v12  ;;  %v1095_v2 = vmul.f32 0.5, %v3779_v47 }
 0x194   :  { %v1326_v22 = vmul.f32 2.1237322e-06, %v3886_v14  ;;  %v1337_v41 = vmul.f32 3.8918573e-05, %v3886_v14  ;;  %v1301_v58 = vmul.f32 %v1300_v35, %v3858_v57  ;;  %v1240_v17 = vsel %vm1237_vm14, %v1239_v30, %v1235_v59  ;;  %vm1274_vm1 = vmor %vm1272_vm0, %vm1273_vm15 }
 0x195   :  { %v1269_v29 = vsub.f32 1.0, %v1268_v45  ;;  %v1290_v4 = vmul.f32 %v1289_v11, %v3858_v57  ;;  %v1241_v49 = vmul.f32 %v1240_v17, %v1216_v26 }
 0x196   :  { %v1327_v55 = vadd.f32 0.00028619796, %v1326_v22  ;;  %v1338_v33 = vadd.f32 0.001143296, %v1337_v41  ;;  %v1302_v43 = vadd.f32 0.112945676, %v1301_v58 }
 0x197   :  { %v1270_v37 = vmul.f32 %v2871_v12, %v1269_v29  ;;  %v1291_v36 = vadd.f32 0.05243302, %v1290_v4  ;;  %v2731_v32 = vclamps-f32 %v1241_v49, 1.0  ;;  %v1094_v22 = vmul.f32 0.5, %v3760_v7 }
 0x198   :  { %v1328_v34 = vmul.f32 %v1327_v55, %v3886_v14  ;;  %v1339_v1 = vmul.f32 %v1338_v33, %v3886_v14  ;;  %v1303_v40 = vmul.f32 %v1302_v43, %v3858_v57 }
 0x199   :  { %v1271_v25 = vadd.f32 %v2871_v12, %v1270_v37  ;;  %v1292_v13 = vmul.f32 %v1291_v36, %v3858_v57  ;;  %v1766_v10 = vadd.f32 1.0, %v2731_v32 }
 0x19a   :  { %v1329_v44 = vadd.f32 0.0036580483, %v1328_v34  ;;  %v1340_v27 = vadd.f32 0.014752088, %v1339_v1  ;;  %v1304_v0 = vadd.f32 0.4994258, %v1303_v40 }
 0x19b   :  { %v1275_v5 = vsel %vm1274_vm1, %v2871_v12, %v1271_v25  ;;  %v1293_v15 = vadd.f32 0.18741608, %v1292_v13  ;;  %v1782_v63 = vmul.f32 %v1766_v10, %v1094_v22 }
 0x19c   :  { %v1341_v19 = vmul.f32 %v1340_v27, %v3886_v14  ;;  %v1330_v42 = vmul.f32 %v1329_v44, %v3886_v14  ;;  %v1305_v16 = vmul.f32 %v1304_v0, %v3858_v57  ;;  %v1280_v61 = vsel %vm1277_vm2, %v1279_v56, %v1275_v5 }
 0x19d   :  { %v1281_v60 = vmul.f32 %v1280_v61, %v1256_v62  ;;  %v1294_v58 = vmul.f32 %v1293_v15, %v3858_v57 }
 0x19e   :  { %v1342_v28 = vadd.f32 0.112945676, %v1341_v19  ;;  %v1306_v23 = vadd.f32 1.0, %v1305_v16  ;;  %v1331_v20 = vadd.f32 0.05243302, %v1330_v42 }
 0x19f   :  { %v2732_v54 = vclamps-f32 %v1281_v60, 1.0  ;;  %v1295_v57 = vadd.f32 1.1283791, %v1294_v58 }
 0x1a0   :  { %v1067_v52 = vpop.f32.mrf.mxu2  ;;  %v1343_v39 = vmul.f32 %v1342_v28, %v3886_v14  ;;  %2872 = vrcp.f32 %v1306_v23  ;;  %v1332_v35 = vmul.f32 %v1331_v20, %v3886_v14  ;;  %v1318_v43 = vand.u32 2147483648, %v1306_v23 }
 0x1a1   :  { %v3918_v53 = vadd.f32 %v3727_v21, %v1067_v52  ;;  %v1767_v24 = vadd.f32 1.0, %v2732_v54  ;;  %v1316_v29 = vand.u32 2147483647, %v1306_v23  ;;  %vm1312_vm4 = vweird.f32 %v1306_v23 }
 0x1a2   :  { %v1344_v31 = vadd.f32 0.4994258, %v1343_v39  ;;  %v1333_v33 = vadd.f32 0.18741608, %v1332_v35  ;;  %v1319_v3 = vor.u32 1.1754944e-38, %v1318_v43  ;;  %v1296_v16 = vmul.f32 %v1295_v57, %v3845_v18 }
 0x1a3   :  { %v3922_v46 = vmul.f32 0.70710677, %v3918_v53  ;;  %v1783_v55 = vmul.f32 %v1767_v24, %v1095_v2  ;;  %vm1317_vm6 = vcmp.eq.f32.partialorder %v1316_v29, 8.507059e+37 }
 0x1a4   :  { %v1345_v41 = vmul.f32 %v1344_v31, %v3886_v14  ;;  %v1334_v4 = vmul.f32 %v1333_v33, %v3886_v14 }
 0x1a5   :  { %v1364_v9 = vmul.f32 %v3922_v46, %v3922_v46  ;;  %v1797_v47 = vpack.c.bf16 %v1783_v55, %v1782_v63 }
 0x1a6   :  { %v2873_v59 = vpop.eup %2872  ;;  %v3932_v11 = vadd.f32 1.0, %v1345_v41  ;;  %v1335_v28 = vadd.f32 1.1283791, %v1334_v4 }
 0x1a7   :  { %v3930_v50 = vmin.f32 %v1364_v9, 16.0  ;;  %v1308_v30 = vmul.f32 %v2873_v59, %v1306_v23  ;;  %1884 = vmatmul.bf16.gmra.mxu3 %v1797_v47  ;;  %vm1313_vm3 = vweird.f32 %v2873_v59 }
 0x1a8   :  { %v1069_v12 = vpop.f32.mrf.mxu2  ;;  %2874 = vrcp.f32 %v3932_v11  ;;  %vm1314_vm5 = vmor %vm1312_vm4, %vm1313_vm3  ;;  %v1356_v60 = vand.u32 2147483647, %v3932_v11  ;;  %v1358_v13 = vand.u32 2147483648, %v3932_v11  ;;  %v1336_v31 = vmul.f32 %v1335_v28, %v3872_v51 }
 0x1a9   :  { %v3935_v7 = vadd.f32 %v3727_v21, %v1069_v12  ;;  %v1366_v34 = vmul.f32 2.1237322e-06, %v3930_v50  ;;  %v1309_v17 = vsub.f32 1.0, %v1308_v30  ;;  %v1377_v1 = vmul.f32 3.8918573e-05, %v3930_v50 }
 0x1aa   :  { %vm1352_vm8 = vweird.f32 %v3932_v11  ;;  %vm1357_vm10 = vcmp.eq.f32.partialorder %v1356_v60, 8.507059e+37  ;;  %v1359_v51 = vor.u32 1.1754944e-38, %v1358_v13 }
 0x1ab   :  { %v3941_v45 = vmul.f32 0.70710677, %v3935_v7  ;;  %v1310_v38 = vmul.f32 %v2873_v59, %v1309_v17  ;;  %v1378_v48 = vadd.f32 0.001143296, %v1377_v1  ;;  %v1367_v44 = vadd.f32 0.00028619796, %v1366_v34 }
 0x1ad   :  { %v1404_v26 = vmul.f32 %v3941_v45, %v3941_v45  ;;  %v1311_v27 = vadd.f32 %v2873_v59, %v1310_v38  ;;  %v1379_v0 = vmul.f32 %v1378_v48, %v3930_v50  ;;  %v1368_v62 = vmul.f32 %v1367_v44, %v3930_v50 }
 0x1ae   :  { %v2875_v49 = vpop.eup %2874  ;;  %v1096_v44 = vmul.f32 0.5, %v3839_v8 }
 0x1af   :  { %v3947_v40 = vmin.f32 %v1404_v26, 16.0  ;;  %v1315_v56 = vsel %vm1314_vm5, %v2873_v59, %v1311_v27  ;;  %v1348_v14 = vmul.f32 %v2875_v49, %v3932_v11  ;;  %v1380_v42 = vadd.f32 0.014752088, %v1379_v0 }
 0x1b0   :  { %v1072_v37 = vpop.f32.mrf.mxu2  ;;  %v1320_v36 = vsel %vm1317_vm6, %v1319_v3, %v1315_v56  ;;  %vm1353_vm7 = vweird.f32 %v2875_v49  ;;  %v1369_v22 = vadd.f32 0.0036580483, %v1368_v62  ;;  %v1097_v27 = vmul.f32 0.5, %v3866_v6 }
 0x1b1   :  { %v1406_v19 = vmul.f32 2.1237322e-06, %v3947_v40  ;;  %v3952_v25 = vadd.f32 %v3727_v21, %v1072_v37  ;;  %v1349_v52 = vsub.f32 1.0, %v1348_v14  ;;  %v1381_v61 = vmul.f32 %v1380_v42, %v3930_v50  ;;  %vm1354_vm9 = vmor %vm1352_vm8, %vm1353_vm7 }
 0x1b2   :  { %v1417_v23 = vmul.f32 3.8918573e-05, %v3947_v40  ;;  %v1321_v39 = vmul.f32 %v1320_v36, %v1296_v16  ;;  %v1370_v30 = vmul.f32 %v1369_v22, %v3930_v50 }
 0x1b3   :  { %v1407_v32 = vadd.f32 0.00028619796, %v1406_v19  ;;  %v3958_v5 = vmul.f32 0.70710677, %v3952_v25  ;;  %v1350_v20 = vmul.f32 %v2875_v49, %v1349_v52  ;;  %v1382_v54 = vadd.f32 0.112945676, %v1381_v61 }
 0x1b4   :  { %v1418_v10 = vadd.f32 0.001143296, %v1417_v23  ;;  %v2733_v55 = vclamps-f32 %v1321_v39, 1.0 }
 0x1b5   :  { %v1444_v18 = vmul.f32 %v3958_v5, %v3958_v5  ;;  %v1408_v2 = vmul.f32 %v1407_v32, %v3947_v40  ;;  %v1351_v15 = vadd.f32 %v2875_v49, %v1350_v20  ;;  %v1383_v35 = vmul.f32 %v1382_v54, %v3930_v50 }
 0x1b6   :  { %v1419_v41 = vmul.f32 %v1418_v10, %v3947_v40  ;;  %v1768_v48 = vadd.f32 1.0, %v2733_v55 }
 0x1b7   :  { %v3969_v9 = vmin.f32 %v1444_v18, 16.0  ;;  %v1355_v12 = vsel %vm1354_vm9, %v2875_v49, %v1351_v15  ;;  %v1384_v11 = vadd.f32 0.4994258, %v1383_v35  ;;  %v1409_v58 = vadd.f32 0.0036580483, %v1408_v2 }
 0x1b8   :  { %v1074_v24 = vpop.f32.mrf.mxu2  ;;  %v1420_v47 = vadd.f32 0.014752088, %v1419_v41  ;;  %v1360_v33 = vsel %vm1357_vm10, %v1359_v51, %v1355_v12  ;;  %v1371_v49 = vadd.f32 0.05243302, %v1370_v30  ;;  %v1784_v16 = vmul.f32 %v1768_v48, %v1096_v44 }
 0x1b9   :  { %v3974_v63 = vadd.f32 %v3727_v21, %v1074_v24  ;;  %v1446_v59 = vmul.f32 2.1237322e-06, %v3969_v9  ;;  %v1361_v43 = vmul.f32 %v1360_v33, %v1336_v31  ;;  %v1385_v1 = vmul.f32 %v1384_v11, %v3930_v50 }
 0x1ba   :  { %v1421_v26 = vmul.f32 %v1420_v47, %v3947_v40  ;;  %v1457_v38 = vmul.f32 3.8918573e-05, %v3969_v9  ;;  %v1410_v37 = vmul.f32 %v1409_v58, %v3947_v40  ;;  %v1372_v28 = vmul.f32 %v1371_v49, %v3930_v50 }
 0x1bb   :  { %v1447_v34 = vadd.f32 0.00028619796, %v1446_v59  ;;  %v3980_v17 = vmul.f32 0.70710677, %v3974_v63  ;;  %v2734_v57 = vclamps-f32 %v1361_v43, 1.0  ;;  %v3987_v4 = vadd.f32 1.0, %v1385_v1 }
 0x1bc   :  { %v1422_v14 = vadd.f32 0.112945676, %v1421_v26  ;;  %v1458_v42 = vadd.f32 0.001143296, %v1457_v38  ;;  %v1411_v32 = vadd.f32 0.05243302, %v1410_v37 }
 0x1bd   :  { %v1484_v29 = vmul.f32 %v3980_v17, %v3980_v17  ;;  %v1448_v3 = vmul.f32 %v1447_v34, %v3969_v9  ;;  %v1769_v56 = vadd.f32 1.0, %v2734_v57  ;;  %2876 = vrcp.f32 %v3987_v4 }
 0x1be   :  { %v1423_v39 = vmul.f32 %v1422_v14, %v3947_v40  ;;  %v1459_v60 = vmul.f32 %v1458_v42, %v3969_v9  ;;  %v1373_v20 = vadd.f32 0.18741608, %v1372_v28  ;;  %v1412_v22 = vmul.f32 %v1411_v32, %v3947_v40 }
 0x1bf   :  { %v3993_v0 = vmin.f32 %v1484_v29, 16.0  ;;  %v1785_v6 = vmul.f32 %v1769_v56, %v1097_v27  ;;  %v1449_v52 = vadd.f32 0.0036580483, %v1448_v3  ;;  %v1398_v44 = vand.u32 2147483648, %v3987_v4 }
 0x1c0   :  { %v1077_v19 = vpop.f32.mrf.mxu2  ;;  %v1424_v31 = vadd.f32 0.4994258, %v1423_v39  ;;  %v1460_v15 = vadd.f32 0.014752088, %v1459_v60  ;;  %v1374_v11 = vmul.f32 %v1373_v20, %v3930_v50  ;;  %v1413_v33 = vadd.f32 0.18741608, %v1412_v22 }
 0x1c1   :  { %v3997_v36 = vadd.f32 %v3727_v21, %v1077_v19  ;;  %v1486_v8 = vmul.f32 2.1237322e-06, %v3993_v0  ;;  %v1798_v61 = vpack.c.bf16 %v1785_v6, %v1784_v16  ;;  %v1450_v2 = vmul.f32 %v1449_v52, %v3969_v9 }
 0x1c2   :  { %v1425_v55 = vmul.f32 %v1424_v31, %v3947_v40  ;;  %v1497_v51 = vmul.f32 3.8918573e-05, %v3993_v0  ;;  %v1461_v12 = vmul.f32 %v1460_v15, %v3969_v9  ;;  %v1375_v50 = vadd.f32 1.1283791, %v1374_v11 }
 0x1c3   :  { %v4002_v62 = vmul.f32 0.70710677, %v3997_v36  ;;  %v2877_v13 = vpop.eup %2876  ;;  %v1487_v18 = vadd.f32 0.00028619796, %v1486_v8  ;;  %1889 = vmatmul.bf16.gmra.mxu3 %v1798_v61  ;;  %v1451_v43 = vadd.f32 0.05243302, %v1450_v2  ;;  %v1414_v27 = vmul.f32 %v1413_v33, %v3947_v40 }
 0x1c4   :  { %v1388_v10 = vmul.f32 %v2877_v13, %v3987_v4  ;;  %v4025_v34 = vadd.f32 1.0, %v1425_v55  ;;  %vm1393_vm11 = vweird.f32 %v2877_v13  ;;  %v1462_v1 = vadd.f32 0.112945676, %v1461_v12 }
 0x1c5   :  { %v1524_v23 = vmul.f32 %v4002_v62, %v4002_v62  ;;  %v1488_v59 = vmul.f32 %v1487_v18, %v3993_v0  ;;  %v1498_v26 = vadd.f32 0.001143296, %v1497_v51  ;;  %vm1392_vm12 = vweird.f32 %v3987_v4 }
 0x1c6   :  { %v1389_v41 = vsub.f32 1.0, %v1388_v10  ;;  %2878 = vrcp.f32 %v4025_v34  ;;  %v1396_v37 = vand.u32 2147483647, %v3987_v4  ;;  %v1463_v3 = vmul.f32 %v1462_v1, %v3969_v9  ;;  %vm4040_vm13 = vmor %vm1392_vm12, %vm1393_vm11 }
 0x1c7   :  { %v4008_v54 = vmin.f32 %v1524_v23, 16.0  ;;  %v1489_v38 = vadd.f32 0.0036580483, %v1488_v59  ;;  %v1452_v19 = vmul.f32 %v1451_v43, %v3969_v9  ;;  %v1499_v42 = vmul.f32 %v1498_v26, %v3993_v0 }
 0x1c8   :  { %v1079_v24 = vpop.f32.mrf.mxu2  ;;  %v1390_v58 = vmul.f32 %v2877_v13, %v1389_v41  ;;  %v1464_v16 = vadd.f32 0.4994258, %v1463_v3  ;;  %v1376_v6 = vmul.f32 %v1375_v50, %v3922_v46  ;;  %v1399_v32 = vor.u32 1.1754944e-38, %v1398_v44 }
 0x1c9   :  { %v4014_v35 = vadd.f32 %v3727_v21, %v1079_v24  ;;  %v1526_v47 = vmul.f32 2.1237322e-06, %v4008_v54  ;;  %v1490_v40 = vmul.f32 %v1489_v38, %v3993_v0  ;;  %v1415_v61 = vadd.f32 1.1283791, %v1414_v27 }
 0x1ca   :  { %v1391_v57 = vadd.f32 %v2877_v13, %v1390_v58  ;;  %vm1397_vm14 = vcmp.eq.f32.partialorder %v1396_v37, 8.507059e+37  ;;  %v1465_v39 = vmul.f32 %v1464_v16, %v3969_v9  ;;  %v1453_v60 = vadd.f32 0.18741608, %v1452_v19 }
 0x1cb   :  { %v4023_v30 = vmul.f32 0.70710677, %v4014_v35  ;;  %v1527_v48 = vadd.f32 0.00028619796, %v1526_v47  ;;  %v1500_v10 = vadd.f32 0.014752088, %v1499_v42  ;;  %v1416_v33 = vmul.f32 %v1415_v61, %v3941_v45 }
 0x1cc   :  { %v1395_v4 = vsel %vm4040_vm13, %v2877_v13, %v1391_v57  ;;  %v2879_v52 = vpop.eup %2878  ;;  %v1491_v13 = vadd.f32 0.05243302, %v1490_v40  ;;  %v4060_v22 = vadd.f32 1.0, %v1465_v39  ;;  %v1098_v2 = vmul.f32 0.5, %v3918_v53 }
 0x1cd   :  { %v1564_v29 = vmul.f32 %v4023_v30, %v4023_v30  ;;  %v1528_v28 = vmul.f32 %v1527_v48, %v4008_v54  ;;  %v1400_v18 = vsel %vm1397_vm14, %v1399_v32, %v1395_v4  ;;  %v1428_v20 = vmul.f32 %v2879_v52, %v4025_v34 }
 0x1ce   :  { %v1436_v41 = vand.u32 2147483647, %v4025_v34  ;;  %v1401_v59 = vmul.f32 %v1400_v18, %v1376_v6  ;;  %v1438_v12 = vand.u32 2147483648, %v4025_v34  ;;  %2880 = vrcp.f32 %v4060_v22 }
 0x1cf   :  { %v4046_v8 = vmin.f32 %v1564_v29, 16.0  ;;  %v1529_v24 = vadd.f32 0.0036580483, %v1528_v28  ;;  %v1429_v15 = vsub.f32 1.0, %v1428_v20  ;;  %vm1433_vm15 = vweird.f32 %v2879_v52 }
 0x1d0   :  { %v1082_v49 = vpop.f32.mrf.mxu2  ;;  %v1501_v58 = vmul.f32 %v1500_v10, %v3993_v0  ;;  %v1099_v53 = vmul.f32 0.5, %v3935_v7  ;;  %v1454_v26 = vmul.f32 %v1453_v60, %v3969_v9  ;;  %v1492_v38 = vmul.f32 %v1491_v13, %v3993_v0 }
 0x1d1   :  { %v4037_v56 = vadd.f32 %v3727_v21, %v1082_v49  ;;  %v1566_v31 = vmul.f32 2.1237322e-06, %v4046_v8  ;;  %v1430_v47 = vmul.f32 %v2879_v52, %v1429_v15  ;;  %vm1432_vm0 = vweird.f32 %v4025_v34 }
 0x1d2   :  { %v1530_v57 = vmul.f32 %v1529_v24, %v4008_v54  ;;  %vm1434_vm1 = vmor %vm1432_vm0, %vm1433_vm15  ;;  %v1439_v7 = vor.u32 1.1754944e-38, %v1438_v12  ;;  %v2735_v44 = vclamps-f32 %v1401_v59, 1.0  ;;  %vm1437_vm2 = vcmp.eq.f32.partialorder %v1436_v41, 8.507059e+37 }
 0x1d3   :  { %v4053_v23 = vmul.f32 0.70710677, %v4037_v56  ;;  %v1567_v43 = vadd.f32 0.00028619796, %v1566_v31  ;;  %v1431_v29 = vadd.f32 %v2879_v52, %v1430_v47  ;;  %v1502_v27 = vadd.f32 0.112945676, %v1501_v58 }
 0x1d4   :  { %v4082_v49 = vpop.eup %2880  ;;  %v1537_v3 = vmul.f32 3.8918573e-05, %v4008_v54  ;;  %v1493_v19 = vadd.f32 0.18741608, %v1492_v38  ;;  %v1531_v4 = vadd.f32 0.05243302, %v1530_v57  ;;  %vm1472_vm4 = vweird.f32 %v4060_v22 }
 0x1d5   :  { %v1604_v46 = vmul.f32 %v4053_v23, %v4053_v23  ;;  %v1435_v45 = vsel %vm1434_vm1, %v2879_v52, %v1431_v29  ;;  %v1568_v9 = vmul.f32 %v1567_v43, %v4046_v8  ;;  %v1468_v40 = vmul.f32 %v4082_v49, %v4060_v22 }
 0x1d6   :  { %v1440_v34 = vsel %vm1437_vm2, %v1439_v7, %v1435_v45  ;;  %v1503_v28 = vmul.f32 %v1502_v27, %v3993_v0  ;;  %v1538_v32 = vadd.f32 0.001143296, %v1537_v3  ;;  %v1770_v39 = vadd.f32 1.0, %v2735_v44 }
 0x1d7   :  { %v4064_v55 = vmin.f32 %v1604_v46, 16.0  ;;  %v1441_v42 = vmul.f32 %v1440_v34, %v1416_v33  ;;  %v1469_v60 = vsub.f32 1.0, %v1468_v40  ;;  %v1569_v18 = vadd.f32 0.0036580483, %v1568_v9 }
 0x1d8   :  { %v1084_v51 = vpop.f32.mrf.mxu2  ;;  %v1504_v10 = vadd.f32 0.4994258, %v1503_v28  ;;  %v1539_v13 = vmul.f32 %v1538_v32, %v4008_v54  ;;  %v1494_v31 = vmul.f32 %v1493_v19, %v3993_v0  ;;  %v1532_v59 = vmul.f32 %v1531_v4, %v4008_v54 }
 0x1d9   :  { %v4069_v11 = vadd.f32 %v3727_v21, %v1084_v51  ;;  %v1606_v1 = vmul.f32 2.1237322e-06, %v4064_v55  ;;  %v2736_v61 = vclamps-f32 %v1441_v42, 1.0  ;;  %v1786_v12 = vmul.f32 %v1770_v39, %v1098_v2 }
 0x1da   :  { %v1505_v51 = vmul.f32 %v1504_v10, %v3993_v0  ;;  %v1540_v58 = vadd.f32 0.014752088, %v1539_v13  ;;  %v1455_v33 = vadd.f32 1.1283791, %v1454_v26  ;;  %v1570_v43 = vmul.f32 %v1569_v18, %v4046_v8 }
 0x1db   :  { %v1607_v50 = vadd.f32 0.00028619796, %v1606_v1  ;;  %v4080_v48 = vmul.f32 0.70710677, %v4069_v11  ;;  %v1771_v15 = vadd.f32 1.0, %v2736_v61  ;;  %vm1473_vm3 = vweird.f32 %v4082_v49 }
 0x1dc   :  { %v4107_v1 = vadd.f32 1.0, %v1505_v51  ;;  %v1495_v38 = vadd.f32 1.1283791, %v1494_v31  ;;  %v1533_v2 = vadd.f32 0.18741608, %v1532_v59  ;;  %v1478_v45 = vand.u32 2147483648, %v4060_v22  ;;  %vm4133_vm5 = vmor %vm1472_vm4, %vm1473_vm3 }
 0x1dd   :  { %v1644_v37 = vmul.f32 %v4080_v48, %v4080_v48  ;;  %v1608_v14 = vmul.f32 %v1607_v50, %v4064_v55  ;;  %v1787_v47 = vmul.f32 %v1771_v15, %v1099_v53  ;;  %v2928_v53 = vld [vmem:[%s4957_s6 + $0x1] ss:$0 sm:$0xff]  ;;  %v1541_v27 = vmul.f32 %v1540_v58, %v4008_v54 }
 0x1de   :  { %2882 = vrcp.f32 %v4107_v1  ;;  %v1571_v9 = vadd.f32 0.05243302, %v1570_v43  ;;  %v1577_v34 = vmul.f32 3.8918573e-05, %v4046_v8  ;;  %v4138_v40 = vmul.f32 0.5, %v3952_v25 }
 0x1df   :  { %v4091_v16 = vmin.f32 %v1644_v37, 16.0  ;;  %v1609_v46 = vadd.f32 0.0036580483, %v1608_v14  ;;  %v1799_v50 = vpack.c.bf16 %v1787_v47, %v1786_v12  ;;  %v1476_v37 = vand.u32 2147483647, %v4060_v22 }
 0x1e0   :  { %v1087_v6 = vpop.f32.mrf.mxu2  ;;  %v1456_v4 = vmul.f32 %v1455_v33, %v3958_v5  ;;  %v1496_v28 = vmul.f32 %v1495_v38, %v3980_v17  ;;  %v1479_v61 = vor.u32 1.1754944e-38, %v1478_v45  ;;  %v1542_v39 = vadd.f32 0.112945676, %v1541_v27 }
 0x1e1   :  { %v4095_v52 = vadd.f32 %v3727_v21, %v1087_v6  ;;  %v1646_v20 = vmul.f32 2.1237322e-06, %v4091_v16  ;;  %v1470_v21 = vmul.f32 %v4082_v49, %v1469_v60  ;;  %v1610_v29 = vmul.f32 %v1609_v46, %v4064_v55  ;;  %1894 = vmatmul.bf16.gmra.mxu3 %v1799_v50 }
 0x1e2   :  { %v1534_v18 = vmul.f32 %v1533_v2, %v4008_v54  ;;  %v1572_v25 = vmul.f32 %v1571_v9, %v4046_v8  ;;  %vm1477_vm6 = vcmp.eq.f32.partialorder %v1476_v37, 8.507059e+37  ;;  %vm1512_vm7 = vweird.f32 %v4107_v1 }
 0x1e3   :  { %v4101_v24 = vmul.f32 0.70710677, %v4095_v52  ;;  %v1647_v41 = vadd.f32 0.00028619796, %v1646_v20  ;;  %v1471_v44 = vadd.f32 %v4082_v49, %v1470_v21  ;;  %v1611_v3 = vadd.f32 0.05243302, %v1610_v29 }
 0x1e4   :  { %v2883_v60 = vpop.eup %2882  ;;  %v1578_v20 = vadd.f32 0.001143296, %v1577_v34  ;;  %v1543_v31 = vmul.f32 %v1542_v39, %v4008_v54  ;;  %v1518_v21 = vand.u32 2147483648, %v4107_v1  ;;  %v1617_v51 = vmul.f32 3.8918573e-05, %v4064_v55 }
 0x1e5   :  { %v1684_v57 = vmul.f32 %v4101_v24, %v4101_v24  ;;  %v1648_v7 = vmul.f32 %v1647_v41, %v4091_v16  ;;  %v1475_v6 = vsel %vm4133_vm5, %v4082_v49, %v1471_v44  ;;  %v1612_v5 = vmul.f32 %v1611_v3, %v4064_v55 }
 0x1e6   :  { %v1480_v13 = vsel %vm1477_vm6, %v1479_v61, %v1475_v6  ;;  %v1508_v49 = vmul.f32 %v2883_v60, %v4107_v1  ;;  %v1579_v46 = vmul.f32 %v1578_v20, %v4046_v8  ;;  %v1544_v12 = vadd.f32 0.4994258, %v1543_v31 }
 0x1e7   :  { %v4126_v19 = vmin.f32 %v1684_v57, 16.0  ;;  %v1649_v22 = vadd.f32 0.0036580483, %v1648_v7  ;;  %v1481_v59 = vmul.f32 %v1480_v13, %v1456_v4  ;;  %v1657_v58 = vmul.f32 3.8918573e-05, %v4091_v16 }
 0x1e8   :  { %v1089_v0 = vpop.f32.mrf.mxu2  ;;  %v1509_v41 = vsub.f32 1.0, %v1508_v49  ;;  %v1580_v47 = vadd.f32 0.014752088, %v1579_v46  ;;  %vm1513_vm8 = vweird.f32 %v2883_v60  ;;  %v1516_v43 = vand.u32 2147483647, %v4107_v1 }
 0x1e9   :  { %v4119_v26 = vadd.f32 %v2928_v53, %v1089_v0  ;;  %v1686_v10 = vmul.f32 2.1237322e-06, %v4126_v19  ;;  %v1650_v17 = vmul.f32 %v1649_v22, %v4091_v16  ;;  %v1618_v38 = vadd.f32 0.001143296, %v1617_v51  ;;  %vm1514_vm9 = vmor %vm1512_vm7, %vm1513_vm8 }
 0x1ea   :  { %v1510_v33 = vmul.f32 %v2883_v60, %v1509_v41  ;;  %v1545_v57 = vmul.f32 %v1544_v12, %v4008_v54  ;;  %v1581_v50 = vmul.f32 %v1580_v47, %v4046_v8  ;;  %v1658_v7 = vadd.f32 0.001143296, %v1657_v58 }
 0x1eb   :  { %v4129_v14 = vmul.f32 0.70710677, %v4119_v26  ;;  %v1687_v29 = vadd.f32 0.00028619796, %v1686_v10  ;;  %v1651_v0 = vadd.f32 0.05243302, %v1650_v17  ;;  %v1619_v53 = vmul.f32 %v1618_v38, %v4064_v55 }
 0x1ec   :  { %v1511_v2 = vadd.f32 %v2883_v60, %v1510_v33  ;;  %v1519_v45 = vor.u32 1.1754944e-38, %v1518_v21  ;;  %v4168_v27 = vadd.f32 1.0, %v1545_v57  ;;  %v1582_v9 = vadd.f32 0.112945676, %v1581_v50 }
 0x1ed   :  { %v1724_v32 = vmul.f32 %v4129_v14, %v4129_v14  ;;  %v1659_v37 = vmul.f32 %v1658_v7, %v4091_v16  ;;  %v2737_v34 = vclamps-f32 %v1481_v59, 1.0  ;;  %vm1517_vm10 = vcmp.eq.f32.partialorder %v1516_v43, 8.507059e+37 }
 0x1ee   :  { %v1515_v54 = vsel %vm1514_vm9, %v2883_v60, %v1511_v2  ;;  %v1620_v3 = vadd.f32 0.014752088, %v1619_v53  ;;  %v1101_v42 = vmul.f32 0.5, %v3974_v63  ;;  %v4173_v4 = vmul.f32 0.5, %v3997_v36 }
 0x1ef   :  { %v4156_v15 = vmin.f32 %v1724_v32, 16.0  ;;  %v1520_v22 = vsel %vm1517_vm10, %v1519_v45, %v1515_v54  ;;  %2884 = vrcp.f32 %v4168_v27  ;;  %v4176_v1 = vadd.f32 1.1283791, %v1534_v18 }
 0x1f0   :  { %v1688_v6 = vmul.f32 %v1687_v29, %v4126_v19  ;;  %v1521_v61 = vmul.f32 %v1520_v22, %v1496_v28  ;;  %v1573_v39 = vadd.f32 0.18741608, %v1572_v25  ;;  %v1583_v20 = vmul.f32 %v1582_v9, %v4046_v8 }
 0x1f1   :  { %v1726_v44 = vmul.f32 2.1237322e-06, %v4156_v15  ;;  %v1621_v60 = vmul.f32 %v1620_v3, %v4064_v55  ;;  %v1660_v10 = vadd.f32 0.014752088, %v1659_v37  ;;  %v1613_v13 = vadd.f32 0.18741608, %v1612_v5 }
 0x1f2   :  { %v1652_v63 = vmul.f32 %v1651_v0, %v4091_v16  ;;  %v2738_v36 = vclamps-f32 %v1521_v61, 1.0  ;;  %v1772_v49 = vadd.f32 1.0, %v2737_v34  ;;  %v1584_v17 = vadd.f32 0.4994258, %v1583_v20 }
 0x1f3   :  { %v1727_v32 = vadd.f32 0.00028619796, %v1726_v44  ;;  %v1622_v31 = vadd.f32 0.112945676, %v1621_v60  ;;  %v1661_v18 = vmul.f32 %v1660_v10, %v4091_v16  ;;  %v1697_v46 = vmul.f32 3.8918573e-05, %v4126_v19 }
 0x1f4   :  { %v1689_v41 = vadd.f32 0.0036580483, %v1688_v6  ;;  %v1773_v25 = vadd.f32 1.0, %v2738_v36  ;;  %v1737_v21 = vmul.f32 3.8918573e-05, %v4156_v15  ;;  %v1585_v59 = vmul.f32 %v1584_v17, %v4046_v8 }
 0x1f5   :  { %v1728_v28 = vmul.f32 %v1727_v32, %v4156_v15  ;;  %v2885_v51 = vpop.eup %2884  ;;  %v1623_v5 = vmul.f32 %v1622_v31, %v4064_v55  ;;  %v1662_v12 = vadd.f32 0.112945676, %v1661_v18  ;;  %v1698_v47 = vadd.f32 0.001143296, %v1697_v46 }
 0x1f6   :  { %v1574_v58 = vmul.f32 %v1573_v39, %v4046_v8  ;;  %v1788_v33 = vmul.f32 %v1772_v49, %v4138_v40  ;;  %v1789_v43 = vmul.f32 %v1773_v25, %v1101_v42  ;;  %v1548_v38 = vmul.f32 %v2885_v51, %v4168_v27 }
 0x1f7   :  { %v4191_v29 = vadd.f32 1.0, %v1585_v59  ;;  %v1624_v57 = vadd.f32 0.4994258, %v1623_v5  ;;  %v1663_v50 = vmul.f32 %v1662_v12, %v4091_v16  ;;  %v1699_v7 = vmul.f32 %v1698_v47, %v4126_v19 }
 0x1f8   :  { %v1614_v0 = vmul.f32 %v1613_v13, %v4064_v55  ;;  %v1800_v44 = vpack.c.bf16 %v1789_v43, %v1788_v33  ;;  %v1549_v2 = vsub.f32 1.0, %v1548_v38  ;;  %v1738_v53 = vadd.f32 0.001143296, %v1737_v21 }
 0x1f9   :  { %v1653_v45 = vadd.f32 0.18741608, %v1652_v63  ;;  %v1690_v8 = vmul.f32 %v1689_v41, %v4126_v19  ;;  %v1729_v9 = vadd.f32 0.0036580483, %v1728_v28  ;;  %2886 = vrcp.f32 %v4191_v29 }
 0x1fa   :  { %1899 = vmatmul.bf16.gmra.mxu3 %v1800_v44  ;;  %v1550_v40 = vmul.f32 %v2885_v51, %v1549_v2  ;;  %vm1553_vm11 = vweird.f32 %v2885_v51  ;;  %v1625_v37 = vmul.f32 %v1624_v57, %v4064_v55  ;;  %v1664_v34 = vadd.f32 0.4994258, %v1663_v50 }
 0x1fb   :  { %vm1552_vm12 = vweird.f32 %v4168_v27  ;;  %v1558_v54 = vand.u32 2147483648, %v4168_v27  ;;  %v1700_v3 = vadd.f32 0.014752088, %v1699_v7  ;;  %v1739_v42 = vmul.f32 %v1738_v53, %v4156_v15 }
 0x1fc   :  { %v1551_v22 = vadd.f32 %v2885_v51, %v1550_v40  ;;  %v1556_v6 = vand.u32 2147483647, %v4168_v27  ;;  %v4203_v32 = vadd.f32 1.0, %v1625_v37  ;;  %v1665_v61 = vmul.f32 %v1664_v34, %v4091_v16  ;;  %vm4207_vm13 = vmor %vm1552_vm12, %vm1553_vm11 }
 0x1fd   :  { %v1575_v39 = vadd.f32 1.1283791, %v1574_v58  ;;  %v1615_v20 = vadd.f32 1.1283791, %v1614_v0  ;;  %v1730_v60 = vmul.f32 %v1729_v9, %v4156_v15  ;;  %v1701_v10 = vmul.f32 %v1700_v3, %v4126_v19 }
 0x1fe   :  { %v1654_v13 = vmul.f32 %v1653_v45, %v4091_v16  ;;  %v1691_v63 = vadd.f32 0.05243302, %v1690_v8  ;;  %v1555_v27 = vsel %vm4207_vm13, %v2885_v51, %v1551_v22  ;;  %2888 = vrcp.f32 %v4203_v32 }
 0x1ff   :  { %v2887_v36 = vpop.eup %2886  ;;  %v1559_v49 = vor.u32 1.1754944e-38, %v1558_v54  ;;  %v4216_v17 = vadd.f32 1.0, %v1665_v61  ;;  %v1702_v31 = vadd.f32 0.112945676, %v1701_v10  ;;  %v1740_v18 = vadd.f32 0.014752088, %v1739_v42 }
 0x200   :  { %v1536_v46 = vmul.f32 %v4176_v1, %v4002_v62  ;;  %v4221_v41 = vmul.f32 0.5, %v4014_v35  ;;  %vm1557_vm14 = vcmp.eq.f32.partialorder %v1556_v6, 8.507059e+37  ;;  %v1588_v16 = vmul.f32 %v2887_v36, %v4191_v29 }
 0x201   :  { %v1576_v28 = vmul.f32 %v1575_v39, %v4023_v30  ;;  %v1731_v25 = vadd.f32 0.05243302, %v1730_v60  ;;  %v1560_v21 = vsel %vm1557_vm14, %v1559_v49, %v1555_v27  ;;  %2890 = vrcp.f32 %v4216_v17 }
 0x202   :  { %v1589_v51 = vsub.f32 1.0, %v1588_v16  ;;  %v1596_v59 = vand.u32 2147483647, %v4191_v29  ;;  %v1598_v5 = vand.u32 2147483648, %v4191_v29  ;;  %v1703_v12 = vmul.f32 %v1702_v31, %v4126_v19 }
 0x203   :  { %v4230_v62 = vmul.f32 %v1615_v20, %v4053_v23  ;;  %v1655_v35 = vadd.f32 1.1283791, %v1654_v13  ;;  %v4233_v1 = vmul.f32 %v1691_v63, %v4126_v19  ;;  %v1741_v30 = vmul.f32 %v1740_v18, %v4156_v15 }
 0x204   :  { %v2889_v47 = vpop.eup %2888  ;;  %v1561_v58 = vmul.f32 %v1560_v21, %v1536_v46  ;;  %v1590_v33 = vmul.f32 %v2887_v36, %v1589_v51  ;;  %vm1593_vm15 = vweird.f32 %v2887_v36  ;;  %v1704_v43 = vadd.f32 0.4994258, %v1703_v12 }
 0x205   :  { %v1732_v38 = vmul.f32 %v1731_v25, %v4156_v15  ;;  %vm1592_vm0 = vweird.f32 %v4191_v29  ;;  %v1628_v57 = vmul.f32 %v2889_v47, %v4203_v32  ;;  %v1742_v50 = vadd.f32 0.112945676, %v1741_v30 }
 0x206   :  { %v1591_v23 = vadd.f32 %v2887_v36, %v1590_v33  ;;  %vm1597_vm1 = vcmp.eq.f32.partialorder %v1596_v59, 8.507059e+37  ;;  %v1599_v7 = vor.u32 1.1754944e-38, %v1598_v5  ;;  %v1705_v0 = vmul.f32 %v1704_v43, %v4126_v19  ;;  %vm1594_vm2 = vmor %vm1592_vm0, %vm1593_vm15 }
 0x207   :  { %v2891_v44 = vpop.eup %2890  ;;  %v1629_v2 = vsub.f32 1.0, %v1628_v57  ;;  %vm1632_vm3 = vweird.f32 %v4203_v32  ;;  %v1638_v53 = vand.u32 2147483648, %v4203_v32  ;;  %v1743_v45 = vmul.f32 %v1742_v50, %v4156_v15 }
 0x208   :  { %v2739_v8 = vclamps-f32 %v1561_v58, 1.0  ;;  %v1595_v9 = vsel %vm1594_vm2, %v2887_v36, %v1591_v23  ;;  %v1668_v29 = vmul.f32 %v2891_v44, %v4216_v17  ;;  %v4244_v40 = vadd.f32 1.0, %v1705_v0 }
 0x209   :  { %v1600_v37 = vsel %vm1597_vm1, %v1599_v7, %v1595_v9  ;;  %v1630_v34 = vmul.f32 %v2889_v47, %v1629_v2  ;;  %vm1633_vm4 = vweird.f32 %v2889_v47  ;;  %v1744_v54 = vadd.f32 0.4994258, %v1743_v45 }
 0x20a   :  { %v1601_v3 = vmul.f32 %v1600_v37, %v1576_v28  ;;  %v1636_v42 = vand.u32 2147483647, %v4203_v32  ;;  %v1669_v22 = vsub.f32 1.0, %v1668_v29  ;;  %2892 = vrcp.f32 %v4244_v40  ;;  %vm1634_vm5 = vmor %vm1632_vm3, %vm1633_vm4 }
 0x20b   :  { %v1631_v6 = vadd.f32 %v2889_v47, %v1630_v34  ;;  %v1676_v61 = vand.u32 2147483647, %v4216_v17  ;;  %v1678_v39 = vand.u32 2147483648, %v4216_v17  ;;  %v1745_v20 = vmul.f32 %v1744_v54, %v4156_v15 }
 0x20c   :  { %v2740_v60 = vclamps-f32 %v1601_v3, 1.0  ;;  %v1774_v55 = vadd.f32 1.0, %v2739_v8  ;;  %v1670_v10 = vmul.f32 %v2891_v44, %v1669_v22  ;;  %vm1673_vm6 = vweird.f32 %v2891_v44 }
 0x20d   :  { %v1656_v13 = vmul.f32 %v1655_v35, %v4080_v48  ;;  %v1635_v63 = vsel %vm1634_vm5, %v2889_v47, %v1631_v6  ;;  %v1639_v27 = vor.u32 1.1754944e-38, %v1638_v53  ;;  %v1746_v36 = vadd.f32 1.0, %v1745_v20 }
 0x20e   :  { %v1775_v49 = vadd.f32 1.0, %v2740_v60  ;;  %vm1637_vm7 = vcmp.eq.f32.partialorder %v1636_v42, 8.507059e+37  ;;  %v1671_v31 = vadd.f32 %v2891_v44, %v1670_v10  ;;  %vm1672_vm8 = vweird.f32 %v4216_v17 }
 0x20f   :  { %v1733_v18 = vadd.f32 0.18741608, %v1732_v38  ;;  %v1640_v46 = vsel %vm1637_vm7, %v1639_v27, %v1635_v63  ;;  %vm1674_vm9 = vmor %vm1672_vm8, %vm1673_vm6  ;;  %v1679_v16 = vor.u32 1.1754944e-38, %v1678_v39  ;;  %2894 = vrcp.f32 %v1746_v36 }
 0x210   :  { %v2893_v28 = vpop.eup %2892  ;;  %v1790_v32 = vmul.f32 %v1774_v55, %v4173_v4  ;;  %v1791_v25 = vmul.f32 %v1775_v49, %v4221_v41  ;;  %v1675_v21 = vsel %vm1674_vm9, %v2891_v44, %v1671_v31  ;;  %vm1677_vm10 = vcmp.eq.f32.partialorder %v1676_v61, 8.507059e+37 }
 0x211   :  { %v1680_v48 = vsel %vm1677_vm10, %v1679_v16, %v1675_v21  ;;  %v1708_v51 = vmul.f32 %v2893_v28, %v4244_v40  ;;  %v1641_v5 = vmul.f32 %v1640_v46, %v4230_v62  ;;  %v1693_v17 = vadd.f32 0.18741608, %v4233_v1  ;;  %v4274_v46 = vld [vmem:[%s4957_s6 + $0x2] ss:$0 sm:$0xff] }
 0x212   :  { %v1801_v59 = vpack.c.bf16 %v1791_v25, %v1790_v32  ;;  %v1681_v12 = vmul.f32 %v1680_v48, %v1656_v13  ;;  %v1734_v35 = vmul.f32 %v1733_v18, %v4156_v15  ;;  %v1105_v43 = vmul.f32 0.5, %v4069_v11  ;;  %v1880_v13 = vpop.f32.mrf.mxu3 }
 0x213   :  { %v1709_v30 = vsub.f32 1.0, %v1708_v51  ;;  %v2741_v33 = vclamps-f32 %v1641_v5, 1.0  ;;  %v1694_v38 = vmul.f32 %v1693_v17, %v4126_v19  ;;  %vm1713_vm11 = vweird.f32 %v2893_v28 }
 0x214   :  { %1904 = vmatmul.bf16.gmra.mxu3 %v1801_v59  ;;  %v2742_v47 = vclamps-f32 %v1681_v12, 1.0  ;;  %v1735_v57 = vadd.f32 1.1283791, %v1734_v35  ;;  %vm1712_vm12 = vweird.f32 %v4244_v40  ;;  %v1716_v15 = vand.u32 2147483647, %v4244_v40 }
 0x215   :  { %v2895_v58 = vpop.eup %2894  ;;  %v1710_v4 = vmul.f32 %v2893_v28, %v1709_v30  ;;  %v1718_v1 = vand.u32 2147483648, %v4244_v40  ;;  %v1758_v7 = vand.u32 2147483648, %v1746_v36  ;;  %v1776_v0 = vadd.f32 1.0, %v2741_v33  ;;  %vm1714_vm14 = vmor %vm1712_vm12, %vm1713_vm11 }
 0x216   :  { %v1748_v41 = vmul.f32 %v2895_v58, %v1746_v36  ;;  %v1777_v50 = vadd.f32 1.0, %v2742_v47  ;;  %vm1753_vm13 = vweird.f32 %v2895_v58  ;;  %v1756_v2 = vand.u32 2147483647, %v1746_v36 }
 0x217   :  { %v1711_v23 = vadd.f32 %v2893_v28, %v1710_v4  ;;  %v1104_v11 = vmul.f32 0.5, %v4037_v56  ;;  %v1695_v53 = vadd.f32 1.1283791, %v1694_v38  ;;  %vm1752_vm15 = vweird.f32 %v1746_v36 }
 0x218   :  { %v1749_v62 = vsub.f32 1.0, %v1748_v41  ;;  %v1793_v19 = vmul.f32 %v1777_v50, %v1105_v43  ;;  %v1736_v9 = vmul.f32 %v1735_v57, %v4129_v14  ;;  %v1719_v29 = vor.u32 1.1754944e-38, %v1718_v1  ;;  %vm1754_vm0 = vmor %vm1752_vm15, %vm1753_vm13 }
 0x219   :  { %v1715_v45 = vsel %vm1714_vm14, %v2893_v28, %v1711_v23  ;;  %v1759_v37 = vor.u32 1.1754944e-38, %v1758_v7  ;;  %v1792_v34 = vmul.f32 %v1776_v0, %v1104_v11  ;;  %vm1717_vm1 = vcmp.eq.f32.partialorder %v1716_v15, 8.507059e+37 }
 0x21a   :  { %v1750_v44 = vmul.f32 %v2895_v58, %v1749_v62  ;;  %vm1757_vm2 = vcmp.eq.f32.partialorder %v1756_v2, 8.507059e+37  ;;  %v1720_v54 = vsel %vm1717_vm1, %v1719_v29, %v1715_v45  ;;  %v1696_v42 = vmul.f32 %v1695_v53, %v4101_v24  ;;  %v1882_v36 = vpop.f32.mrf.mxu3 }
 0x21b   :  { %v1802_v56 = vpack.c.bf16 %v1793_v19, %v1792_v34  ;;  %v1107_v14 = vmul.f32 0.5, %v4119_v26  ;;  %v1106_v55 = vmul.f32 0.5, %v4095_v52  ;;  %v4305_v17 = vadd.f32 %v4274_v46, %v1880_v13 }
 0x21c   :  { %v1751_v8 = vadd.f32 %v2895_v58, %v1750_v44  ;;  %v1721_v6 = vmul.f32 %v1720_v54, %v1696_v42  ;;  %v4327_v38 = vadd.f32 %v4274_v46, %v1882_v36 }
 0x21d   :  { %5004 = vst [vmem:[#allocation6_spill] sm:$0xff] %v4305_v17  ;;  %v4322_v41 = vmul.f32 0.70710677, %v4305_v17 }
 0x21e   :  { %v1755_v40 = vsel %vm1754_vm0, %v2895_v58, %v1751_v8  ;;  %v2743_v39 = vclamps-f32 %v1721_v6, 1.0  ;;  %5007 = vst [vmem:[#allocation9_spill] sm:$0xff] %v4327_v38  ;;  %v4343_v0 = vmul.f32 0.70710677, %v4327_v38 }
 0x21f   :  { %v1760_v3 = vsel %vm1757_vm2, %v1759_v37, %v1755_v40  ;;  %5006 = vst [vmem:[#allocation8_spill] sm:$0xff] %v4322_v41  ;;  %v1952_v1 = vmul.f32 %v4322_v41, %v4322_v41 }
 0x220   :  { %v1761_v22 = vmul.f32 %v1760_v3, %v1736_v9  ;;  %v1778_v60 = vadd.f32 1.0, %v2743_v39  ;;  %5009 = vst [vmem:[#allocation11_spill] sm:$0xff] %v4343_v0  ;;  %v1992_v34 = vmul.f32 %v4343_v0, %v4343_v0 }
 0x221   :  { %v4355_v9 = vmin.f32 %v1952_v1, 16.0 }
 0x222   :  { %v2744_v61 = vclamps-f32 %v1761_v22, 1.0  ;;  %v1794_v63 = vmul.f32 %v1778_v60, %v1106_v55 }
 0x223   :  { %v1954_v6 = vmul.f32 2.1237322e-06, %v4355_v9 }
 0x224   :  { %1909 = vmatmul.bf16.gmra.mxu3 %v1802_v56  ;;  %v1779_v20 = vadd.f32 1.0, %v2744_v61 }
 0x226   :  { %v1795_v10 = vmul.f32 %v1779_v20, %v1107_v14  ;;  %v4371_v20 = vmin.f32 %v1992_v34, 16.0 }
 0x228   :  { %v1803_v27 = vpack.c.bf16 %v1795_v10, %v1794_v63  ;;  %5010 = vst [vmem:[#allocation12_spill] sm:$0xff] %v4371_v20 }
 0x22a   :  { %v1885_v49 = vpop.f32.mrf.mxu3 }
 0x22b   :  { %v4277_v26 = vadd.f32 %v4274_v46, %v1885_v49  ;;  %v1955_v49 = vadd.f32 0.00028619796, %v1954_v6 }
 0x22d   :  { %5000 = vst [vmem:[#allocation2_spill] sm:$0xff] %v4277_v26  ;;  %v4280_v52 = vmul.f32 0.70710677, %v4277_v26 }
 0x22f   :  { %v2032_v32 = vmul.f32 %v4280_v52, %v4280_v52 }
 0x231   :  { %v4296_v51 = vmin.f32 %v2032_v32, 16.0 }
 0x232   :  { %v1887_v24 = vpop.f32.mrf.mxu3 }
 0x233   :  { %v4288_v25 = vadd.f32 %v4274_v46, %v1887_v24  ;;  %v2034_v47 = vmul.f32 2.1237322e-06, %v4296_v51 }
 0x234   :  { %1914 = vmatmul.bf16.gmra.mxu3 %v1803_v27 }
 0x235   :  { %5001 = vst [vmem:[#allocation3_spill] sm:$0xff] %v4288_v25  ;;  %v4302_v5 = vmul.f32 0.70710677, %v4288_v25  ;;  %v2035_v50 = vadd.f32 0.00028619796, %v2034_v47 }
 0x237   :  { %5003 = vst [vmem:[#allocation5_spill] sm:$0xff] %v4302_v5  ;;  %v2072_v4 = vmul.f32 %v4302_v5, %v4302_v5  ;;  %v2036_v11 = vmul.f32 %v2035_v50, %v4296_v51  ;;  %v1956_v50 = vmul.f32 %v1955_v49, %v4355_v9 }
 0x239   :  { %v4333_v62 = vmin.f32 %v2072_v4, 16.0  ;;  %v2037_v54 = vadd.f32 0.0036580483, %v2036_v11 }
 0x23b   :  { %v2074_v45 = vmul.f32 2.1237322e-06, %v4333_v62  ;;  %v2038_v55 = vmul.f32 %v2037_v54, %v4296_v51  ;;  %v1957_v54 = vadd.f32 0.0036580483, %v1956_v50 }
 0x23d   :  { %v2075_v56 = vadd.f32 0.00028619796, %v2074_v45  ;;  %v1958_v49 = vmul.f32 %v1957_v54, %v4355_v9 }
 0x23f   :  { %v2076_v27 = vmul.f32 %v2075_v56, %v4333_v62 }
 0x241   :  { %v2077_v4 = vadd.f32 0.0036580483, %v2076_v27 }
 0x243   :  { %v2078_v34 = vmul.f32 %v2077_v4, %v4333_v62 }
 0x246   :  { %v1890_v31 = vpop.f32.mrf.mxu3 }
 0x247   :  { %v4283_v28 = vadd.f32 %v4274_v46, %v1890_v31 }
 0x249   :  { %v4294_v48 = vmul.f32 0.70710677, %v4283_v28 }
 0x24b   :  { %v2112_v30 = vmul.f32 %v4294_v48, %v4294_v48 }
 0x24d   :  { %v4329_v57 = vmin.f32 %v2112_v30, 16.0 }
 0x24e   :  { %v1892_v18 = vpop.f32.mrf.mxu3 }
 0x24f   :  { %v4299_v59 = vadd.f32 %v4274_v46, %v1892_v18  ;;  %v2114_v44 = vmul.f32 2.1237322e-06, %v4329_v57  ;;  %v1994_v18 = vmul.f32 2.1237322e-06, %v4371_v20 }
 0x251   :  { %5002 = vst [vmem:[#allocation4_spill] sm:$0xff] %v4299_v59  ;;  %v4314_v58 = vmul.f32 0.70710677, %v4299_v59  ;;  %v2115_v40 = vadd.f32 0.00028619796, %v2114_v44 }
 0x252   :  { %v1995_v44 = vadd.f32 0.00028619796, %v1994_v18 }
 0x253   :  { %v2152_v23 = vmul.f32 %v4314_v58, %v4314_v58  ;;  %v2116_v14 = vmul.f32 %v2115_v40, %v4329_v57 }
 0x254   :  { %v1996_v6 = vmul.f32 %v1995_v44, %v4371_v20 }
 0x255   :  { %v4347_v53 = vmin.f32 %v2152_v23, 16.0 }
 0x257   :  { %v2154_v3 = vmul.f32 2.1237322e-06, %v4347_v53 }
 0x259   :  { %v2155_v10 = vadd.f32 0.00028619796, %v2154_v3 }
 0x25b   :  { %v2156_v30 = vmul.f32 %v2155_v10, %v4347_v53 }
 0x264   :  { %v1895_v16 = vpop.f32.mrf.mxu3 }
 0x265   :  { %v4291_v21 = vadd.f32 %v4274_v46, %v1895_v16  ;;  %v2117_v16 = vadd.f32 0.0036580483, %v2116_v14 }
 0x267   :  { %v4308_v35 = vmul.f32 0.70710677, %v4291_v21 }
 0x269   :  { %v2192_v43 = vmul.f32 %v4308_v35, %v4308_v35 }
 0x26b   :  { %v4340_v7 = vmin.f32 %v2192_v43, 16.0 }
 0x26c   :  { %v1897_v12 = vpop.f32.mrf.mxu3 }
 0x26d   :  { %v4319_v33 = vadd.f32 %v4274_v46, %v1897_v12  ;;  %v2194_v29 = vmul.f32 2.1237322e-06, %v4340_v7  ;;  %v2039_v12 = vadd.f32 0.05243302, %v2038_v55 }
 0x26f   :  { %5005 = vst [vmem:[#allocation7_spill] sm:$0xff] %v4319_v33  ;;  %v4336_v15 = vmul.f32 0.70710677, %v4319_v33  ;;  %v2195_v61 = vadd.f32 0.00028619796, %v2194_v29  ;;  %v2040_v45 = vmul.f32 %v2039_v12, %v4296_v51 }
 0x271   :  { %5008 = vst [vmem:[#allocation10_spill] sm:$0xff] %v4336_v15  ;;  %v2232_v8 = vmul.f32 %v4336_v15, %v4336_v15  ;;  %v2196_v24 = vmul.f32 %v2195_v61, %v4340_v7 }
 0x273   :  { %v4366_v22 = vmin.f32 %v2232_v8, 16.0  ;;  %v2197_v23 = vadd.f32 0.0036580483, %v2196_v24  ;;  %v2157_v8 = vadd.f32 0.0036580483, %v2156_v30 }
 0x275   :  { %v2234_v36 = vmul.f32 2.1237322e-06, %v4366_v22  ;;  %v2198_v3 = vmul.f32 %v2197_v23, %v4340_v7  ;;  %v2158_v55 = vmul.f32 %v2157_v8, %v4347_v53 }
 0x277   :  { %v2235_v43 = vadd.f32 0.00028619796, %v2234_v36  ;;  %v2199_v24 = vadd.f32 0.05243302, %v2198_v3 }
 0x279   :  { %v2236_v40 = vmul.f32 %v2235_v43, %v4366_v22 }
 0x27b   :  { %v2237_v27 = vadd.f32 0.0036580483, %v2236_v40 }
 0x27d   :  { %v1900_v2 = vpop.f32.mrf.mxu3  ;;  %v2238_v50 = vmul.f32 %v2237_v27, %v4366_v22 }
 0x27e   :  { %v4350_v19 = vadd.f32 %v4274_v46, %v1900_v2  ;;  %v2118_v2 = vmul.f32 %v2117_v16, %v4329_v57  ;;  %v1997_v16 = vadd.f32 0.0036580483, %v1996_v6 }
 0x27f   :  { %v2239_v6 = vadd.f32 0.05243302, %v2238_v50 }
 0x280   :  { %v4359_v37 = vmul.f32 0.70710677, %v4350_v19  ;;  %v2119_v61 = vadd.f32 0.05243302, %v2118_v2  ;;  %v1959_v2 = vadd.f32 0.05243302, %v1958_v49 }
 0x282   :  { %v2272_v42 = vmul.f32 %v4359_v37, %v4359_v37 }
 0x284   :  { %v4369_v39 = vmin.f32 %v2272_v42, 16.0 }
 0x285   :  { %v1902_v60 = vpop.f32.mrf.mxu3 }
 0x286   :  { %v2274_v13 = vmul.f32 2.1237322e-06, %v4369_v39  ;;  %v4377_v63 = vadd.f32 %v4274_v46, %v1902_v60  ;;  %v2285_v56 = vmul.f32 3.8918573e-05, %v4369_v39  ;;  %v2041_v60 = vadd.f32 0.18741608, %v2040_v45 }
 0x288   :  { %v4383_v31 = vmul.f32 0.70710677, %v4377_v63  ;;  %v2275_v32 = vadd.f32 0.00028619796, %v2274_v13  ;;  %v2286_v10 = vadd.f32 0.001143296, %v2285_v56  ;;  %v2042_v30 = vmul.f32 %v2041_v60, %v4296_v51 }
 0x289   :  { %v2079_v13 = vadd.f32 0.05243302, %v2078_v34  ;;  %v4422_v60 = vmul.f32 %v1959_v2, %v4355_v9 }
 0x28a   :  { %v2312_v47 = vmul.f32 %v4383_v31, %v4383_v31  ;;  %v2276_v11 = vmul.f32 %v2275_v32, %v4369_v39  ;;  %v2287_v18 = vmul.f32 %v2286_v10, %v4369_v39  ;;  %v2120_v32 = vmul.f32 %v2119_v61, %v4329_v57 }
 0x28b   :  { %v2080_v43 = vmul.f32 %v2079_v13, %v4333_v62  ;;  %v2043_v54 = vadd.f32 1.1283791, %v2042_v30  ;;  %5011 = vst [vmem:[#allocation13_spill] sm:$0xff] %v4422_v60  ;;  %v2240_v30 = vmul.f32 %v2239_v6, %v4366_v22 }
 0x28c   :  { %v4390_v1 = vmin.f32 %v2312_v47, 16.0  ;;  %v2277_v14 = vadd.f32 0.0036580483, %v2276_v11  ;;  %v2159_v47 = vadd.f32 0.05243302, %v2158_v55  ;;  %v2200_v11 = vmul.f32 %v2199_v24, %v4340_v7 }
 0x28d   :  { %v2288_v4 = vadd.f32 0.014752088, %v2287_v18  ;;  %v2121_v34 = vadd.f32 0.18741608, %v2120_v32  ;;  %v2081_v56 = vadd.f32 0.18741608, %v2080_v43  ;;  %v4432_v24 = vmul.f32 %v2043_v54, %v4280_v52 }
 0x28e   :  { %v2314_v29 = vmul.f32 2.1237322e-06, %v4390_v1  ;;  %v2278_v12 = vmul.f32 %v2277_v14, %v4369_v39  ;;  %v2160_v3 = vmul.f32 %v2159_v47, %v4347_v53  ;;  %v2201_v55 = vadd.f32 0.18741608, %v2200_v11 }
 0x28f   :  { %v2289_v8 = vmul.f32 %v2288_v4, %v4369_v39  ;;  %v2122_v27 = vmul.f32 %v2121_v34, %v4329_v57  ;;  %5013 = vst [vmem:[#allocation15_spill] sm:$0xff] %v4432_v24  ;;  %v4435_v18 = vmul.f32 0.5, %v4283_v28  ;;  %v2325_v54 = vmul.f32 3.8918573e-05, %v4390_v1 }
 0x290   :  { %v2315_v42 = vadd.f32 0.00028619796, %v2314_v29  ;;  %v1998_v29 = vmul.f32 %v1997_v16, %v4371_v20  ;;  %v2279_v40 = vadd.f32 0.05243302, %v2278_v12  ;;  %v2161_v16 = vadd.f32 0.18741608, %v2160_v3 }
 0x291   :  { %v2290_v14 = vadd.f32 0.112945676, %v2289_v8  ;;  %5014 = vst [vmem:[#allocation16_spill] sm:$0xff] %v4435_v18  ;;  %v2082_v12 = vmul.f32 %v2081_v56, %v4333_v62  ;;  %v2202_v50 = vmul.f32 %v2201_v55, %v4340_v7  ;;  %v2205_v8 = vmul.f32 3.8918573e-05, %v4340_v7 }
 0x292   :  { %v2316_v36 = vmul.f32 %v2315_v42, %v4390_v1  ;;  %v4426_v13 = vadd.f32 0.05243302, %v1998_v29  ;;  %v2162_v29 = vmul.f32 %v2161_v16, %v4347_v53  ;;  %v2241_v3 = vadd.f32 0.18741608, %v2240_v30 }
 0x293   :  { %v2291_v49 = vmul.f32 %v2290_v14, %v4369_v39  ;;  %v4457_v14 = vadd.f32 1.1283791, %v2082_v12  ;;  %v2203_v55 = vadd.f32 1.1283791, %v2202_v50  ;;  %v2206_v16 = vadd.f32 0.001143296, %v2205_v8 }
 0x294   :  { %v2317_v23 = vadd.f32 0.0036580483, %v2316_v36  ;;  %5012 = vst [vmem:[#allocation14_spill] sm:$0xff] %v4426_v13  ;;  %v2280_v36 = vmul.f32 %v2279_v40, %v4369_v39  ;;  %v2326_v12 = vadd.f32 0.001143296, %v2325_v54  ;;  %v2242_v50 = vmul.f32 %v2241_v3, %v4366_v22 }
 0x295   :  { %v2292_v43 = vadd.f32 0.4994258, %v2291_v49  ;;  %5015 = vst [vmem:[#allocation17_spill] sm:$0xff] %v4457_v14  ;;  %v2207_v54 = vmul.f32 %v2206_v16, %v4340_v7  ;;  %v4483_v3 = vmul.f32 0.5, %v4350_v19 }
 0x296   :  { %v2318_v61 = vmul.f32 %v2317_v23, %v4390_v1  ;;  %v2281_v2 = vadd.f32 0.18741608, %v2280_v36 }
 0x297   :  { %v1905_v44 = vpop.f32.mrf.mxu3  ;;  %v2293_v11 = vmul.f32 %v2292_v43, %v4369_v39  ;;  %v4470_v43 = vadd.f32 1.1283791, %v2162_v29 }
 0x298   :  { %v4412_v45 = vadd.f32 %v4274_v46, %v1905_v44  ;;  %v2319_v47 = vadd.f32 0.05243302, %v2318_v61  ;;  %v2123_v44 = vadd.f32 1.1283791, %v2122_v27  ;;  %v2282_v36 = vmul.f32 %v2281_v2, %v4369_v39 }
 0x299   :  { %v4455_v61 = vadd.f32 1.0, %v2293_v11 }
 0x29a   :  { %v4418_v42 = vmul.f32 0.70710677, %v4412_v45  ;;  %v2320_v56 = vmul.f32 %v2319_v47, %v4390_v1  ;;  %v4466_v30 = vmul.f32 %v2123_v44, %v4294_v48  ;;  %v4478_v44 = vmul.f32 %v2203_v55, %v4308_v35 }
 0x29b   :  { %2896 = vrcp.f32 %v4455_v61  ;;  %vm2300_vm3 = vweird.f32 %v4455_v61 }
 0x29c   :  { %v2352_v10 = vmul.f32 %v4418_v42, %v4418_v42  ;;  %5016 = vst [vmem:[#allocation18_spill] sm:$0xff] %v4466_v30 }
 0x29e   :  { %v4437_v32 = vmin.f32 %v2352_v10, 16.0 }
 0x29f   :  { %v1907_v4 = vpop.f32.mrf.mxu3 }
 0x2a0   :  { %v2354_v23 = vmul.f32 2.1237322e-06, %v4437_v32  ;;  %v4444_v52 = vadd.f32 %v4274_v46, %v1907_v4  ;;  %v2365_v28 = vmul.f32 3.8918573e-05, %v4437_v32 }
 0x2a2   :  { %v2355_v34 = vadd.f32 0.00028619796, %v2354_v23  ;;  %v4451_v40 = vmul.f32 0.70710677, %v4444_v52  ;;  %v2366_v6 = vadd.f32 0.001143296, %v2365_v28 }
 0x2a3   :  { %v2321_v23 = vadd.f32 0.18741608, %v2320_v56 }
 0x2a4   :  { %v2356_v10 = vmul.f32 %v2355_v34, %v4437_v32  ;;  %v2392_v27 = vmul.f32 %v4451_v40, %v4451_v40  ;;  %v2367_v49 = vmul.f32 %v2366_v6, %v4437_v32  ;;  %v2283_v34 = vadd.f32 1.1283791, %v2282_v36 }
 0x2a5   :  { %v4494_v36 = vmul.f32 0.5, %v4377_v63 }
 0x2a6   :  { %v2357_v47 = vadd.f32 0.0036580483, %v2356_v10  ;;  %v4468_v4 = vmin.f32 %v2392_v27, 16.0  ;;  %v2368_v11 = vadd.f32 0.014752088, %v2367_v49  ;;  %v2327_v10 = vmul.f32 %v2326_v12, %v4390_v1  ;;  %v4486_v27 = vpop.eup %2896 }
 0x2a7   :  { %v1910_v28 = vpop.f32.mrf.mxu3  ;;  %v4488_v49 = vadd.f32 1.1283791, %v2242_v50  ;;  %v2296_v63 = vmul.f32 %v4486_v27, %v4455_v61  ;;  %vm2301_vm4 = vweird.f32 %v4486_v27 }
 0x2a8   :  { %v2358_v39 = vmul.f32 %v2357_v47, %v4437_v32  ;;  %v2394_v2 = vmul.f32 2.1237322e-06, %v4468_v4  ;;  %v1911_v8 = vadd.f32 %v4274_v46, %v1910_v28  ;;  %v2405_v48 = vmul.f32 3.8918573e-05, %v4468_v4  ;;  %vm4578_vm5 = vmor %vm2300_vm3, %vm2301_vm4 }
 0x2a9   :  { %v2369_v29 = vmul.f32 %v2368_v11, %v4437_v32  ;;  %5017 = vst [vmem:[#allocation19_spill] sm:$0xff] %v4488_v49  ;;  %v2322_v47 = vmul.f32 %v2321_v23, %v4390_v1  ;;  %v4499_v11 = vmul.f32 %v2283_v34, %v4359_v37  ;;  %v2208_v23 = vadd.f32 0.014752088, %v2207_v54 }
 0x2aa   :  { %v2359_v56 = vadd.f32 0.05243302, %v2358_v39  ;;  %v2395_v6 = vadd.f32 0.00028619796, %v2394_v2  ;;  %v4491_v35 = vmul.f32 0.70710677, %v1911_v8 }
 0x2ab   :  { %v2370_v55 = vadd.f32 0.112945676, %v2369_v29  ;;  %v2406_v28 = vadd.f32 0.001143296, %v2405_v48  ;;  %v4505_v39 = vmul.f32 0.5, %v4412_v45  ;;  %v2306_v34 = vand.u32 2147483648, %v4455_v61 }
 0x2ac   :  { %v2360_v16 = vmul.f32 %v2359_v56, %v4437_v32  ;;  %v2396_v19 = vmul.f32 %v2395_v6, %v4468_v4  ;;  %v2432_v12 = vmul.f32 %v4491_v35, %v4491_v35  ;;  %v2328_v29 = vadd.f32 0.014752088, %v2327_v10 }
 0x2ad   :  { %v2371_v50 = vmul.f32 %v2370_v55, %v4437_v32  ;;  %v2323_v56 = vadd.f32 1.1283791, %v2322_v47  ;;  %v2407_v45 = vmul.f32 %v2406_v28, %v4468_v4  ;;  %v2209_v47 = vmul.f32 %v2208_v23, %v4340_v7 }
 0x2ae   :  { %v2397_v2 = vadd.f32 0.0036580483, %v2396_v19  ;;  %v4509_v6 = vmin.f32 %v2432_v12, 16.0  ;;  %v2361_v38 = vadd.f32 0.18741608, %v2360_v16  ;;  %v2297_v0 = vsub.f32 1.0, %v2296_v63 }
 0x2af   :  { %v1912_v48 = vpop.f32.mrf.mxu3  ;;  %v2372_v37 = vadd.f32 0.4994258, %v2371_v50  ;;  %v2329_v16 = vmul.f32 %v2328_v29, %v4390_v1  ;;  %v2210_v29 = vadd.f32 0.112945676, %v2209_v47 }
 0x2b0   :  { %v2398_v17 = vmul.f32 %v2397_v2, %v4468_v4  ;;  %v1913_v54 = vadd.f32 %v4274_v46, %v1912_v48  ;;  %v2434_v55 = vmul.f32 2.1237322e-06, %v4509_v6  ;;  %v2445_v19 = vmul.f32 3.8918573e-05, %v4509_v6 }
 0x2b1   :  { %v2373_v10 = vmul.f32 %v2372_v37, %v4437_v32  ;;  %v4522_v2 = vmul.f32 %v2323_v56, %v4383_v31  ;;  %v2362_v25 = vmul.f32 %v2361_v38, %v4437_v32  ;;  %v2408_v37 = vadd.f32 0.014752088, %v2407_v45 }
 0x2b2   :  { %v2399_v12 = vadd.f32 0.05243302, %v2398_v17  ;;  %v2435_v48 = vadd.f32 0.00028619796, %v2434_v55  ;;  %v4524_v41 = vmul.f32 0.70710677, %v1913_v54  ;;  %v2298_v38 = vmul.f32 %v4486_v27, %v2297_v0 }
 0x2b3   :  { %v2446_v28 = vadd.f32 0.001143296, %v2445_v19  ;;  %v4527_v26 = vadd.f32 1.0, %v2373_v10  ;;  %v4530_v17 = vor.u32 1.1754944e-38, %v2306_v34  ;;  %v2330_v32 = vadd.f32 0.112945676, %v2329_v16 }
 0x2b4   :  { %v2436_v23 = vmul.f32 %v2435_v48, %v4509_v6  ;;  %v2472_v63 = vmul.f32 %v4524_v41, %v4524_v41  ;;  %v2400_v56 = vmul.f32 %v2399_v12, %v4468_v4  ;;  %v4539_v45 = vmul.f32 0.5, %v1911_v8 }
 0x2b5   :  { %v2447_v31 = vmul.f32 %v2446_v28, %v4509_v6  ;;  %2898 = vrcp.f32 %v4527_v26  ;;  %v2363_v48 = vadd.f32 1.1283791, %v2362_v25  ;;  %v2409_v28 = vmul.f32 %v2408_v37, %v4468_v4 }
 0x2b6   :  { %v2437_v55 = vadd.f32 0.0036580483, %v2436_v23  ;;  %v4541_v34 = vmin.f32 %v2472_v63, 16.0  ;;  %v2401_v16 = vadd.f32 0.18741608, %v2400_v56  ;;  %v4553_v63 = vadd.f32 %v4486_v27, %v2298_v38 }
 0x2b7   :  { %v1915_v19 = vpop.f32.mrf.mxu3  ;;  %v2448_v10 = vadd.f32 0.014752088, %v2447_v31  ;;  %v4556_v25 = vmul.f32 %v2210_v29, %v4340_v7  ;;  %v4566_v56 = vmul.f32 0.5, %v1913_v54  ;;  %v2384_v59 = vand.u32 2147483647, %v4527_v26 }
 0x2b8   :  { %v1916_v50 = vadd.f32 %v4274_v46, %v1915_v19  ;;  %v2438_v47 = vmul.f32 %v2437_v55, %v4509_v6  ;;  %v2474_v12 = vmul.f32 2.1237322e-06, %v4541_v34  ;;  %v2485_v8 = vmul.f32 3.8918573e-05, %v4541_v34 }
 0x2b9   :  { %v2449_v0 = vmul.f32 %v2448_v10, %v4509_v6  ;;  %v4559_v55 = vmul.f32 %v2330_v32, %v4390_v1  ;;  %v4564_v10 = vmul.f32 %v2363_v48, %v4418_v42  ;;  %v2410_v32 = vadd.f32 0.112945676, %v2409_v28 }
 0x2ba   :  { %v4550_v23 = vmul.f32 0.70710677, %v1916_v50  ;;  %v2439_v37 = vadd.f32 0.05243302, %v2438_v47  ;;  %v2475_v31 = vadd.f32 0.00028619796, %v2474_v12  ;;  %v2402_v54 = vmul.f32 %v2401_v16, %v4468_v4 }
 0x2bb   :  { %v2450_v19 = vadd.f32 0.112945676, %v2449_v0  ;;  %v4561_v13 = vpop.eup %2898  ;;  %v2486_v60 = vadd.f32 0.001143296, %v2485_v8  ;;  %v2303_v8 = vsel %vm4578_vm5, %v4486_v27, %v4553_v63  ;;  %v2386_v63 = vand.u32 2147483648, %v4527_v26 }
 0x2bc   :  { %v2512_v38 = vmul.f32 %v4550_v23, %v4550_v23  ;;  %v2476_v29 = vmul.f32 %v2475_v31, %v4541_v34  ;;  %v2376_v12 = vmul.f32 %v4561_v13, %v4527_v26  ;;  %v2440_v28 = vmul.f32 %v2439_v37, %v4509_v6 }
 0x2bd   :  { %v2451_v47 = vmul.f32 %v2450_v19, %v4509_v6  ;;  %v2487_v0 = vmul.f32 %v2486_v60, %v4541_v34  ;;  %v5020_v37 = vand.u32 2147483647, %v4455_v61  ;;  %vm2380_vm7 = vweird.f32 %v4527_v26 }
 0x2be   :  { %v4583_v48 = vmin.f32 %v2512_v38, 16.0  ;;  %v2477_v31 = vadd.f32 0.0036580483, %v2476_v29  ;;  %v2377_v27 = vsub.f32 1.0, %v2376_v12  ;;  %v4618_v20 = vmul.f32 0.5, %v1916_v50 }
 0x2bf   :  { %v1917_v19 = vpop.f32.mrf.mxu3  ;;  %v2452_v18 = vadd.f32 0.4994258, %v2451_v47  ;;  %v2488_v60 = vadd.f32 0.014752088, %v2487_v0  ;;  %vm4602_vm6 = vcmp.eq.f32.partialorder %v5020_v37, 8.507059e+37  ;;  %vm2381_vm8 = vweird.f32 %v4561_v13 }
 0x2c0   :  { %v2514_v14 = vmul.f32 2.1237322e-06, %v4583_v48  ;;  %v4594_v16 = vadd.f32 %v4274_v46, %v1917_v19  ;;  %v2525_v38 = vmul.f32 3.8918573e-05, %v4583_v48  ;;  %v2478_v5 = vmul.f32 %v2477_v31, %v4541_v34  ;;  %vm4652_vm10 = vmor %vm2380_vm7, %vm2381_vm8 }
 0x2c1   :  { %v2453_v42 = vmul.f32 %v2452_v18, %v4509_v6  ;;  %v2403_v47 = vadd.f32 1.1283791, %v2402_v54  ;;  %v2489_v0 = vmul.f32 %v2488_v60, %v4541_v34  ;;  %v2441_v19 = vadd.f32 0.18741608, %v2440_v28 }
 0x2c2   :  { %v2515_v24 = vadd.f32 0.00028619796, %v2514_v14  ;;  %v4607_v46 = vmul.f32 0.70710677, %v4594_v16  ;;  %v2479_v31 = vadd.f32 0.05243302, %v2478_v5  ;;  %v2411_v18 = vmul.f32 %v2410_v32, %v4468_v4 }
 0x2c3   :  { %v2526_v30 = vadd.f32 0.001143296, %v2525_v38  ;;  %v4615_v37 = vadd.f32 1.0, %v2453_v42  ;;  %v2490_v14 = vadd.f32 0.112945676, %v2489_v0  ;;  %v2378_v5 = vmul.f32 %v4561_v13, %v2377_v27 }
 0x2c4   :  { %v2516_v61 = vmul.f32 %v2515_v24, %v4583_v48  ;;  %v2552_v12 = vmul.f32 %v4607_v46, %v4607_v46  ;;  %v2480_v54 = vmul.f32 %v2479_v31, %v4541_v34  ;;  %v2387_v24 = vor.u32 1.1754944e-38, %v2386_v63 }
 0x2c5   :  { %v2527_v28 = vmul.f32 %v2526_v30, %v4583_v48  ;;  %2900 = vrcp.f32 %v4615_v37  ;;  %v2491_v49 = vmul.f32 %v2490_v14, %v4541_v34  ;;  %vm4627_vm9 = vcmp.eq.f32.partialorder %v2384_v59, 8.507059e+37 }
 0x2c6   :  { %v2517_v38 = vadd.f32 0.0036580483, %v2516_v61  ;;  %v4622_v60 = vmin.f32 %v2552_v12, 16.0  ;;  %v2412_v50 = vadd.f32 0.4994258, %v2411_v18  ;;  %v2442_v30 = vmul.f32 %v2441_v19, %v4509_v6 }
 0x2c7   :  { %v2528_v32 = vadd.f32 0.014752088, %v2527_v28  ;;  %v2481_v61 = vadd.f32 0.18741608, %v2480_v54  ;;  %v2492_v12 = vadd.f32 0.4994258, %v2491_v49  ;;  %v2379_v14 = vadd.f32 %v4561_v13, %v2378_v5 }
 0x2c8   :  { %v2518_v27 = vmul.f32 %v2517_v38, %v4583_v48  ;;  %v2554_v0 = vmul.f32 2.1237322e-06, %v4622_v60  ;;  %v2565_v31 = vmul.f32 3.8918573e-05, %v4622_v60  ;;  %v2308_v18 = vsel %vm4602_vm6, %v4530_v17, %v2303_v8 }
 0x2c9   :  { %v2529_v63 = vmul.f32 %v2528_v32, %v4583_v48  ;;  %v4641_v6 = vmul.f32 %v2403_v47, %v4451_v40  ;;  %v2493_v38 = vmul.f32 %v2492_v12, %v4541_v34  ;;  %v2413_v54 = vmul.f32 %v2412_v50, %v4468_v4 }
 0x2ca   :  { %v2519_v28 = vadd.f32 0.05243302, %v2518_v27  ;;  %v2555_v59 = vadd.f32 0.00028619796, %v2554_v0  ;;  %v2566_v15 = vadd.f32 0.001143296, %v2565_v31  ;;  %v2383_v29 = vsel %vm4652_vm10, %v4561_v13, %v2379_v14 }
 0x2cb   :  { %v2530_v19 = vadd.f32 0.112945676, %v2529_v63  ;;  %v2901_v33 = vpop.eup %2900  ;;  %v2443_v32 = vadd.f32 1.1283791, %v2442_v30  ;;  %v2464_v8 = vand.u32 2147483647, %v4615_v37  ;;  %v2388_v13 = vsel %vm4627_vm9, %v2387_v24, %v2383_v29 }
 0x2cc   :  { %v2520_v49 = vmul.f32 %v2519_v28, %v4583_v48  ;;  %v2556_v5 = vmul.f32 %v2555_v59, %v4622_v60  ;;  %v2567_v27 = vmul.f32 %v2566_v15, %v4622_v60  ;;  %v2456_v4 = vmul.f32 %v2901_v33, %v4615_v37 }
 0x2cd   :  { %v2531_v17 = vmul.f32 %v2530_v19, %v4583_v48  ;;  %v2482_v15 = vmul.f32 %v2481_v61, %v4541_v34  ;;  %v4663_v31 = vadd.f32 1.0, %v2493_v38  ;;  %v4665_v63 = vadd.f32 1.0, %v2413_v54 }
 0x2ce   :  { %v2521_v47 = vadd.f32 0.18741608, %v2520_v49  ;;  %v2557_v50 = vadd.f32 0.0036580483, %v2556_v5  ;;  %v2568_v30 = vadd.f32 0.014752088, %v2567_v27  ;;  %vm2461_vm11 = vweird.f32 %v2901_v33 }
 0x2cf   :  { %v2532_v26 = vadd.f32 0.4994258, %v2531_v17  ;;  %v2457_v0 = vsub.f32 1.0, %v2456_v4  ;;  %v2466_v59 = vand.u32 2147483648, %v4615_v37  ;;  %2902 = vrcp.f32 %v4663_v31 }
 0x2d0   :  { %v2558_v12 = vmul.f32 %v2557_v50, %v4622_v60  ;;  %v2569_v28 = vmul.f32 %v2568_v30, %v4622_v60  ;;  %v2522_v34 = vmul.f32 %v2521_v47, %v4583_v48  ;;  %2904 = vrcp.f32 %v4665_v63 }
 0x2d1   :  { %v2533_v61 = vmul.f32 %v2532_v26, %v4583_v48  ;;  %v2458_v14 = vmul.f32 %v2901_v33, %v2457_v0  ;;  %v2483_v54 = vadd.f32 1.1283791, %v2482_v15  ;;  %v4679_v27 = vmul.f32 %v2388_v13, %v4564_v10 }
 0x2d2   :  { %v2559_v19 = vadd.f32 0.05243302, %v2558_v12  ;;  %v2570_v38 = vadd.f32 0.112945676, %v2569_v28  ;;  %vm2460_vm12 = vweird.f32 %v4615_v37  ;;  %v4685_v48 = vmul.f32 %v2308_v18, %v4499_v11 }
 0x2d3   :  { %v4676_v49 = vadd.f32 1.0, %v2533_v61  ;;  %v2459_v5 = vadd.f32 %v2901_v33, %v2458_v14  ;;  %v2444_v40 = vmul.f32 %v2443_v32, %v4491_v35  ;;  %v2523_v17 = vadd.f32 1.1283791, %v2522_v34  ;;  %vm2462_vm13 = vmor %vm2460_vm12, %vm2461_vm11 }
 0x2d4   :  { %v2560_v24 = vmul.f32 %v2559_v19, %v4622_v60  ;;  %v2571_v42 = vmul.f32 %v2570_v38, %v4622_v60  ;;  %v4689_v4 = vmul.f32 0.5, %v4594_v16  ;;  %v2467_v47 = vor.u32 1.1754944e-38, %v2466_v59 }
 0x2d5   :  { %2906 = vrcp.f32 %v4676_v49  ;;  %v2463_v15 = vsel %vm2462_vm13, %v2901_v33, %v2459_v5  ;;  %v2903_v50 = vpop.eup %2902  ;;  %v2484_v30 = vmul.f32 %v2483_v54, %v4524_v41  ;;  %vm2465_vm14 = vcmp.eq.f32.partialorder %v2464_v8, 8.507059e+37 }
 0x2d6   :  { %v2561_v10 = vadd.f32 0.18741608, %v2560_v24  ;;  %v2572_v29 = vadd.f32 0.4994258, %v2571_v42  ;;  %vm2500_vm15 = vweird.f32 %v4663_v31  ;;  %v2803_v11 = vclamps-f32 %v4679_v27, 1.0  ;;  %v2905_v35 = vpop.eup %2904 }
 0x2d7   :  { %v2468_v16 = vsel %vm2465_vm14, %v2467_v47, %v2463_v15  ;;  %v2496_v18 = vmul.f32 %v2903_v50, %v4663_v31  ;;  %v2504_v32 = vand.u32 2147483647, %v4663_v31  ;;  %v2524_v26 = vmul.f32 %v2523_v17, %v4550_v23 }
 0x2d8   :  { %v2573_v37 = vmul.f32 %v2572_v29, %v4622_v60  ;;  %v2544_v33 = vand.u32 2147483647, %v4676_v49  ;;  %v2506_v0 = vand.u32 2147483648, %v4663_v31  ;;  %v2416_v41 = vmul.f32 %v2905_v35, %v4665_v63 }
 0x2d9   :  { %v2562_v8 = vmul.f32 %v2561_v10, %v4622_v60  ;;  %v2497_v28 = vsub.f32 1.0, %v2496_v18  ;;  %vm2420_vm0 = vweird.f32 %v4665_v63  ;;  %vm2540_vm1 = vweird.f32 %v4676_v49 }
 0x2da   :  { %v4703_v12 = vadd.f32 1.0, %v2573_v37  ;;  %v2546_v13 = vand.u32 2147483648, %v4676_v49  ;;  %v2469_v34 = vmul.f32 %v2468_v16, %v2444_v40  ;;  %v2417_v23 = vsub.f32 1.0, %v2416_v41 }
 0x2db   :  { %v2907_v59 = vpop.eup %2906  ;;  %vm4710_vm2 = vcmp.eq.f32.partialorder %v2504_v32, 8.507059e+37  ;;  %v2424_v60 = vand.u32 2147483647, %v4665_v63  ;;  %vm4715_vm3 = vcmp.eq.f32.partialorder %v2544_v33, 8.507059e+37  ;;  %v2498_v38 = vmul.f32 %v2903_v50, %v2497_v28 }
 0x2dc   :  { %v2536_v61 = vmul.f32 %v2907_v59, %v4676_v49  ;;  %2908 = vrcp.f32 %v4703_v12  ;;  %vm2501_vm4 = vweird.f32 %v2903_v50  ;;  %v2426_v54 = vand.u32 2147483648, %v4665_v63 }
 0x2dd   :  { %v2563_v5 = vadd.f32 1.1283791, %v2562_v8  ;;  %v2418_v42 = vmul.f32 %v2905_v35, %v2417_v23  ;;  %vm2421_vm5 = vweird.f32 %v2905_v35  ;;  %v2547_v40 = vor.u32 1.1754944e-38, %v2546_v13  ;;  %vm2502_vm7 = vmor %vm2500_vm15, %vm2501_vm4 }
 0x2de   :  { %v2537_v24 = vsub.f32 1.0, %v2536_v61  ;;  %v2805_v17 = vclamps-f32 %v2469_v34, 1.0  ;;  %v2499_v10 = vadd.f32 %v2903_v50, %v2498_v38  ;;  %v2507_v29 = vor.u32 1.1754944e-38, %v2506_v0  ;;  %vm2422_vm9 = vmor %vm2420_vm0, %vm2421_vm5 }
 0x2df   :  { %vm2541_vm6 = vweird.f32 %v2907_v59  ;;  %v2419_v47 = vadd.f32 %v2905_v35, %v2418_v42  ;;  %vm2425_vm8 = vcmp.eq.f32.partialorder %v2424_v60, 8.507059e+37  ;;  %v2427_v16 = vor.u32 1.1754944e-38, %v2426_v54 }
 0x2e0   :  { %v2538_v15 = vmul.f32 %v2907_v59, %v2537_v24  ;;  %v2503_v37 = vsel %vm2502_vm7, %v2903_v50, %v2499_v10  ;;  %v2332_v18 = vadd.f32 0.4994258, %v4559_v55  ;;  %v2212_v32 = vadd.f32 0.4994258, %v4556_v25  ;;  %vm2542_vm10 = vmor %vm2540_vm1, %vm2541_vm6 }
 0x2e1   :  { %v2564_v41 = vmul.f32 %v2563_v5, %v4607_v46  ;;  %v2508_v8 = vsel %vm4710_vm2, %v2507_v29, %v2503_v37  ;;  %v2423_v31 = vsel %vm2422_vm9, %v2905_v35, %v2419_v47  ;;  %v2584_v63 = vand.u32 2147483647, %v4703_v12 }
 0x2e2   :  { %v2909_v33 = vpop.eup %2908  ;;  %v2539_v0 = vadd.f32 %v2907_v59, %v2538_v15  ;;  %v2509_v28 = vmul.f32 %v2508_v8, %v2484_v30  ;;  %v2428_v13 = vsel %vm2425_vm8, %v2427_v16, %v2423_v31  ;;  %v2333_v34 = vmul.f32 %v2332_v18, %v4390_v1 }
 0x2e3   :  { %v2576_v50 = vmul.f32 %v2909_v33, %v4703_v12  ;;  %v2429_v25 = vmul.f32 %v2428_v13, %v4641_v6  ;;  %v2245_v46 = vmul.f32 3.8918573e-05, %v4366_v22  ;;  %v2213_v49 = vmul.f32 %v2212_v32, %v4340_v7 }
 0x2e4   :  { %v2543_v55 = vsel %vm2542_vm10, %v2907_v59, %v2539_v0  ;;  %v2806_v61 = vclamps-f32 %v2509_v28, 1.0  ;;  %v2586_v60 = vand.u32 2147483648, %v4703_v12  ;;  %v2604_v38 = vadd.f32 1.0, %v2805_v17 }
 0x2e5   :  { %v2548_v23 = vsel %vm4715_vm3, %v2547_v40, %v2543_v55  ;;  %v2577_v35 = vsub.f32 1.0, %v2576_v50  ;;  %v4740_v30 = vadd.f32 1.0, %v2333_v34  ;;  %vm2581_vm11 = vweird.f32 %v2909_v33 }
 0x2e6   :  { %v2549_v14 = vmul.f32 %v2548_v23, %v2524_v26  ;;  %v2801_v6 = vclamps-f32 %v4685_v48, 1.0  ;;  %v4743_v1 = vadd.f32 1.0, %v2213_v49  ;;  %v2605_v5 = vadd.f32 1.0, %v2806_v61 }
 0x2e7   :  { %v2578_v59 = vmul.f32 %v2909_v33, %v2577_v35  ;;  %v2804_v19 = vclamps-f32 %v2429_v25, 1.0  ;;  %2910 = vrcp.f32 %v4740_v30  ;;  %vm2580_vm12 = vweird.f32 %v4703_v12 }
 0x2e8   :  { %v2807_v54 = vclamps-f32 %v2549_v14, 1.0  ;;  %v2246_v7 = vadd.f32 0.001143296, %v2245_v46  ;;  %v2125_v26 = vmul.f32 3.8918573e-05, %v4329_v57  ;;  %vm2582_vm13 = vmor %vm2580_vm12, %vm2581_vm11  ;;  %v2587_v42 = vor.u32 1.1754944e-38, %v2586_v60 }
 0x2e9   :  { %v2579_v24 = vadd.f32 %v2909_v33, %v2578_v59  ;;  %v2346_v17 = vand.u32 2147483648, %v4740_v30  ;;  %2912 = vrcp.f32 %v4743_v1  ;;  %vm2585_vm14 = vcmp.eq.f32.partialorder %v2584_v63, 8.507059e+37 }
 0x2ea   :  { %v2606_v40 = vadd.f32 1.0, %v2807_v54  ;;  %v4751_v10 = vmul.f32 %v2604_v38, %v4539_v45  ;;  %v2344_v29 = vand.u32 2147483647, %v4740_v30  ;;  %v4755_v12 = vmul.f32 %v2605_v5, %v4566_v56 }
 0x2eb   :  { %v2583_v48 = vsel %vm2582_vm13, %v2909_v33, %v2579_v24  ;;  %v4757_v47 = vadd.f32 1.0, %v2804_v19  ;;  %v4759_v37 = vadd.f32 1.0, %v2801_v6  ;;  %vm2340_vm15 = vweird.f32 %v4740_v30 }
 0x2ec   :  { %v2588_v15 = vsel %vm2585_vm14, %v2587_v42, %v2583_v48  ;;  %v2224_v18 = vand.u32 2147483647, %v4743_v1  ;;  %v2247_v32 = vmul.f32 %v2246_v7, %v4366_v22  ;;  %v2126_v33 = vadd.f32 0.001143296, %v2125_v26 }
 0x2ed   :  { %v2589_v16 = vmul.f32 %v2588_v15, %v2564_v41  ;;  %v2911_v45 = vpop.eup %2910  ;;  %v2622_v0 = vmul.f32 %v2606_v40, %v4618_v20  ;;  %v2347_v8 = vor.u32 1.1754944e-38, %v2346_v17  ;;  %v2165_v31 = vmul.f32 3.8918573e-05, %v4347_v53 }
 0x2ee   :  { %v2045_v56 = vmul.f32 3.8918573e-05, %v4296_v51  ;;  %v2336_v63 = vmul.f32 %v2911_v45, %v4740_v30  ;;  %vm2341_vm0 = vweird.f32 %v2911_v45  ;;  %vm4768_vm1 = vcmp.eq.f32.partialorder %v2344_v29, 8.507059e+37 }
 0x2ef   :  { %v2808_v50 = vclamps-f32 %v2589_v16, 1.0  ;;  %vm2220_vm2 = vweird.f32 %v4743_v1  ;;  %v2226_v28 = vand.u32 2147483648, %v4743_v1  ;;  %v2913_v13 = vpop.eup %2912  ;;  %v2248_v55 = vadd.f32 0.014752088, %v2247_v32  ;;  %vm2342_vm5 = vmor %vm2340_vm15, %vm2341_vm0 }
 0x2f0   :  { %v2127_v20 = vmul.f32 %v2126_v33, %v4329_v57  ;;  %v2166_v25 = vadd.f32 0.001143296, %v2165_v31  ;;  %v2046_v34 = vadd.f32 0.001143296, %v2045_v56  ;;  %v2337_v23 = vsub.f32 1.0, %v2336_v63 }
 0x2f1   :  { %v2607_v46 = vadd.f32 1.0, %v2808_v50  ;;  %v2216_v35 = vmul.f32 %v2913_v13, %v4743_v1  ;;  %vm2221_vm3 = vweird.f32 %v2913_v13  ;;  %vm4776_vm4 = vcmp.eq.f32.partialorder %v2224_v18, 8.507059e+37 }
 0x2f2   :  { %v2249_v49 = vmul.f32 %v2248_v55, %v4366_v22  ;;  %v2128_v14 = vadd.f32 0.014752088, %v2127_v20  ;;  %v2167_v60 = vmul.f32 %v2166_v25, %v4347_v53  ;;  %v2047_v38 = vmul.f32 %v2046_v34, %v4296_v51  ;;  %vm2222_vm6 = vmor %vm2220_vm2, %vm2221_vm3 }
 0x2f3   :  { %v2623_v59 = vmul.f32 %v2607_v46, %v4689_v4  ;;  %v2338_v6 = vmul.f32 %v2911_v45, %v2337_v23  ;;  %v2217_v54 = vsub.f32 1.0, %v2216_v35  ;;  %v2085_v5 = vmul.f32 3.8918573e-05, %v4333_v62 }
 0x2f4   :  { %v2250_v19 = vadd.f32 0.112945676, %v2249_v49  ;;  %v2129_v24 = vmul.f32 %v2128_v14, %v4329_v57  ;;  %v2168_v7 = vadd.f32 0.014752088, %v2167_v60  ;;  %v2048_v26 = vadd.f32 0.014752088, %v2047_v38 }
 0x2f5   :  { %v2632_v42 = vpack.c.bf16 %v2623_v59, %v2622_v0  ;;  %v2339_v40 = vadd.f32 %v2911_v45, %v2338_v6  ;;  %v2218_v17 = vmul.f32 %v2913_v13, %v2217_v54  ;;  %v2086_v48 = vadd.f32 0.001143296, %v2085_v5 }
 0x2f6   :  { %v2251_v29 = vmul.f32 %v2250_v19, %v4366_v22  ;;  %v2130_v4 = vadd.f32 0.112945676, %v2129_v24  ;;  %v2169_v15 = vmul.f32 %v2168_v7, %v4347_v53  ;;  %v2049_v16 = vmul.f32 %v2048_v26, %v4296_v51  ;;  %v5035_v24 = vld [vmem:[#allocation7_spill] sm:$0xff] }
 0x2f7   :  { %2639 = vmatpush.bf16.xpose.msrb.mxu0 %v2632_v42  ;;  %v2343_v18 = vsel %vm2342_vm5, %v2911_v45, %v2339_v40  ;;  %v2219_v32 = vadd.f32 %v2913_v13, %v2218_v17  ;;  %v2227_v33 = vor.u32 1.1754944e-38, %v2226_v28  ;;  %v2087_v0 = vmul.f32 %v2086_v48, %v4333_v62  ;;  %v5036_v17 = vld [vmem:[#allocation10_spill] sm:$0xff]  ;;  %v5037_v48 = vld [vmem:[#allocation19_spill] sm:$0xff] }
 0x2f8   :  { %v2348_v31 = vsel %vm4768_vm1, %v2347_v8, %v2343_v18  ;;  %v2252_v30 = vadd.f32 0.4994258, %v2251_v29  ;;  %v2131_v56 = vmul.f32 %v2130_v4, %v4329_v57  ;;  %v2170_v50 = vadd.f32 0.112945676, %v2169_v15 }
 0x2f9   :  { %v2349_v63 = vmul.f32 %v2348_v31, %v4522_v2  ;;  %v2223_v55 = vsel %vm2222_vm6, %v2913_v13, %v2219_v32  ;;  %v2050_v20 = vadd.f32 0.112945676, %v2049_v16  ;;  %v2088_v45 = vadd.f32 0.014752088, %v2087_v0 }
 0x2fa   :  { %v2228_v28 = vsel %vm4776_vm4, %v2227_v33, %v2223_v55  ;;  %v2253_v25 = vmul.f32 %v2252_v30, %v4366_v22  ;;  %v2132_v41 = vadd.f32 0.4994258, %v2131_v56  ;;  %v2171_v8 = vmul.f32 %v2170_v50, %v4347_v53  ;;  %v5040_v50 = vld [vmem:[#allocation12_spill] sm:$0xff] }
 0x2fb   :  { %v2802_v34 = vclamps-f32 %v2349_v63, 1.0  ;;  %v2229_v1 = vmul.f32 %v2228_v28, %v4478_v44  ;;  %v2051_v46 = vmul.f32 %v2050_v20, %v4296_v51  ;;  %v2089_v23 = vmul.f32 %v2088_v45, %v4333_v62 }
 0x2fc   :  { %v2631_v2 = vpack.c.bf16 %v4755_v12, %v4751_v10  ;;  %v4809_v13 = vadd.f32 1.0, %v2253_v25  ;;  %v2133_v35 = vmul.f32 %v2132_v41, %v4329_v57  ;;  %v2172_v61 = vadd.f32 0.4994258, %v2171_v8 }
 0x2fd   :  { %v2601_v49 = vadd.f32 1.0, %v2802_v34  ;;  %v2799_v22 = vclamps-f32 %v2229_v1, 1.0  ;;  %v2052_v14 = vadd.f32 0.4994258, %v2051_v46  ;;  %v2090_v60 = vadd.f32 0.112945676, %v2089_v23 }
 0x2fe   :  { %v1931_v38 = vmul.f32 0.5, %v4444_v52  ;;  %v2602_v44 = vadd.f32 1.0, %v2803_v11  ;;  %v4817_v59 = vmul.f32 %v4759_v37, %v4483_v3  ;;  %2914 = vrcp.f32 %v4809_v13 }
 0x2ff   :  { %2640 = vmatpush.bf16.xpose.msrb.mxu0 %v2631_v2  ;;  %v4821_v10 = vmul.f32 %v2601_v49, %v4494_v36  ;;  %v4823_v57 = vadd.f32 1.0, %v2133_v35  ;;  %v2173_v12 = vmul.f32 %v2172_v61, %v4347_v53  ;;  %v1965_v6 = vmul.f32 3.8918573e-05, %v4355_v9 }
 0x300   :  { %v2619_v52 = vmul.f32 %v4757_v47, %v1931_v38  ;;  %v2264_v27 = vand.u32 2147483647, %v4809_v13  ;;  %v2053_v11 = vmul.f32 %v2052_v14, %v4296_v51  ;;  %v2091_v3 = vmul.f32 %v2090_v60, %v4333_v62 }
 0x301   :  { %v2629_v37 = vpack.c.bf16 %v4821_v10, %v4817_v59  ;;  %v2266_v36 = vand.u32 2147483648, %v4809_v13  ;;  %v2598_v54 = vadd.f32 1.0, %v2799_v22  ;;  %2916 = vrcp.f32 %v4823_v57 }
 0x302   :  { %v4837_v53 = vmul.f32 %v4470_v43, %v4314_v58  ;;  %v2618_v47 = vmul.f32 %v2602_v44, %v4505_v39  ;;  %v4840_v5 = vadd.f32 1.0, %v2173_v12  ;;  %v4842_v19 = vadd.f32 1.0, %v2053_v11 }
 0x303   :  { %v1926_v51 = vmul.f32 0.5, %v4291_v21  ;;  %v4846_v7 = vmul.f32 0.5, %v5035_v24  ;;  %v2092_v26 = vadd.f32 0.4994258, %v2091_v3  ;;  %v1966_v42 = vadd.f32 0.001143296, %v1965_v6 }
 0x304   :  { %v2915_v40 = vpop.eup %2914  ;;  %v2244_v29 = vmul.f32 %v5037_v48, %v5036_v17  ;;  %v2630_v4 = vpack.c.bf16 %v2619_v52, %v2618_v47  ;;  %vm2260_vm7 = vweird.f32 %v4809_v13  ;;  %2918 = vrcp.f32 %v4840_v5 }
 0x305   :  { %v2256_v58 = vmul.f32 %v2915_v40, %v4809_v13  ;;  %vm4853_vm8 = vcmp.eq.f32.partialorder %v2264_v27, 8.507059e+37  ;;  %v2267_v21 = vor.u32 1.1754944e-38, %v2266_v36  ;;  %v4857_v39 = vmul.f32 %v2598_v54, %v1926_v51 }
 0x306   :  { %vm2140_vm9 = vweird.f32 %v4823_v57  ;;  %v2144_v15 = vand.u32 2147483647, %v4823_v57  ;;  %v2146_v16 = vand.u32 2147483648, %v4823_v57  ;;  %2920 = vrcp.f32 %v4842_v19 }
 0x307   :  { %v2917_v18 = vpop.eup %2916  ;;  %2641 = vmatpush.bf16.xpose.msrb.mxu0 %v2630_v4  ;;  %v2257_v32 = vsub.f32 1.0, %v2256_v58  ;;  %v2184_v33 = vand.u32 2147483647, %v4840_v5  ;;  %v2093_v0 = vmul.f32 %v2092_v26, %v4333_v62  ;;  %v1967_v31 = vmul.f32 %v1966_v42, %v4355_v9  ;;  %v5047_v26 = vld [vmem:[#allocation18_spill] sm:$0xff]  ;;  %v5051_v62 = vld [vmem:[#allocation4_spill] sm:$0xff] }
 0x308   :  { %vm2261_vm10 = vweird.f32 %v2915_v40  ;;  %v2136_v30 = vmul.f32 %v2917_v18, %v4823_v57  ;;  %v2186_v56 = vand.u32 2147483648, %v4840_v5  ;;  %v2005_v63 = vmul.f32 3.8918573e-05, %v5040_v50 }
 0x309   :  { %v2258_v55 = vmul.f32 %v2915_v40, %v2257_v32  ;;  %v2064_v20 = vand.u32 2147483647, %v4842_v19  ;;  %v2066_v45 = vand.u32 2147483648, %v4842_v19  ;;  %v4871_v28 = vadd.f32 1.0, %v2093_v0  ;;  %vm2262_vm15 = vmor %vm2260_vm7, %vm2261_vm10 }
 0x30a   :  { %v2919_v25 = vpop.eup %2918  ;;  %v2137_v41 = vsub.f32 1.0, %v2136_v30  ;;  %vm4873_vm11 = vcmp.eq.f32.partialorder %v2144_v15, 8.507059e+37  ;;  %v2147_v8 = vor.u32 1.1754944e-38, %v2146_v16  ;;  %vm2180_vm12 = vweird.f32 %v4840_v5 }
 0x30b   :  { %v2259_v34 = vadd.f32 %v2915_v40, %v2258_v55  ;;  %v2176_v1 = vmul.f32 %v2919_v25, %v4840_v5  ;;  %vm4879_vm13 = vcmp.eq.f32.partialorder %v2184_v33, 8.507059e+37  ;;  %vm2060_vm14 = vweird.f32 %v4842_v19 }
 0x30c   :  { %2922 = vrcp.f32 %v4871_v28  ;;  %v1968_v23 = vadd.f32 0.014752088, %v1967_v31  ;;  %v2921_v2 = vpop.eup %2920  ;;  %v2138_v35 = vmul.f32 %v2917_v18, %v2137_v41  ;;  %vm2141_vm0 = vweird.f32 %v2917_v18 }
 0x30d   :  { %v2187_v61 = vor.u32 1.1754944e-38, %v2186_v56  ;;  %v2006_v49 = vadd.f32 0.001143296, %v2005_v63  ;;  %v2263_v22 = vsel %vm2262_vm15, %v2915_v40, %v2259_v34  ;;  %v2177_v14 = vsub.f32 1.0, %v2176_v1  ;;  %vm2142_vm3 = vmor %vm2140_vm9, %vm2141_vm0  ;;  %v5048_v63 = vld [vmem:[#allocation15_spill] sm:$0xff] }
 0x30e   :  { %v2056_v60 = vmul.f32 %v2921_v2, %v4842_v19  ;;  %vm4889_vm1 = vcmp.eq.f32.partialorder %v2064_v20, 8.507059e+37  ;;  %v2067_v44 = vor.u32 1.1754944e-38, %v2066_v45  ;;  %v2268_v12 = vsel %vm4853_vm8, %v2267_v21, %v2263_v22  ;;  %v5049_v45 = vld [vmem:[#allocation5_spill] sm:$0xff] }
 0x30f   :  { %v2139_v6 = vadd.f32 %v2917_v18, %v2138_v35  ;;  %vm2181_vm2 = vweird.f32 %v2919_v25  ;;  %v2104_v13 = vand.u32 2147483647, %v4871_v28  ;;  %2642 = vmatpush.bf16.xpose.msrb.mxu0 %v2629_v37  ;;  %v2269_v52 = vmul.f32 %v2268_v12, %v2244_v29  ;;  %v5052_v35 = vld [vmem:[#allocation16_spill] sm:$0xff] }
 0x310   :  { %v2178_v27 = vmul.f32 %v2919_v25, %v2177_v14  ;;  %v2057_v11 = vsub.f32 1.0, %v2056_v60  ;;  %v1969_v3 = vmul.f32 %v1968_v23, %v4355_v9  ;;  %vm2061_vm4 = vweird.f32 %v2921_v2  ;;  %vm2182_vm5 = vmor %vm2180_vm12, %vm2181_vm2 }
 0x311   :  { %v2143_v36 = vsel %vm2142_vm3, %v2917_v18, %v2139_v6  ;;  %v2106_v54 = vand.u32 2147483648, %v4871_v28  ;;  %v2007_v47 = vmul.f32 %v2006_v49, %v5040_v50  ;;  %v2800_v24 = vclamps-f32 %v2269_v52, 1.0  ;;  %vm2062_vm7 = vmor %vm2060_vm14, %vm2061_vm4 }
 0x312   :  { %v2923_v51 = vpop.eup %2922  ;;  %v2148_v59 = vsel %vm4873_vm11, %v2147_v8, %v2143_v36  ;;  %v2179_v10 = vadd.f32 %v2919_v25, %v2178_v27  ;;  %v2058_v37 = vmul.f32 %v2921_v2, %v2057_v11  ;;  %v1970_v40 = vadd.f32 0.112945676, %v1969_v3  ;;  %v5054_v27 = vld [vmem:[#allocation14_spill] sm:$0xff] }
 0x313   :  { %v2149_v57 = vmul.f32 %v2148_v59, %v5047_v26  ;;  %v2096_v42 = vmul.f32 %v2923_v51, %v4871_v28  ;;  %vm2101_vm6 = vweird.f32 %v2923_v51  ;;  %v2599_v17 = vadd.f32 1.0, %v2800_v24 }
 0x314   :  { %v2183_v48 = vsel %vm2182_vm5, %v2919_v25, %v2179_v10  ;;  %v2059_v29 = vadd.f32 %v2921_v2, %v2058_v37  ;;  %v2008_v4 = vadd.f32 0.014752088, %v2007_v47  ;;  %v1971_v5 = vmul.f32 %v1970_v40, %v4355_v9  ;;  %v5050_v25 = vld [vmem:[#allocation17_spill] sm:$0xff] }
 0x315   :  { %v2797_v58 = vclamps-f32 %v2149_v57, 1.0  ;;  %v2188_v43 = vsel %vm4879_vm13, %v2187_v61, %v2183_v48  ;;  %v2097_v21 = vsub.f32 1.0, %v2096_v42  ;;  %v2615_v15 = vmul.f32 %v2599_v17, %v4846_v7  ;;  %v2633_v42 = vld [vmem:[%s4959_s7] sm:$0xff] }
 0x316   :  { %v2189_v16 = vmul.f32 %v2188_v43, %v4837_v53  ;;  %v2063_v18 = vsel %vm2062_vm7, %v2921_v2, %v2059_v29  ;;  %v2009_v32 = vmul.f32 %v2008_v4, %v5040_v50  ;;  %v1972_v30 = vadd.f32 0.4994258, %v1971_v5 }
 0x317   :  { %v2596_v33 = vadd.f32 1.0, %v2797_v58  ;;  %v2068_v0 = vsel %vm4889_vm1, %v2067_v44, %v2063_v18  ;;  %v2098_v31 = vmul.f32 %v2923_v51, %v2097_v21  ;;  %v2628_v56 = vpack.c.bf16 %v2615_v15, %v4857_v39  ;;  %v5053_v44 = vld [vmem:[#allocation13_spill] sm:$0xff] }
 0x318   :  { %v2798_v19 = vclamps-f32 %v2189_v16, 1.0  ;;  %v2069_v55 = vmul.f32 %v2068_v0, %v5048_v63  ;;  %v2010_v20 = vadd.f32 0.112945676, %v2009_v32  ;;  %v2084_v7 = vmul.f32 %v5050_v25, %v5049_v45  ;;  %v5057_v16 = vld [vmem:[#allocation8_spill] sm:$0xff]  ;;  %v5058_v45 = vld [vmem:[#allocation11_spill] sm:$0xff] }
 0x319   :  { %v2099_v41 = vadd.f32 %v2923_v51, %v2098_v31  ;;  %vm2100_vm8 = vweird.f32 %v4871_v28  ;;  %v1973_v53 = vmul.f32 %v1972_v30, %v4355_v9  ;;  %v1925_v8 = vmul.f32 0.5, %v5051_v62  ;;  %2643 = vmatpush.bf16.xpose.msrb.mxu0 %v2628_v56 }
 0x31a   :  { %v2597_v34 = vadd.f32 1.0, %v2798_v19  ;;  %vm2102_vm9 = vmor %vm2100_vm8, %vm2101_vm6  ;;  %v2107_v1 = vor.u32 1.1754944e-38, %v2106_v54  ;;  %v2011_v39 = vmul.f32 %v2010_v20, %v5040_v50  ;;  %v2795_v46 = vclamps-f32 %v2069_v55, 1.0  ;;  %v5056_v54 = vld [vmem:[#allocation3_spill] sm:$0xff] }
 0x31b   :  { %v2103_v23 = vsel %vm2102_vm9, %v2923_v51, %v2099_v41  ;;  %vm2105_vm10 = vcmp.eq.f32.partialorder %v2104_v13, 8.507059e+37  ;;  %v1974_v2 = vadd.f32 1.0, %v1973_v53  ;;  %v2612_v61 = vmul.f32 %v2596_v33, %v5052_v35  ;;  %v5055_v13 = vld [vmem:[#allocation2_spill] sm:$0xff] }
 0x31c   :  { %v2613_v49 = vmul.f32 %v2597_v34, %v1925_v8  ;;  %v2108_v22 = vsel %vm2105_vm10, %v2107_v1, %v2103_v23  ;;  %v2012_v28 = vadd.f32 0.4994258, %v2011_v39  ;;  %v1961_v12 = vadd.f32 0.18741608, %v5053_v44  ;;  %v5059_v1 = vld [vmem:[#allocation6_spill] sm:$0xff] }
 0x31d   :  { %v2109_v14 = vmul.f32 %v2108_v22, %v2084_v7  ;;  %2924 = vrcp.f32 %v1974_v2  ;;  %v2594_v52 = vadd.f32 1.0, %v2795_v46  ;;  %v2000_v11 = vmul.f32 %v5054_v27, %v5040_v50  ;;  %v5060_v46 = vld [vmem:[#allocation9_spill] sm:$0xff]  ;;  %v2624_v22 = vld [vmem:[%s4960_s5] sm:$0xf] }
 0x31e   :  { %v2627_v60 = vpack.c.bf16 %v2613_v49, %v2612_v61  ;;  %v2013_v38 = vmul.f32 %v2012_v28, %v5040_v50  ;;  %v1922_v36 = vmul.f32 0.5, %v5055_v13  ;;  %v1923_v47 = vmul.f32 0.5, %v5056_v54 }
 0x31f   :  { %v2796_v6 = vclamps-f32 %v2109_v14, 1.0  ;;  %v1962_v59 = vmul.f32 %v1961_v12, %v4355_v9  ;;  %v2001_v26 = vadd.f32 0.18741608, %v2000_v11  ;;  %v2929_v48 = vmov 0  }
 0x320   :  { %v2014_v3 = vadd.f32 1.0, %v2013_v38  ;;  %v2610_v10 = vmul.f32 %v2594_v52, %v1922_v36  ;;  %2828 = vset.pattern.permute.xlu0 %v2929_v48  ;;  %v1986_v4 = vand.u32 2147483648, %v1974_v2  ;;  %v1984_v9 = vand.u32 2147483647, %v1974_v2 }
 0x321   :  { %v2595_v51 = vadd.f32 1.0, %v2796_v6  ;;  %2644 = vmatpush.bf16.xpose.msrb.mxu0 %v2627_v60  ;;  %v1963_v29 = vadd.f32 1.1283791, %v1962_v59  ;;  %2636 = vperm.xlu0 %2828, %v2633_v42   ;;  %v2002_v43 = vmul.f32 %v2001_v26, %v5040_v50  ;;  %vm1980_vm12 = vweird.f32 %v1974_v2 }
 0x322   :  { %2926 = vrcp.f32 %v2014_v3  ;;  %v1987_v32 = vor.u32 1.1754944e-38, %v1986_v4  ;;  %vm1985_vm14 = vcmp.eq.f32.partialorder %v1984_v9, 8.507059e+37  ;;  %v2026_v30 = vand.u32 2147483648, %v2014_v3 }
 0x323   :  { %v2925_v24 = vpop.eup %2924  ;;  %v2611_v37 = vmul.f32 %v2595_v51, %v1923_v47  ;;  %v1964_v18 = vmul.f32 %v1963_v29, %v5057_v16  ;;  %v2003_v0 = vadd.f32 1.1283791, %v2002_v43  ;;  %v2024_v50 = vand.u32 2147483647, %v2014_v3 }
 0x324   :  { %v1976_v57 = vmul.f32 %v2925_v24, %v1974_v2  ;;  %vm1981_vm11 = vweird.f32 %v2925_v24  ;;  %vm2020_vm0 = vweird.f32 %v2014_v3  ;;  %v2027_v20 = vor.u32 1.1754944e-38, %v2026_v30 }
 0x325   :  { %v2626_v40 = vpack.c.bf16 %v2611_v37, %v2610_v10  ;;  %vm1982_vm13 = vmor %vm1980_vm12, %vm1981_vm11  ;;  %v2004_v25 = vmul.f32 %v2003_v0, %v5058_v45  ;;  %vm2025_vm2 = vcmp.eq.f32.partialorder %v2024_v50, 8.507059e+37  ;;  %v1920_v39 = vmul.f32 0.5, %v5059_v1 }
 0x326   :  { %v1977_v17 = vsub.f32 1.0, %v1976_v57  ;;  %v1921_v23 = vmul.f32 0.5, %v5060_v46 }
 0x328   :  { %v2927_v58 = vpop.eup %2926  ;;  %v1978_v21 = vmul.f32 %v2925_v24, %v1977_v17 }
 0x329   :  { %v2016_v5 = vmul.f32 %v2927_v58, %v2014_v3  ;;  %2645 = vmatpush.bf16.xpose.msrb.mxu0 %v2626_v40  ;;  %vm2021_vm15 = vweird.f32 %v2927_v58 }
 0x32a   :  { %v1979_v15 = vadd.f32 %v2925_v24, %v1978_v21  ;;  %vm2022_vm1 = vmor %vm2020_vm0, %vm2021_vm15 }
 0x32b   :  { %v2017_v33 = vsub.f32 1.0, %v2016_v5 }
 0x32c   :  { %v1983_v31 = vsel %vm1982_vm13, %v2925_v24, %v1979_v15 }
 0x32d   :  { %v1988_v56 = vsel %vm1985_vm14, %v1987_v32, %v1983_v31  ;;  %v2018_v19 = vmul.f32 %v2927_v58, %v2017_v33 }
 0x32e   :  { %v1989_v63 = vmul.f32 %v1988_v56, %v1964_v18 }
 0x32f   :  { %v2019_v55 = vadd.f32 %v2927_v58, %v2018_v19 }
 0x330   :  { %v2793_v7 = vclamps-f32 %v1989_v63, 1.0 }
 0x331   :  { %v2023_v41 = vsel %vm2022_vm1, %v2927_v58, %v2019_v55 }
 0x332   :  { %v2028_v53 = vsel %vm2025_vm2, %v2027_v20, %v2023_v41  ;;  %v2592_v34 = vadd.f32 1.0, %v2793_v7 }
 0x333   :  { %v2029_v62 = vmul.f32 %v2028_v53, %v2004_v25 }
 0x334   :  { %v2608_v35 = vmul.f32 %v2592_v34, %v1920_v39 }
 0x335   :  { %v2794_v8 = vclamps-f32 %v2029_v62, 1.0 }
 0x337   :  { %v2593_v2 = vadd.f32 1.0, %v2794_v8 }
 0x339   :  { %v2609_v61 = vmul.f32 %v2593_v2, %v1921_v23 }
 0x33b   :  { %v2625_v49 = vpack.c.bf16 %v2609_v61, %v2608_v35 }
 0x33d   :  { %2646 = vmatpush.bf16.xpose.msrb.mxu0 %v2625_v49 }
 0x344   :  { %2647 = vmatmul.bf16.vlgmr.msrb.gmra.mxu0 %v2624_v22 }
 0x393   :  { %v2637_v28 = vpop.permute.xlu0 %2636 }
 0x3c1   :  { %v2648_v14 = vpop.f32.mrf.mxu0 }
 0x3c2   :  { %v2649_v60 = vadd.f32 %v2648_v14, %v2637_v28 }
 0x3c4   :  { %2652 = vst [vmem:[%s4961_s8] sm:$0xff] %v2649_v60 }
 0x3c9   :  { %v2650_v38 = vpop.f32.mrf.mxu0 }

</bundles_post_ra>
